<compile_context>
chip_gen: v7x
topology: tpu7x:2x2x1
jax: 0.10.0
libtpu: 0.0.40
codegen_flags: <defaults>
</compile_context>

<pallas_src>
import functools

import jax
import jax.numpy as jnp
from jax.experimental import pallas as pl
from jax.experimental.pallas import tpu as pltpu


def _round_up(x, m):
    return (x + m - 1) // m * m


# ---------------------------------------------------------------------------
# Fused Pallas kernel: the whole dense block for ONE batch element.
# ---------------------------------------------------------------------------
def _dense_block_kernel(*refs, C0p, G, L, K, H, W, base, Cp_list, Kpad_list,
                        R, cdtype):
    x_ref, masks_ref = refs[0], refs[1]
    layer_refs = refs[2:2 + 2 * L]                 # (w0, b0, ..., w_{L-1}, b_{L-1})
    wc_ref, bc_ref = refs[2 + 2 * L], refs[3 + 2 * L]
    o_ref = refs[4 + 2 * L]
    feat, xcol = refs[5 + 2 * L], refs[6 + 2 * L]  # VMEM scratch

    HW = H * W
    half = K // 2

    # (Re)initialize the zero-padded flat feature buffer.  The zero lanes give
    # the vertical "same"-padding for free; zero rows pad channels to 8/128.
    feat[...] = jnp.zeros_like(feat)
    feat[0:C0p, base:base + HW] = x_ref[0]

    for l in range(L):
        Cp = Cp_list[l]              # feature-buffer rows consumed (mult of 8)
        Kd = K * K * Cp              # un-padded contraction size
        Kp = Kpad_list[l]            # contraction padded to a multiple of 128
        w_ref = layer_refs[2 * l]
        b_ref = layer_refs[2 * l + 1]

        # im2col in VMEM: tap (dy, dx) is a static lane-shifted slice of the
        # padded flat buffer; horizontal overruns are zeroed by the edge mask.
        for dy in range(K):
            for dx in range(K):
                t = dy * K + dx
                s = (dy - half) * W + (dx - half)
                v = feat[0:Cp, base + s:base + s + HW]
                if dx != half:
                    v = v * masks_ref[dx:dx + 1, :]
                xcol[t * Cp:(t + 1) * Cp, :] = v.astype(cdtype)
        if Kp > Kd:                                   # zero the K-padding rows
            xcol[Kd:Kp, :] = jnp.zeros((Kp - Kd, HW), cdtype)

        # One lane-dense MXU matmul per layer: (G, Kp) @ (Kp, HW), f32 accum.
        acc = jnp.dot(w_ref[...], xcol[0:Kp, :],
                      preferred_element_type=jnp.float32)
        acc = jnp.maximum(acc + b_ref[...], 0.0)       # bias + ReLU (epilogue)

        # Append the new feature to the dense feature buffer (stays in VMEM).
        off = C0p + l * G
        feat[off:off + G, base:base + HW] = acc

    # 1x1 "compress" conv over all concatenated features (no ReLU).
    fall = feat[0:R, base:base + HW].astype(cdtype)     # (R, HW), R % 128 == 0
    out = jnp.dot(wc_ref[...], fall, preferred_element_type=jnp.float32)
    o_ref[0] = (out + bc_ref[...]).astype(o_ref.dtype)


# ---------------------------------------------------------------------------
# Host-side weight packing (tiny; folds into the surrounding jit).
# ---------------------------------------------------------------------------
def _pack_layer_weight(w, C0, C0p, compute_dtype):
    """w: (G, Cin, K, K) OIHW conv weight -> (G, Kpad) matmul weight."""
    G, Cin, K, _ = w.shape
    Cp = Cin + (C0p - C0)
    wt = jnp.transpose(w, (2, 3, 1, 0)).reshape(K * K, Cin, G)   # (tap, c, g)
    zpad = jnp.zeros((K * K, C0p - C0, G), w.dtype)
    wp = jnp.concatenate([wt[:, :C0, :], zpad, wt[:, C0:, :]], axis=1)
    wp = wp.reshape(K * K * Cp, G).T                             # (G, K*K*Cp)
    Kpad = _round_up(K * K * Cp, 128)
    wp = jnp.pad(wp, ((0, 0), (0, Kpad - K * K * Cp)))
    return wp.astype(compute_dtype)


def _pack_compress_weight(wc, C0, C0p, R, compute_dtype):
    """wc: (Cout, Ctot, 1, 1) -> (Coutp, R) matmul weight over buffer rows."""
    Cout, Ctot = wc.shape[0], wc.shape[1]
    Coutp = _round_up(Cout, 8)
    w2 = wc.reshape(Cout, Ctot)
    wz = jnp.zeros((Cout, C0p - C0), wc.dtype)
    wp = jnp.concatenate([w2[:, :C0], wz, w2[:, C0:]], axis=1)
    wp = jnp.pad(wp, ((0, Coutp - Cout), (0, R - wp.shape[1])))
    return wp.astype(compute_dtype)


# ---------------------------------------------------------------------------
# Public forward (NCHW in / NCHW out, like the PyTorch module).
# ---------------------------------------------------------------------------
def dense_block_forward(x, params, *, compute_dtype=jnp.bfloat16):
    N, C0, H, W = x.shape
    layers = params["layers"]
    wc, bc = params["compress"]
    L = len(layers)
    G = layers[0][0].shape[0]
    K = layers[0][0].shape[2]
    assert G % 8 == 0, "growth_rate must be a multiple of 8 for this kernel"

    HW = H * W
    C0p = _round_up(C0, 8)
    Coutp = _round_up(wc.shape[0], 8)
    R = _round_up(C0p + L * G, 128)              # feature rows == compress K
    base = _round_up(max(128, (K // 2) * (W + 1)), 128)
    featW = 2 * base + HW
    Cp_list = tuple(C0p + l * G for l in range(L))
    Kpad_list = tuple(_round_up(K * K * cp, 128) for cp in Cp_list)
    half = K // 2

    # Input: NCHW -> (N, C0p, H*W) flat spatial, channel rows padded to 8.
    x_flat = jnp.pad(x.reshape(N, C0, HW), ((0, 0), (0, C0p - C0), (0, 0)))

    # 0/1 horizontal edge masks per tap-column offset dx.
    xs_col = jnp.arange(HW, dtype=jnp.int32) % W
    masks = jnp.stack(
        [((xs_col + (d - half) >= 0) & (xs_col + (d - half) < W))
         .astype(jnp.float32) for d in range(K)], axis=0)        # (K, HW)

    packed = []
    for (w, b) in layers:
        packed.append(_pack_layer_weight(w, C0, C0p, compute_dtype))
        packed.append(b.reshape(-1, 1).astype(jnp.float32))
    packed.append(_pack_compress_weight(wc, C0, C0p, R, compute_dtype))
    packed.append(jnp.pad(bc, (0, Coutp - bc.shape[0]))
                  .reshape(Coutp, 1).astype(jnp.float32))

    kernel = functools.partial(
        _dense_block_kernel, C0p=C0p, G=G, L=L, K=K, H=H, W=W, base=base,
        Cp_list=Cp_list, Kpad_list=Kpad_list, R=R, cdtype=compute_dtype)

    in_specs = [pl.BlockSpec((1, C0p, HW), lambda n: (n, 0, 0)),   # x
                pl.BlockSpec((K, HW), lambda n: (0, 0))]           # edge masks
    for l in range(L):
        in_specs.append(pl.BlockSpec((G, Kpad_list[l]), lambda n: (0, 0)))
        in_specs.append(pl.BlockSpec((G, 1), lambda n: (0, 0)))
    in_specs.append(pl.BlockSpec((Coutp, R), lambda n: (0, 0)))
    in_specs.append(pl.BlockSpec((Coutp, 1), lambda n: (0, 0)))

    out = pl.pallas_call(
        kernel,
        out_shape=jax.ShapeDtypeStruct((N, Coutp, HW), jnp.float32),
        grid=(N,),
        in_specs=in_specs,
        out_specs=pl.BlockSpec((1, Coutp, HW), lambda n: (n, 0, 0)),
        scratch_shapes=[
            pltpu.VMEM((R, featW), jnp.float32),          # padded feature slab
            pltpu.VMEM((max(Kpad_list), HW), compute_dtype),  # im2col slab
        ],
        compiler_params=pltpu.CompilerParams(
            dimension_semantics=("parallel",)),
    )(x_flat, masks, *packed)

    Cout = wc.shape[0]
    return out[:, :Cout, :].reshape(N, Cout, H, W)


# ---------------------------------------------------------------------------
# Parameter init (PyTorch Conv2d default: uniform +-1/sqrt(fan_in), OIHW).
# ---------------------------------------------------------------------------
def init_dense_block_params(key, channels, num_layers=4, growth_rate=16,
                            kernel_size=3):
    params = {"layers": [], "compress": None}
    c = channels
    for _ in range(num_layers):
        key, wk, bk = jax.random.split(key, 3)
        fan_in = c * kernel_size * kernel_size
        bound = 1.0 / float(fan_in) ** 0.5
        w = jax.random.uniform(wk, (growth_rate, c, kernel_size, kernel_size),
                               jnp.float32, -bound, bound)
        b = jax.random.uniform(bk, (growth_rate,), jnp.float32, -bound, bound)
        params["layers"].append((w, b))
        c += growth_rate
    key, wk, bk = jax.random.split(key, 3)
    cout = c - num_layers * growth_rate
    bound = 1.0 / float(c) ** 0.5
    wc = jax.random.uniform(wk, (cout, c, 1, 1), jnp.float32, -bound, bound)
    bc = jax.random.uniform(bk, (cout,), jnp.float32, -bound, bound)
    params["compress"] = (wc, bc)
    return params


# ---------------------------------------------------------------------------
# Pure-JAX reference (f32, HIGHEST precision) for correctness checking.
# ---------------------------------------------------------------------------
def _ref_forward(x, params):
    dn = ("NCHW", "OIHW", "NCHW")
    hi = jax.lax.Precision.HIGHEST
    feats = [x]
    for (w, b) in params["layers"]:
        inp = jnp.concatenate(feats, axis=1)
        y = jax.lax.conv_general_dilated(inp, w, (1, 1), "SAME",
                                         dimension_numbers=dn, precision=hi)
        feats.append(jnp.maximum(y + b.reshape(1, -1, 1, 1), 0.0))
    inp = jnp.concatenate(feats, axis=1)
    wc, bc = params["compress"]
    y = jax.lax.conv_general_dilated(inp, wc, (1, 1), "VALID",
                                     dimension_numbers=dn, precision=hi)
    return y + bc.reshape(1, -1, 1, 1)


if __name__ == "__main__":
    key = jax.random.PRNGKey(0)
    key, xkey, pkey = jax.random.split(key, 3)

    # Small shapes consistent with the module: N=2, C=4, H=W=16.
    x = jax.random.normal(xkey, (2, 4, 16, 16), jnp.float32)
    params = init_dense_block_params(pkey, channels=4, num_layers=4,
                                     growth_rate=16, kernel_size=3)

    fwd = jax.jit(dense_block_forward)
    out = jax.block_until_ready(fwd(x, params))
    ref = jax.block_until_ready(_ref_forward(x, params))

    assert out.shape == (2, 4, 16, 16), out.shape
    # bf16 MXU operands with f32 accumulation -> bf16-level tolerance.
    assert jnp.allclose(out, ref, atol=2e-2, rtol=2e-2), (
        float(jnp.max(jnp.abs(out - ref))))
    print("KERNEL_OK")
</pallas_src>

<mosaic_0001>
module attributes {stable_mosaic.version = 11 : i64} {
  func.func @_dense_block_kernel(%arg0: i32, %arg1: memref<1x8x256xf32, #tpu.memory_space<vmem>>, %arg2: memref<3x256xf32, #tpu.memory_space<vmem>>, %arg3: memref<16x128xbf16, #tpu.memory_space<vmem>>, %arg4: memref<16x1xf32, #tpu.memory_space<vmem>>, %arg5: memref<16x256xbf16, #tpu.memory_space<vmem>>, %arg6: memref<16x1xf32, #tpu.memory_space<vmem>>, %arg7: memref<16x384xbf16, #tpu.memory_space<vmem>>, %arg8: memref<16x1xf32, #tpu.memory_space<vmem>>, %arg9: memref<16x512xbf16, #tpu.memory_space<vmem>>, %arg10: memref<16x1xf32, #tpu.memory_space<vmem>>, %arg11: memref<8x128xbf16, #tpu.memory_space<vmem>>, %arg12: memref<8x1xf32, #tpu.memory_space<vmem>>, %arg13: memref<1x8x256xf32, #tpu.memory_space<vmem>>, %arg14: memref<128x512xf32, #tpu.memory_space<vmem>>, %arg15: memref<512x256xbf16, #tpu.memory_space<vmem>>) attributes {dimension_semantics = [#tpu.dimension_semantics<parallel>], iteration_bounds = array<i64: 2>, scalar_prefetch = 0 : i64, scratch_operands = 2 : i64, tpu.core_type = #tpu.core_type<tc>, window_params = [{transform_indices = @transform_0, window_bounds = array<i64: 1, 8, 256>}, {pipeline_mode = #tpu.pipeline_mode<synchronous>, transform_indices = @transform_1, window_bounds = array<i64: 3, 256>}, {pipeline_mode = #tpu.pipeline_mode<synchronous>, transform_indices = @transform_2, window_bounds = array<i64: 16, 128>}, {pipeline_mode = #tpu.pipeline_mode<synchronous>, transform_indices = @transform_3, window_bounds = array<i64: 16, 1>}, {pipeline_mode = #tpu.pipeline_mode<synchronous>, transform_indices = @transform_4, window_bounds = array<i64: 16, 256>}, {pipeline_mode = #tpu.pipeline_mode<synchronous>, transform_indices = @transform_5, window_bounds = array<i64: 16, 1>}, {pipeline_mode = #tpu.pipeline_mode<synchronous>, transform_indices = @transform_6, window_bounds = array<i64: 16, 384>}, {pipeline_mode = #tpu.pipeline_mode<synchronous>, transform_indices = @transform_7, window_bounds = array<i64: 16, 1>}, {pipeline_mode = #tpu.pipeline_mode<synchronous>, transform_indices = @transform_8, window_bounds = array<i64: 16, 512>}, {pipeline_mode = #tpu.pipeline_mode<synchronous>, transform_indices = @transform_9, window_bounds = array<i64: 16, 1>}, {pipeline_mode = #tpu.pipeline_mode<synchronous>, transform_indices = @transform_10, window_bounds = array<i64: 8, 128>}, {pipeline_mode = #tpu.pipeline_mode<synchronous>, transform_indices = @transform_11, window_bounds = array<i64: 8, 1>}, {transform_indices = @transform_12, window_bounds = array<i64: 1, 8, 256>}]} {
    %cst = arith.constant 0.000000e+00 : f32
    %0 = vector.broadcast %cst : f32 to vector<128x512xf32>
    %c0 = arith.constant 0 : index
    %c0_0 = arith.constant 0 : index
    %1 = vector.load %arg14[%c0, %c0_0] : memref<128x512xf32, #tpu.memory_space<vmem>>, vector<128x512xf32>
    tpu.vector_store %arg14[%c0, %c0_0], %0 {strides = array<i32>} : memref<128x512xf32, #tpu.memory_space<vmem>>, vector<128x512xf32>,
    %c0_1 = arith.constant 0 : index
    %c0_2 = arith.constant 0 : index
    %c0_3 = arith.constant 0 : index
    %2 = vector.load %arg1[%c0_1, %c0_2, %c0_3] : memref<1x8x256xf32, #tpu.memory_space<vmem>>, vector<1x8x256xf32>
    %3 = vector.shape_cast %2 : vector<1x8x256xf32> to vector<8x256xf32>
    %c0_4 = arith.constant 0 : index
    %c128 = arith.constant 128 : index
    %4 = vector.load %arg14[%c0_4, %c128] : memref<128x512xf32, #tpu.memory_space<vmem>>, vector<8x256xf32>
    tpu.vector_store %arg14[%c0_4, %c128], %3 {strides = array<i32>} : memref<128x512xf32, #tpu.memory_space<vmem>>, vector<8x256xf32>,
    %c0_5 = arith.constant 0 : index
    %c111 = arith.constant 111 : index
    %5 = vector.load %arg14[%c0_5, %c111] : memref<128x512xf32, #tpu.memory_space<vmem>>, vector<8x256xf32>
    %c0_6 = arith.constant 0 : index
    %c0_7 = arith.constant 0 : index
    %6 = vector.load %arg2[%c0_6, %c0_7] : memref<3x256xf32, #tpu.memory_space<vmem>>, vector<1x256xf32>
    %7 = vector.broadcast %6 : vector<1x256xf32> to vector<8x256xf32>
    %8 = arith.mulf %5, %7 : vector<8x256xf32>
    %9 = arith.truncf %8 : vector<8x256xf32> to vector<8x256xbf16>
    %c0_8 = arith.constant 0 : index
    %c0_9 = arith.constant 0 : index
    %10 = vector.load %arg15[%c0_8, %c0_9] : memref<512x256xbf16, #tpu.memory_space<vmem>>, vector<8x256xbf16>
    tpu.vector_store %arg15[%c0_8, %c0_9], %9 {strides = array<i32>} : memref<512x256xbf16, #tpu.memory_space<vmem>>, vector<8x256xbf16>,
    %c0_10 = arith.constant 0 : index
    %c112 = arith.constant 112 : index
    %11 = vector.load %arg14[%c0_10, %c112] : memref<128x512xf32, #tpu.memory_space<vmem>>, vector<8x256xf32>
    %12 = arith.truncf %11 : vector<8x256xf32> to vector<8x256xbf16>
    %c8 = arith.constant 8 : index
    %c0_11 = arith.constant 0 : index
    %13 = vector.load %arg15[%c8, %c0_11] : memref<512x256xbf16, #tpu.memory_space<vmem>>, vector<8x256xbf16>
    tpu.vector_store %arg15[%c8, %c0_11], %12 {strides = array<i32>} : memref<512x256xbf16, #tpu.memory_space<vmem>>, vector<8x256xbf16>,
    %c0_12 = arith.constant 0 : index
    %c113 = arith.constant 113 : index
    %14 = vector.load %arg14[%c0_12, %c113] : memref<128x512xf32, #tpu.memory_space<vmem>>, vector<8x256xf32>
    %c2 = arith.constant 2 : index
    %c0_13 = arith.constant 0 : index
    %15 = vector.load %arg2[%c2, %c0_13] : memref<3x256xf32, #tpu.memory_space<vmem>>, vector<1x256xf32>
    %16 = vector.broadcast %15 : vector<1x256xf32> to vector<8x256xf32>
    %17 = arith.mulf %14, %16 : vector<8x256xf32>
    %18 = arith.truncf %17 : vector<8x256xf32> to vector<8x256xbf16>
    %c16 = arith.constant 16 : index
    %c0_14 = arith.constant 0 : index
    %19 = vector.load %arg15[%c16, %c0_14] : memref<512x256xbf16, #tpu.memory_space<vmem>>, vector<8x256xbf16>
    tpu.vector_store %arg15[%c16, %c0_14], %18 {strides = array<i32>} : memref<512x256xbf16, #tpu.memory_space<vmem>>, vector<8x256xbf16>,
    %c0_15 = arith.constant 0 : index
    %c127 = arith.constant 127 : index
    %20 = vector.load %arg14[%c0_15, %c127] : memref<128x512xf32, #tpu.memory_space<vmem>>, vector<8x256xf32>
    %c0_16 = arith.constant 0 : index
    %c0_17 = arith.constant 0 : index
    %21 = vector.load %arg2[%c0_16, %c0_17] : memref<3x256xf32, #tpu.memory_space<vmem>>, vector<1x256xf32>
    %22 = vector.broadcast %21 : vector<1x256xf32> to vector<8x256xf32>
    %23 = arith.mulf %20, %22 : vector<8x256xf32>
    %24 = arith.truncf %23 : vector<8x256xf32> to vector<8x256xbf16>
    %c24 = arith.constant 24 : index
    %c0_18 = arith.constant 0 : index
    %25 = vector.load %arg15[%c24, %c0_18] : memref<512x256xbf16, #tpu.memory_space<vmem>>, vector<8x256xbf16>
    tpu.vector_store %arg15[%c24, %c0_18], %24 {strides = array<i32>} : memref<512x256xbf16, #tpu.memory_space<vmem>>, vector<8x256xbf16>,
    %c0_19 = arith.constant 0 : index
    %c128_20 = arith.constant 128 : index
    %26 = vector.load %arg14[%c0_19, %c128_20] : memref<128x512xf32, #tpu.memory_space<vmem>>, vector<8x256xf32>
    %27 = arith.truncf %26 : vector<8x256xf32> to vector<8x256xbf16>
    %c32 = arith.constant 32 : index
    %c0_21 = arith.constant 0 : index
    %28 = vector.load %arg15[%c32, %c0_21] : memref<512x256xbf16, #tpu.memory_space<vmem>>, vector<8x256xbf16>
    tpu.vector_store %arg15[%c32, %c0_21], %27 {strides = array<i32>} : memref<512x256xbf16, #tpu.memory_space<vmem>>, vector<8x256xbf16>,
    %c0_22 = arith.constant 0 : index
    %c129 = arith.constant 129 : index
    %29 = vector.load %arg14[%c0_22, %c129] : memref<128x512xf32, #tpu.memory_space<vmem>>, vector<8x256xf32>
    %c2_23 = arith.constant 2 : index
    %c0_24 = arith.constant 0 : index
    %30 = vector.load %arg2[%c2_23, %c0_24] : memref<3x256xf32, #tpu.memory_space<vmem>>, vector<1x256xf32>
    %31 = vector.broadcast %30 : vector<1x256xf32> to vector<8x256xf32>
    %32 = arith.mulf %29, %31 : vector<8x256xf32>
    %33 = arith.truncf %32 : vector<8x256xf32> to vector<8x256xbf16>
    %c40 = arith.constant 40 : index
    %c0_25 = arith.constant 0 : index
    %34 = vector.load %arg15[%c40, %c0_25] : memref<512x256xbf16, #tpu.memory_space<vmem>>, vector<8x256xbf16>
    tpu.vector_store %arg15[%c40, %c0_25], %33 {strides = array<i32>} : memref<512x256xbf16, #tpu.memory_space<vmem>>, vector<8x256xbf16>,
    %c0_26 = arith.constant 0 : index
    %c143 = arith.constant 143 : index
    %35 = vector.load %arg14[%c0_26, %c143] : memref<128x512xf32, #tpu.memory_space<vmem>>, vector<8x256xf32>
    %c0_27 = arith.constant 0 : index
    %c0_28 = arith.constant 0 : index
    %36 = vector.load %arg2[%c0_27, %c0_28] : memref<3x256xf32, #tpu.memory_space<vmem>>, vector<1x256xf32>
    %37 = vector.broadcast %36 : vector<1x256xf32> to vector<8x256xf32>
    %38 = arith.mulf %35, %37 : vector<8x256xf32>
    %39 = arith.truncf %38 : vector<8x256xf32> to vector<8x256xbf16>
    %c48 = arith.constant 48 : index
    %c0_29 = arith.constant 0 : index
    %40 = vector.load %arg15[%c48, %c0_29] : memref<512x256xbf16, #tpu.memory_space<vmem>>, vector<8x256xbf16>
    tpu.vector_store %arg15[%c48, %c0_29], %39 {strides = array<i32>} : memref<512x256xbf16, #tpu.memory_space<vmem>>, vector<8x256xbf16>,
    %c0_30 = arith.constant 0 : index
    %c144 = arith.constant 144 : index
    %41 = vector.load %arg14[%c0_30, %c144] : memref<128x512xf32, #tpu.memory_space<vmem>>, vector<8x256xf32>
    %42 = arith.truncf %41 : vector<8x256xf32> to vector<8x256xbf16>
    %c56 = arith.constant 56 : index
    %c0_31 = arith.constant 0 : index
    %43 = vector.load %arg15[%c56, %c0_31] : memref<512x256xbf16, #tpu.memory_space<vmem>>, vector<8x256xbf16>
    tpu.vector_store %arg15[%c56, %c0_31], %42 {strides = array<i32>} : memref<512x256xbf16, #tpu.memory_space<vmem>>, vector<8x256xbf16>,
    %c0_32 = arith.constant 0 : index
    %c145 = arith.constant 145 : index
    %44 = vector.load %arg14[%c0_32, %c145] : memref<128x512xf32, #tpu.memory_space<vmem>>, vector<8x256xf32>
    %c2_33 = arith.constant 2 : index
    %c0_34 = arith.constant 0 : index
    %45 = vector.load %arg2[%c2_33, %c0_34] : memref<3x256xf32, #tpu.memory_space<vmem>>, vector<1x256xf32>
    %46 = vector.broadcast %45 : vector<1x256xf32> to vector<8x256xf32>
    %47 = arith.mulf %44, %46 : vector<8x256xf32>
    %48 = arith.truncf %47 : vector<8x256xf32> to vector<8x256xbf16>
    %c64 = arith.constant 64 : index
    %c0_35 = arith.constant 0 : index
    %49 = vector.load %arg15[%c64, %c0_35] : memref<512x256xbf16, #tpu.memory_space<vmem>>, vector<8x256xbf16>
    tpu.vector_store %arg15[%c64, %c0_35], %48 {strides = array<i32>} : memref<512x256xbf16, #tpu.memory_space<vmem>>, vector<8x256xbf16>,
    %cst_36 = arith.constant 0.000000e+00 : bf16
    %50 = vector.broadcast %cst_36 : bf16 to vector<56x256xbf16>
    %c72 = arith.constant 72 : index
    %c0_37 = arith.constant 0 : index
    %51 = vector.load %arg15[%c72, %c0_37] : memref<512x256xbf16, #tpu.memory_space<vmem>>, vector<56x256xbf16>
    tpu.vector_store %arg15[%c72, %c0_37], %50 {strides = array<i32>} : memref<512x256xbf16, #tpu.memory_space<vmem>>, vector<56x256xbf16>,
    %c0_38 = arith.constant 0 : index
    %c0_39 = arith.constant 0 : index
    %52 = vector.load %arg3[%c0_38, %c0_39] : memref<16x128xbf16, #tpu.memory_space<vmem>>, vector<16x128xbf16>
    %c0_40 = arith.constant 0 : index
    %c0_41 = arith.constant 0 : index
    %53 = vector.load %arg15[%c0_40, %c0_41] : memref<512x256xbf16, #tpu.memory_space<vmem>>, vector<128x256xbf16>
    %cst_42 = arith.constant dense<0.000000e+00> : vector<16x256xf32>
    %54 = tpu.matmul %52, %53, %cst_42 {dimension_numbers = #tpu.dot_dimension_numbers<[1], [0], [0], [1], [0, 0, 1, 1], [], []>} : vector<16x128xbf16>, vector<128x256xbf16>, vector<16x256xf32> -> vector<16x256xf32>
    %c0_43 = arith.constant 0 : index
    %c0_44 = arith.constant 0 : index
    %55 = vector.load %arg4[%c0_43, %c0_44] : memref<16x1xf32, #tpu.memory_space<vmem>>, vector<16x1xf32>
    %56 = vector.broadcast %55 : vector<16x1xf32> to vector<16x256xf32>
    %57 = arith.addf %54, %56 : vector<16x256xf32>
    %cst_45 = arith.constant 0.000000e+00 : f32
    %58 = vector.broadcast %cst_45 : f32 to vector<16x256xf32>
    %59 = arith.maximumf %57, %58 : vector<16x256xf32>
    %c8_46 = arith.constant 8 : index
    %c128_47 = arith.constant 128 : index
    %60 = vector.load %arg14[%c8_46, %c128_47] : memref<128x512xf32, #tpu.memory_space<vmem>>, vector<16x256xf32>
    tpu.vector_store %arg14[%c8_46, %c128_47], %59 {strides = array<i32>} : memref<128x512xf32, #tpu.memory_space<vmem>>, vector<16x256xf32>,
    %c0_48 = arith.constant 0 : index
    %c111_49 = arith.constant 111 : index
    %61 = vector.load %arg14[%c0_48, %c111_49] : memref<128x512xf32, #tpu.memory_space<vmem>>, vector<24x256xf32>
    %c0_50 = arith.constant 0 : index
    %c0_51 = arith.constant 0 : index
    %62 = vector.load %arg2[%c0_50, %c0_51] : memref<3x256xf32, #tpu.memory_space<vmem>>, vector<1x256xf32>
    %63 = vector.broadcast %62 : vector<1x256xf32> to vector<24x256xf32>
    %64 = arith.mulf %61, %63 : vector<24x256xf32>
    %65 = arith.truncf %64 : vector<24x256xf32> to vector<24x256xbf16>
    %c0_52 = arith.constant 0 : index
    %c0_53 = arith.constant 0 : index
    %66 = vector.load %arg15[%c0_52, %c0_53] : memref<512x256xbf16, #tpu.memory_space<vmem>>, vector<24x256xbf16>
    tpu.vector_store %arg15[%c0_52, %c0_53], %65 {strides = array<i32>} : memref<512x256xbf16, #tpu.memory_space<vmem>>, vector<24x256xbf16>,
    %c0_54 = arith.constant 0 : index
    %c112_55 = arith.constant 112 : index
    %67 = vector.load %arg14[%c0_54, %c112_55] : memref<128x512xf32, #tpu.memory_space<vmem>>, vector<24x256xf32>
    %68 = arith.truncf %67 : vector<24x256xf32> to vector<24x256xbf16>
    %c24_56 = arith.constant 24 : index
    %c0_57 = arith.constant 0 : index
    %69 = vector.load %arg15[%c24_56, %c0_57] : memref<512x256xbf16, #tpu.memory_space<vmem>>, vector<24x256xbf16>
    tpu.vector_store %arg15[%c24_56, %c0_57], %68 {strides = array<i32>} : memref<512x256xbf16, #tpu.memory_space<vmem>>, vector<24x256xbf16>,
    %c0_58 = arith.constant 0 : index
    %c113_59 = arith.constant 113 : index
    %70 = vector.load %arg14[%c0_58, %c113_59] : memref<128x512xf32, #tpu.memory_space<vmem>>, vector<24x256xf32>
    %c2_60 = arith.constant 2 : index
    %c0_61 = arith.constant 0 : index
    %71 = vector.load %arg2[%c2_60, %c0_61] : memref<3x256xf32, #tpu.memory_space<vmem>>, vector<1x256xf32>
    %72 = vector.broadcast %71 : vector<1x256xf32> to vector<24x256xf32>
    %73 = arith.mulf %70, %72 : vector<24x256xf32>
    %74 = arith.truncf %73 : vector<24x256xf32> to vector<24x256xbf16>
    %c48_62 = arith.constant 48 : index
    %c0_63 = arith.constant 0 : index
    %75 = vector.load %arg15[%c48_62, %c0_63] : memref<512x256xbf16, #tpu.memory_space<vmem>>, vector<24x256xbf16>
    tpu.vector_store %arg15[%c48_62, %c0_63], %74 {strides = array<i32>} : memref<512x256xbf16, #tpu.memory_space<vmem>>, vector<24x256xbf16>,
    %c0_64 = arith.constant 0 : index
    %c127_65 = arith.constant 127 : index
    %76 = vector.load %arg14[%c0_64, %c127_65] : memref<128x512xf32, #tpu.memory_space<vmem>>, vector<24x256xf32>
    %c0_66 = arith.constant 0 : index
    %c0_67 = arith.constant 0 : index
    %77 = vector.load %arg2[%c0_66, %c0_67] : memref<3x256xf32, #tpu.memory_space<vmem>>, vector<1x256xf32>
    %78 = vector.broadcast %77 : vector<1x256xf32> to vector<24x256xf32>
    %79 = arith.mulf %76, %78 : vector<24x256xf32>
    %80 = arith.truncf %79 : vector<24x256xf32> to vector<24x256xbf16>
    %c72_68 = arith.constant 72 : index
    %c0_69 = arith.constant 0 : index
    %81 = vector.load %arg15[%c72_68, %c0_69] : memref<512x256xbf16, #tpu.memory_space<vmem>>, vector<24x256xbf16>
    tpu.vector_store %arg15[%c72_68, %c0_69], %80 {strides = array<i32>} : memref<512x256xbf16, #tpu.memory_space<vmem>>, vector<24x256xbf16>,
    %c0_70 = arith.constant 0 : index
    %c128_71 = arith.constant 128 : index
    %82 = vector.load %arg14[%c0_70, %c128_71] : memref<128x512xf32, #tpu.memory_space<vmem>>, vector<24x256xf32>
    %83 = arith.truncf %82 : vector<24x256xf32> to vector<24x256xbf16>
    %c96 = arith.constant 96 : index
    %c0_72 = arith.constant 0 : index
    %84 = vector.load %arg15[%c96, %c0_72] : memref<512x256xbf16, #tpu.memory_space<vmem>>, vector<24x256xbf16>
    tpu.vector_store %arg15[%c96, %c0_72], %83 {strides = array<i32>} : memref<512x256xbf16, #tpu.memory_space<vmem>>, vector<24x256xbf16>,
    %c0_73 = arith.constant 0 : index
    %c129_74 = arith.constant 129 : index
    %85 = vector.load %arg14[%c0_73, %c129_74] : memref<128x512xf32, #tpu.memory_space<vmem>>, vector<24x256xf32>
    %c2_75 = arith.constant 2 : index
    %c0_76 = arith.constant 0 : index
    %86 = vector.load %arg2[%c2_75, %c0_76] : memref<3x256xf32, #tpu.memory_space<vmem>>, vector<1x256xf32>
    %87 = vector.broadcast %86 : vector<1x256xf32> to vector<24x256xf32>
    %88 = arith.mulf %85, %87 : vector<24x256xf32>
    %89 = arith.truncf %88 : vector<24x256xf32> to vector<24x256xbf16>
    %c120 = arith.constant 120 : index
    %c0_77 = arith.constant 0 : index
    %90 = vector.load %arg15[%c120, %c0_77] : memref<512x256xbf16, #tpu.memory_space<vmem>>, vector<24x256xbf16>
    tpu.vector_store %arg15[%c120, %c0_77], %89 {strides = array<i32>} : memref<512x256xbf16, #tpu.memory_space<vmem>>, vector<24x256xbf16>,
    %c0_78 = arith.constant 0 : index
    %c143_79 = arith.constant 143 : index
    %91 = vector.load %arg14[%c0_78, %c143_79] : memref<128x512xf32, #tpu.memory_space<vmem>>, vector<24x256xf32>
    %c0_80 = arith.constant 0 : index
    %c0_81 = arith.constant 0 : index
    %92 = vector.load %arg2[%c0_80, %c0_81] : memref<3x256xf32, #tpu.memory_space<vmem>>, vector<1x256xf32>
    %93 = vector.broadcast %92 : vector<1x256xf32> to vector<24x256xf32>
    %94 = arith.mulf %91, %93 : vector<24x256xf32>
    %95 = arith.truncf %94 : vector<24x256xf32> to vector<24x256xbf16>
    %c144_82 = arith.constant 144 : index
    %c0_83 = arith.constant 0 : index
    %96 = vector.load %arg15[%c144_82, %c0_83] : memref<512x256xbf16, #tpu.memory_space<vmem>>, vector<24x256xbf16>
    tpu.vector_store %arg15[%c144_82, %c0_83], %95 {strides = array<i32>} : memref<512x256xbf16, #tpu.memory_space<vmem>>, vector<24x256xbf16>,
    %c0_84 = arith.constant 0 : index
    %c144_85 = arith.constant 144 : index
    %97 = vector.load %arg14[%c0_84, %c144_85] : memref<128x512xf32, #tpu.memory_space<vmem>>, vector<24x256xf32>
    %98 = arith.truncf %97 : vector<24x256xf32> to vector<24x256xbf16>
    %c168 = arith.constant 168 : index
    %c0_86 = arith.constant 0 : index
    %99 = vector.load %arg15[%c168, %c0_86] : memref<512x256xbf16, #tpu.memory_space<vmem>>, vector<24x256xbf16>
    tpu.vector_store %arg15[%c168, %c0_86], %98 {strides = array<i32>} : memref<512x256xbf16, #tpu.memory_space<vmem>>, vector<24x256xbf16>,
    %c0_87 = arith.constant 0 : index
    %c145_88 = arith.constant 145 : index
    %100 = vector.load %arg14[%c0_87, %c145_88] : memref<128x512xf32, #tpu.memory_space<vmem>>, vector<24x256xf32>
    %c2_89 = arith.constant 2 : index
    %c0_90 = arith.constant 0 : index
    %101 = vector.load %arg2[%c2_89, %c0_90] : memref<3x256xf32, #tpu.memory_space<vmem>>, vector<1x256xf32>
    %102 = vector.broadcast %101 : vector<1x256xf32> to vector<24x256xf32>
    %103 = arith.mulf %100, %102 : vector<24x256xf32>
    %104 = arith.truncf %103 : vector<24x256xf32> to vector<24x256xbf16>
    %c192 = arith.constant 192 : index
    %c0_91 = arith.constant 0 : index
    %105 = vector.load %arg15[%c192, %c0_91] : memref<512x256xbf16, #tpu.memory_space<vmem>>, vector<24x256xbf16>
    tpu.vector_store %arg15[%c192, %c0_91], %104 {strides = array<i32>} : memref<512x256xbf16, #tpu.memory_space<vmem>>, vector<24x256xbf16>,
    %cst_92 = arith.constant 0.000000e+00 : bf16
    %106 = vector.broadcast %cst_92 : bf16 to vector<40x256xbf16>
    %c216 = arith.constant 216 : index
    %c0_93 = arith.constant 0 : index
    %107 = vector.load %arg15[%c216, %c0_93] : memref<512x256xbf16, #tpu.memory_space<vmem>>, vector<40x256xbf16>
    tpu.vector_store %arg15[%c216, %c0_93], %106 {strides = array<i32>} : memref<512x256xbf16, #tpu.memory_space<vmem>>, vector<40x256xbf16>,
    %c0_94 = arith.constant 0 : index
    %c0_95 = arith.constant 0 : index
    %108 = vector.load %arg5[%c0_94, %c0_95] : memref<16x256xbf16, #tpu.memory_space<vmem>>, vector<16x256xbf16>
    %c0_96 = arith.constant 0 : index
    %c0_97 = arith.constant 0 : index
    %109 = vector.load %arg15[%c0_96, %c0_97] : memref<512x256xbf16, #tpu.memory_space<vmem>>, vector<256x256xbf16>
    %cst_98 = arith.constant dense<0.000000e+00> : vector<16x256xf32>
    %110 = tpu.matmul %108, %109, %cst_98 {dimension_numbers = #tpu.dot_dimension_numbers<[1], [0], [0], [1], [0, 0, 1, 1], [], []>} : vector<16x256xbf16>, vector<256x256xbf16>, vector<16x256xf32> -> vector<16x256xf32>
    %c0_99 = arith.constant 0 : index
    %c0_100 = arith.constant 0 : index
    %111 = vector.load %arg6[%c0_99, %c0_100] : memref<16x1xf32, #tpu.memory_space<vmem>>, vector<16x1xf32>
    %112 = vector.broadcast %111 : vector<16x1xf32> to vector<16x256xf32>
    %113 = arith.addf %110, %112 : vector<16x256xf32>
    %cst_101 = arith.constant 0.000000e+00 : f32
    %114 = vector.broadcast %cst_101 : f32 to vector<16x256xf32>
    %115 = arith.maximumf %113, %114 : vector<16x256xf32>
    %c24_102 = arith.constant 24 : index
    %c128_103 = arith.constant 128 : index
    %116 = vector.load %arg14[%c24_102, %c128_103] : memref<128x512xf32, #tpu.memory_space<vmem>>, vector<16x256xf32>
    tpu.vector_store %arg14[%c24_102, %c128_103], %115 {strides = array<i32>} : memref<128x512xf32, #tpu.memory_space<vmem>>, vector<16x256xf32>,
    %c0_104 = arith.constant 0 : index
    %c111_105 = arith.constant 111 : index
    %117 = vector.load %arg14[%c0_104, %c111_105] : memref<128x512xf32, #tpu.memory_space<vmem>>, vector<40x256xf32>
    %c0_106 = arith.constant 0 : index
    %c0_107 = arith.constant 0 : index
    %118 = vector.load %arg2[%c0_106, %c0_107] : memref<3x256xf32, #tpu.memory_space<vmem>>, vector<1x256xf32>
    %119 = vector.broadcast %118 : vector<1x256xf32> to vector<40x256xf32>
    %120 = arith.mulf %117, %119 : vector<40x256xf32>
    %121 = arith.truncf %120 : vector<40x256xf32> to vector<40x256xbf16>
    %c0_108 = arith.constant 0 : index
    %c0_109 = arith.constant 0 : index
    %122 = vector.load %arg15[%c0_108, %c0_109] : memref<512x256xbf16, #tpu.memory_space<vmem>>, vector<40x256xbf16>
    tpu.vector_store %arg15[%c0_108, %c0_109], %121 {strides = array<i32>} : memref<512x256xbf16, #tpu.memory_space<vmem>>, vector<40x256xbf16>,
    %c0_110 = arith.constant 0 : index
    %c112_111 = arith.constant 112 : index
    %123 = vector.load %arg14[%c0_110, %c112_111] : memref<128x512xf32, #tpu.memory_space<vmem>>, vector<40x256xf32>
    %124 = arith.truncf %123 : vector<40x256xf32> to vector<40x256xbf16>
    %c40_112 = arith.constant 40 : index
    %c0_113 = arith.constant 0 : index
    %125 = vector.load %arg15[%c40_112, %c0_113] : memref<512x256xbf16, #tpu.memory_space<vmem>>, vector<40x256xbf16>
    tpu.vector_store %arg15[%c40_112, %c0_113], %124 {strides = array<i32>} : memref<512x256xbf16, #tpu.memory_space<vmem>>, vector<40x256xbf16>,
    %c0_114 = arith.constant 0 : index
    %c113_115 = arith.constant 113 : index
    %126 = vector.load %arg14[%c0_114, %c113_115] : memref<128x512xf32, #tpu.memory_space<vmem>>, vector<40x256xf32>
    %c2_116 = arith.constant 2 : index
    %c0_117 = arith.constant 0 : index
    %127 = vector.load %arg2[%c2_116, %c0_117] : memref<3x256xf32, #tpu.memory_space<vmem>>, vector<1x256xf32>
    %128 = vector.broadcast %127 : vector<1x256xf32> to vector<40x256xf32>
    %129 = arith.mulf %126, %128 : vector<40x256xf32>
    %130 = arith.truncf %129 : vector<40x256xf32> to vector<40x256xbf16>
    %c80 = arith.constant 80 : index
    %c0_118 = arith.constant 0 : index
    %131 = vector.load %arg15[%c80, %c0_118] : memref<512x256xbf16, #tpu.memory_space<vmem>>, vector<40x256xbf16>
    tpu.vector_store %arg15[%c80, %c0_118], %130 {strides = array<i32>} : memref<512x256xbf16, #tpu.memory_space<vmem>>, vector<40x256xbf16>,
    %c0_119 = arith.constant 0 : index
    %c127_120 = arith.constant 127 : index
    %132 = vector.load %arg14[%c0_119, %c127_120] : memref<128x512xf32, #tpu.memory_space<vmem>>, vector<40x256xf32>
    %c0_121 = arith.constant 0 : index
    %c0_122 = arith.constant 0 : index
    %133 = vector.load %arg2[%c0_121, %c0_122] : memref<3x256xf32, #tpu.memory_space<vmem>>, vector<1x256xf32>
    %134 = vector.broadcast %133 : vector<1x256xf32> to vector<40x256xf32>
    %135 = arith.mulf %132, %134 : vector<40x256xf32>
    %136 = arith.truncf %135 : vector<40x256xf32> to vector<40x256xbf16>
    %c120_123 = arith.constant 120 : index
    %c0_124 = arith.constant 0 : index
    %137 = vector.load %arg15[%c120_123, %c0_124] : memref<512x256xbf16, #tpu.memory_space<vmem>>, vector<40x256xbf16>
    tpu.vector_store %arg15[%c120_123, %c0_124], %136 {strides = array<i32>} : memref<512x256xbf16, #tpu.memory_space<vmem>>, vector<40x256xbf16>,
    %c0_125 = arith.constant 0 : index
    %c128_126 = arith.constant 128 : index
    %138 = vector.load %arg14[%c0_125, %c128_126] : memref<128x512xf32, #tpu.memory_space<vmem>>, vector<40x256xf32>
    %139 = arith.truncf %138 : vector<40x256xf32> to vector<40x256xbf16>
    %c160 = arith.constant 160 : index
    %c0_127 = arith.constant 0 : index
    %140 = vector.load %arg15[%c160, %c0_127] : memref<512x256xbf16, #tpu.memory_space<vmem>>, vector<40x256xbf16>
    tpu.vector_store %arg15[%c160, %c0_127], %139 {strides = array<i32>} : memref<512x256xbf16, #tpu.memory_space<vmem>>, vector<40x256xbf16>,
    %c0_128 = arith.constant 0 : index
    %c129_129 = arith.constant 129 : index
    %141 = vector.load %arg14[%c0_128, %c129_129] : memref<128x512xf32, #tpu.memory_space<vmem>>, vector<40x256xf32>
    %c2_130 = arith.constant 2 : index
    %c0_131 = arith.constant 0 : index
    %142 = vector.load %arg2[%c2_130, %c0_131] : memref<3x256xf32, #tpu.memory_space<vmem>>, vector<1x256xf32>
    %143 = vector.broadcast %142 : vector<1x256xf32> to vector<40x256xf32>
    %144 = arith.mulf %141, %143 : vector<40x256xf32>
    %145 = arith.truncf %144 : vector<40x256xf32> to vector<40x256xbf16>
    %c200 = arith.constant 200 : index
    %c0_132 = arith.constant 0 : index
    %146 = vector.load %arg15[%c200, %c0_132] : memref<512x256xbf16, #tpu.memory_space<vmem>>, vector<40x256xbf16>
    tpu.vector_store %arg15[%c200, %c0_132], %145 {strides = array<i32>} : memref<512x256xbf16, #tpu.memory_space<vmem>>, vector<40x256xbf16>,
    %c0_133 = arith.constant 0 : index
    %c143_134 = arith.constant 143 : index
    %147 = vector.load %arg14[%c0_133, %c143_134] : memref<128x512xf32, #tpu.memory_space<vmem>>, vector<40x256xf32>
    %c0_135 = arith.constant 0 : index
    %c0_136 = arith.constant 0 : index
    %148 = vector.load %arg2[%c0_135, %c0_136] : memref<3x256xf32, #tpu.memory_space<vmem>>, vector<1x256xf32>
    %149 = vector.broadcast %148 : vector<1x256xf32> to vector<40x256xf32>
    %150 = arith.mulf %147, %149 : vector<40x256xf32>
    %151 = arith.truncf %150 : vector<40x256xf32> to vector<40x256xbf16>
    %c240 = arith.constant 240 : index
    %c0_137 = arith.constant 0 : index
    %152 = vector.load %arg15[%c240, %c0_137] : memref<512x256xbf16, #tpu.memory_space<vmem>>, vector<40x256xbf16>
    tpu.vector_store %arg15[%c240, %c0_137], %151 {strides = array<i32>} : memref<512x256xbf16, #tpu.memory_space<vmem>>, vector<40x256xbf16>,
    %c0_138 = arith.constant 0 : index
    %c144_139 = arith.constant 144 : index
    %153 = vector.load %arg14[%c0_138, %c144_139] : memref<128x512xf32, #tpu.memory_space<vmem>>, vector<40x256xf32>
    %154 = arith.truncf %153 : vector<40x256xf32> to vector<40x256xbf16>
    %c280 = arith.constant 280 : index
    %c0_140 = arith.constant 0 : index
    %155 = vector.load %arg15[%c280, %c0_140] : memref<512x256xbf16, #tpu.memory_space<vmem>>, vector<40x256xbf16>
    tpu.vector_store %arg15[%c280, %c0_140], %154 {strides = array<i32>} : memref<512x256xbf16, #tpu.memory_space<vmem>>, vector<40x256xbf16>,
    %c0_141 = arith.constant 0 : index
    %c145_142 = arith.constant 145 : index
    %156 = vector.load %arg14[%c0_141, %c145_142] : memref<128x512xf32, #tpu.memory_space<vmem>>, vector<40x256xf32>
    %c2_143 = arith.constant 2 : index
    %c0_144 = arith.constant 0 : index
    %157 = vector.load %arg2[%c2_143, %c0_144] : memref<3x256xf32, #tpu.memory_space<vmem>>, vector<1x256xf32>
    %158 = vector.broadcast %157 : vector<1x256xf32> to vector<40x256xf32>
    %159 = arith.mulf %156, %158 : vector<40x256xf32>
    %160 = arith.truncf %159 : vector<40x256xf32> to vector<40x256xbf16>
    %c320 = arith.constant 320 : index
    %c0_145 = arith.constant 0 : index
    %161 = vector.load %arg15[%c320, %c0_145] : memref<512x256xbf16, #tpu.memory_space<vmem>>, vector<40x256xbf16>
    tpu.vector_store %arg15[%c320, %c0_145], %160 {strides = array<i32>} : memref<512x256xbf16, #tpu.memory_space<vmem>>, vector<40x256xbf16>,
    %cst_146 = arith.constant 0.000000e+00 : bf16
    %162 = vector.broadcast %cst_146 : bf16 to vector<24x256xbf16>
    %c360 = arith.constant 360 : index
    %c0_147 = arith.constant 0 : index
    %163 = vector.load %arg15[%c360, %c0_147] : memref<512x256xbf16, #tpu.memory_space<vmem>>, vector<24x256xbf16>
    tpu.vector_store %arg15[%c360, %c0_147], %162 {strides = array<i32>} : memref<512x256xbf16, #tpu.memory_space<vmem>>, vector<24x256xbf16>,
    %c0_148 = arith.constant 0 : index
    %c0_149 = arith.constant 0 : index
    %164 = vector.load %arg7[%c0_148, %c0_149] : memref<16x384xbf16, #tpu.memory_space<vmem>>, vector<16x384xbf16>
    %c0_150 = arith.constant 0 : index
    %c0_151 = arith.constant 0 : index
    %165 = vector.load %arg15[%c0_150, %c0_151] : memref<512x256xbf16, #tpu.memory_space<vmem>>, vector<384x256xbf16>
    %cst_152 = arith.constant dense<0.000000e+00> : vector<16x256xf32>
    %166 = tpu.matmul %164, %165, %cst_152 {dimension_numbers = #tpu.dot_dimension_numbers<[1], [0], [0], [1], [0, 0, 1, 1], [], []>} : vector<16x384xbf16>, vector<384x256xbf16>, vector<16x256xf32> -> vector<16x256xf32>
    %c0_153 = arith.constant 0 : index
    %c0_154 = arith.constant 0 : index
    %167 = vector.load %arg8[%c0_153, %c0_154] : memref<16x1xf32, #tpu.memory_space<vmem>>, vector<16x1xf32>
    %168 = vector.broadcast %167 : vector<16x1xf32> to vector<16x256xf32>
    %169 = arith.addf %166, %168 : vector<16x256xf32>
    %cst_155 = arith.constant 0.000000e+00 : f32
    %170 = vector.broadcast %cst_155 : f32 to vector<16x256xf32>
    %171 = arith.maximumf %169, %170 : vector<16x256xf32>
    %c40_156 = arith.constant 40 : index
    %c128_157 = arith.constant 128 : index
    %172 = vector.load %arg14[%c40_156, %c128_157] : memref<128x512xf32, #tpu.memory_space<vmem>>, vector<16x256xf32>
    tpu.vector_store %arg14[%c40_156, %c128_157], %171 {strides = array<i32>} : memref<128x512xf32, #tpu.memory_space<vmem>>, vector<16x256xf32>,
    %c0_158 = arith.constant 0 : index
    %c111_159 = arith.constant 111 : index
    %173 = vector.load %arg14[%c0_158, %c111_159] : memref<128x512xf32, #tpu.memory_space<vmem>>, vector<56x256xf32>
    %c0_160 = arith.constant 0 : index
    %c0_161 = arith.constant 0 : index
    %174 = vector.load %arg2[%c0_160, %c0_161] : memref<3x256xf32, #tpu.memory_space<vmem>>, vector<1x256xf32>
    %175 = vector.broadcast %174 : vector<1x256xf32> to vector<56x256xf32>
    %176 = arith.mulf %173, %175 : vector<56x256xf32>
    %177 = arith.truncf %176 : vector<56x256xf32> to vector<56x256xbf16>
    %c0_162 = arith.constant 0 : index
    %c0_163 = arith.constant 0 : index
    %178 = vector.load %arg15[%c0_162, %c0_163] : memref<512x256xbf16, #tpu.memory_space<vmem>>, vector<56x256xbf16>
    tpu.vector_store %arg15[%c0_162, %c0_163], %177 {strides = array<i32>} : memref<512x256xbf16, #tpu.memory_space<vmem>>, vector<56x256xbf16>,
    %c0_164 = arith.constant 0 : index
    %c112_165 = arith.constant 112 : index
    %179 = vector.load %arg14[%c0_164, %c112_165] : memref<128x512xf32, #tpu.memory_space<vmem>>, vector<56x256xf32>
    %180 = arith.truncf %179 : vector<56x256xf32> to vector<56x256xbf16>
    %c56_166 = arith.constant 56 : index
    %c0_167 = arith.constant 0 : index
    %181 = vector.load %arg15[%c56_166, %c0_167] : memref<512x256xbf16, #tpu.memory_space<vmem>>, vector<56x256xbf16>
    tpu.vector_store %arg15[%c56_166, %c0_167], %180 {strides = array<i32>} : memref<512x256xbf16, #tpu.memory_space<vmem>>, vector<56x256xbf16>,
    %c0_168 = arith.constant 0 : index
    %c113_169 = arith.constant 113 : index
    %182 = vector.load %arg14[%c0_168, %c113_169] : memref<128x512xf32, #tpu.memory_space<vmem>>, vector<56x256xf32>
    %c2_170 = arith.constant 2 : index
    %c0_171 = arith.constant 0 : index
    %183 = vector.load %arg2[%c2_170, %c0_171] : memref<3x256xf32, #tpu.memory_space<vmem>>, vector<1x256xf32>
    %184 = vector.broadcast %183 : vector<1x256xf32> to vector<56x256xf32>
    %185 = arith.mulf %182, %184 : vector<56x256xf32>
    %186 = arith.truncf %185 : vector<56x256xf32> to vector<56x256xbf16>
    %c112_172 = arith.constant 112 : index
    %c0_173 = arith.constant 0 : index
    %187 = vector.load %arg15[%c112_172, %c0_173] : memref<512x256xbf16, #tpu.memory_space<vmem>>, vector<56x256xbf16>
    tpu.vector_store %arg15[%c112_172, %c0_173], %186 {strides = array<i32>} : memref<512x256xbf16, #tpu.memory_space<vmem>>, vector<56x256xbf16>,
    %c0_174 = arith.constant 0 : index
    %c127_175 = arith.constant 127 : index
    %188 = vector.load %arg14[%c0_174, %c127_175] : memref<128x512xf32, #tpu.memory_space<vmem>>, vector<56x256xf32>
    %c0_176 = arith.constant 0 : index
    %c0_177 = arith.constant 0 : index
    %189 = vector.load %arg2[%c0_176, %c0_177] : memref<3x256xf32, #tpu.memory_space<vmem>>, vector<1x256xf32>
    %190 = vector.broadcast %189 : vector<1x256xf32> to vector<56x256xf32>
    %191 = arith.mulf %188, %190 : vector<56x256xf32>
    %192 = arith.truncf %191 : vector<56x256xf32> to vector<56x256xbf16>
    %c168_178 = arith.constant 168 : index
    %c0_179 = arith.constant 0 : index
    %193 = vector.load %arg15[%c168_178, %c0_179] : memref<512x256xbf16, #tpu.memory_space<vmem>>, vector<56x256xbf16>
    tpu.vector_store %arg15[%c168_178, %c0_179], %192 {strides = array<i32>} : memref<512x256xbf16, #tpu.memory_space<vmem>>, vector<56x256xbf16>,
    %c0_180 = arith.constant 0 : index
    %c128_181 = arith.constant 128 : index
    %194 = vector.load %arg14[%c0_180, %c128_181] : memref<128x512xf32, #tpu.memory_space<vmem>>, vector<56x256xf32>
    %195 = arith.truncf %194 : vector<56x256xf32> to vector<56x256xbf16>
    %c224 = arith.constant 224 : index
    %c0_182 = arith.constant 0 : index
    %196 = vector.load %arg15[%c224, %c0_182] : memref<512x256xbf16, #tpu.memory_space<vmem>>, vector<56x256xbf16>
    tpu.vector_store %arg15[%c224, %c0_182], %195 {strides = array<i32>} : memref<512x256xbf16, #tpu.memory_space<vmem>>, vector<56x256xbf16>,
    %c0_183 = arith.constant 0 : index
    %c129_184 = arith.constant 129 : index
    %197 = vector.load %arg14[%c0_183, %c129_184] : memref<128x512xf32, #tpu.memory_space<vmem>>, vector<56x256xf32>
    %c2_185 = arith.constant 2 : index
    %c0_186 = arith.constant 0 : index
    %198 = vector.load %arg2[%c2_185, %c0_186] : memref<3x256xf32, #tpu.memory_space<vmem>>, vector<1x256xf32>
    %199 = vector.broadcast %198 : vector<1x256xf32> to vector<56x256xf32>
    %200 = arith.mulf %197, %199 : vector<56x256xf32>
    %201 = arith.truncf %200 : vector<56x256xf32> to vector<56x256xbf16>
    %c280_187 = arith.constant 280 : index
    %c0_188 = arith.constant 0 : index
    %202 = vector.load %arg15[%c280_187, %c0_188] : memref<512x256xbf16, #tpu.memory_space<vmem>>, vector<56x256xbf16>
    tpu.vector_store %arg15[%c280_187, %c0_188], %201 {strides = array<i32>} : memref<512x256xbf16, #tpu.memory_space<vmem>>, vector<56x256xbf16>,
    %c0_189 = arith.constant 0 : index
    %c143_190 = arith.constant 143 : index
    %203 = vector.load %arg14[%c0_189, %c143_190] : memref<128x512xf32, #tpu.memory_space<vmem>>, vector<56x256xf32>
    %c0_191 = arith.constant 0 : index
    %c0_192 = arith.constant 0 : index
    %204 = vector.load %arg2[%c0_191, %c0_192] : memref<3x256xf32, #tpu.memory_space<vmem>>, vector<1x256xf32>
    %205 = vector.broadcast %204 : vector<1x256xf32> to vector<56x256xf32>
    %206 = arith.mulf %203, %205 : vector<56x256xf32>
    %207 = arith.truncf %206 : vector<56x256xf32> to vector<56x256xbf16>
    %c336 = arith.constant 336 : index
    %c0_193 = arith.constant 0 : index
    %208 = vector.load %arg15[%c336, %c0_193] : memref<512x256xbf16, #tpu.memory_space<vmem>>, vector<56x256xbf16>
    tpu.vector_store %arg15[%c336, %c0_193], %207 {strides = array<i32>} : memref<512x256xbf16, #tpu.memory_space<vmem>>, vector<56x256xbf16>,
    %c0_194 = arith.constant 0 : index
    %c144_195 = arith.constant 144 : index
    %209 = vector.load %arg14[%c0_194, %c144_195] : memref<128x512xf32, #tpu.memory_space<vmem>>, vector<56x256xf32>
    %210 = arith.truncf %209 : vector<56x256xf32> to vector<56x256xbf16>
    %c392 = arith.constant 392 : index
    %c0_196 = arith.constant 0 : index
    %211 = vector.load %arg15[%c392, %c0_196] : memref<512x256xbf16, #tpu.memory_space<vmem>>, vector<56x256xbf16>
    tpu.vector_store %arg15[%c392, %c0_196], %210 {strides = array<i32>} : memref<512x256xbf16, #tpu.memory_space<vmem>>, vector<56x256xbf16>,
    %c0_197 = arith.constant 0 : index
    %c145_198 = arith.constant 145 : index
    %212 = vector.load %arg14[%c0_197, %c145_198] : memref<128x512xf32, #tpu.memory_space<vmem>>, vector<56x256xf32>
    %c2_199 = arith.constant 2 : index
    %c0_200 = arith.constant 0 : index
    %213 = vector.load %arg2[%c2_199, %c0_200] : memref<3x256xf32, #tpu.memory_space<vmem>>, vector<1x256xf32>
    %214 = vector.broadcast %213 : vector<1x256xf32> to vector<56x256xf32>
    %215 = arith.mulf %212, %214 : vector<56x256xf32>
    %216 = arith.truncf %215 : vector<56x256xf32> to vector<56x256xbf16>
    %c448 = arith.constant 448 : index
    %c0_201 = arith.constant 0 : index
    %217 = vector.load %arg15[%c448, %c0_201] : memref<512x256xbf16, #tpu.memory_space<vmem>>, vector<56x256xbf16>
    tpu.vector_store %arg15[%c448, %c0_201], %216 {strides = array<i32>} : memref<512x256xbf16, #tpu.memory_space<vmem>>, vector<56x256xbf16>,
    %cst_202 = arith.constant 0.000000e+00 : bf16
    %218 = vector.broadcast %cst_202 : bf16 to vector<8x256xbf16>
    %c504 = arith.constant 504 : index
    %c0_203 = arith.constant 0 : index
    %219 = vector.load %arg15[%c504, %c0_203] : memref<512x256xbf16, #tpu.memory_space<vmem>>, vector<8x256xbf16>
    tpu.vector_store %arg15[%c504, %c0_203], %218 {strides = array<i32>} : memref<512x256xbf16, #tpu.memory_space<vmem>>, vector<8x256xbf16>,
    %c0_204 = arith.constant 0 : index
    %c0_205 = arith.constant 0 : index
    %220 = vector.load %arg9[%c0_204, %c0_205] : memref<16x512xbf16, #tpu.memory_space<vmem>>, vector<16x512xbf16>
    %c0_206 = arith.constant 0 : index
    %c0_207 = arith.constant 0 : index
    %221 = vector.load %arg15[%c0_206, %c0_207] : memref<512x256xbf16, #tpu.memory_space<vmem>>, vector<512x256xbf16>
    %cst_208 = arith.constant dense<0.000000e+00> : vector<16x256xf32>
    %222 = tpu.matmul %220, %221, %cst_208 {dimension_numbers = #tpu.dot_dimension_numbers<[1], [0], [0], [1], [0, 0, 1, 1], [], []>} : vector<16x512xbf16>, vector<512x256xbf16>, vector<16x256xf32> -> vector<16x256xf32>
    %c0_209 = arith.constant 0 : index
    %c0_210 = arith.constant 0 : index
    %223 = vector.load %arg10[%c0_209, %c0_210] : memref<16x1xf32, #tpu.memory_space<vmem>>, vector<16x1xf32>
    %224 = vector.broadcast %223 : vector<16x1xf32> to vector<16x256xf32>
    %225 = arith.addf %222, %224 : vector<16x256xf32>
    %cst_211 = arith.constant 0.000000e+00 : f32
    %226 = vector.broadcast %cst_211 : f32 to vector<16x256xf32>
    %227 = arith.maximumf %225, %226 : vector<16x256xf32>
    %c56_212 = arith.constant 56 : index
    %c128_213 = arith.constant 128 : index
    %228 = vector.load %arg14[%c56_212, %c128_213] : memref<128x512xf32, #tpu.memory_space<vmem>>, vector<16x256xf32>
    tpu.vector_store %arg14[%c56_212, %c128_213], %227 {strides = array<i32>} : memref<128x512xf32, #tpu.memory_space<vmem>>, vector<16x256xf32>,
    %c0_214 = arith.constant 0 : index
    %c128_215 = arith.constant 128 : index
    %229 = vector.load %arg14[%c0_214, %c128_215] : memref<128x512xf32, #tpu.memory_space<vmem>>, vector<128x256xf32>
    %230 = arith.truncf %229 : vector<128x256xf32> to vector<128x256xbf16>
    %c0_216 = arith.constant 0 : index
    %c0_217 = arith.constant 0 : index
    %231 = vector.load %arg11[%c0_216, %c0_217] : memref<8x128xbf16, #tpu.memory_space<vmem>>, vector<8x128xbf16>
    %cst_218 = arith.constant dense<0.000000e+00> : vector<8x256xf32>
    %232 = tpu.matmul %231, %230, %cst_218 {dimension_numbers = #tpu.dot_dimension_numbers<[1], [0], [0], [1], [0, 0, 1, 1], [], []>} : vector<8x128xbf16>, vector<128x256xbf16>, vector<8x256xf32> -> vector<8x256xf32>
    %c0_219 = arith.constant 0 : index
    %c0_220 = arith.constant 0 : index
    %233 = vector.load %arg12[%c0_219, %c0_220] : memref<8x1xf32, #tpu.memory_space<vmem>>, vector<8x1xf32>
    %234 = vector.broadcast %233 : vector<8x1xf32> to vector<8x256xf32>
    %235 = arith.addf %232, %234 : vector<8x256xf32>
    %c0_221 = arith.constant 0 : index
    %c0_222 = arith.constant 0 : index
    %c0_223 = arith.constant 0 : index
    %236 = vector.load %arg13[%c0_221, %c0_222, %c0_223] : memref<1x8x256xf32, #tpu.memory_space<vmem>>, vector<1x8x256xf32>
    %237 = vector.shape_cast %236 : vector<1x8x256xf32> to vector<8x256xf32>
    %238 = vector.shape_cast %235 : vector<8x256xf32> to vector<1x8x256xf32>
    tpu.vector_store %arg13[%c0_221, %c0_222, %c0_223], %238 {strides = array<i32>} : memref<1x8x256xf32, #tpu.memory_space<vmem>>, vector<1x8x256xf32>,
    return
  }
  func.func @transform_0(%arg0: i32) -> (i32, i32, i32) {
    %c0_i32 = arith.constant 0 : i32
    %c0_i32_0 = arith.constant 0 : i32
    %c0_i32_1 = arith.constant 0 : i32
    return %arg0, %c0_i32, %c0_i32_0 : i32, i32, i32
  }
  func.func @transform_1(%arg0: i32) -> (i32, i32) {
    %c0_i32 = arith.constant 0 : i32
    %c0_i32_0 = arith.constant 0 : i32
    %c0_i32_1 = arith.constant 0 : i32
    return %c0_i32, %c0_i32_0 : i32, i32
  }
  func.func @transform_2(%arg0: i32) -> (i32, i32) {
    %c0_i32 = arith.constant 0 : i32
    %c0_i32_0 = arith.constant 0 : i32
    %c0_i32_1 = arith.constant 0 : i32
    return %c0_i32, %c0_i32_0 : i32, i32
  }
  func.func @transform_3(%arg0: i32) -> (i32, i32) {
    %c0_i32 = arith.constant 0 : i32
    %c0_i32_0 = arith.constant 0 : i32
    %c0_i32_1 = arith.constant 0 : i32
    return %c0_i32, %c0_i32_0 : i32, i32
  }
  func.func @transform_4(%arg0: i32) -> (i32, i32) {
    %c0_i32 = arith.constant 0 : i32
    %c0_i32_0 = arith.constant 0 : i32
    %c0_i32_1 = arith.constant 0 : i32
    return %c0_i32, %c0_i32_0 : i32, i32
  }
  func.func @transform_5(%arg0: i32) -> (i32, i32) {
    %c0_i32 = arith.constant 0 : i32
    %c0_i32_0 = arith.constant 0 : i32
    %c0_i32_1 = arith.constant 0 : i32
    return %c0_i32, %c0_i32_0 : i32, i32
  }
  func.func @transform_6(%arg0: i32) -> (i32, i32) {
    %c0_i32 = arith.constant 0 : i32
    %c0_i32_0 = arith.constant 0 : i32
    %c0_i32_1 = arith.constant 0 : i32
    return %c0_i32, %c0_i32_0 : i32, i32
  }
  func.func @transform_7(%arg0: i32) -> (i32, i32) {
    %c0_i32 = arith.constant 0 : i32
    %c0_i32_0 = arith.constant 0 : i32
    %c0_i32_1 = arith.constant 0 : i32
    return %c0_i32, %c0_i32_0 : i32, i32
  }
  func.func @transform_8(%arg0: i32) -> (i32, i32) {
    %c0_i32 = arith.constant 0 : i32
    %c0_i32_0 = arith.constant 0 : i32
    %c0_i32_1 = arith.constant 0 : i32
    return %c0_i32, %c0_i32_0 : i32, i32
  }
  func.func @transform_9(%arg0: i32) -> (i32, i32) {
    %c0_i32 = arith.constant 0 : i32
    %c0_i32_0 = arith.constant 0 : i32
    %c0_i32_1 = arith.constant 0 : i32
    return %c0_i32, %c0_i32_0 : i32, i32
  }
  func.func @transform_10(%arg0: i32) -> (i32, i32) {
    %c0_i32 = arith.constant 0 : i32
    %c0_i32_0 = arith.constant 0 : i32
    %c0_i32_1 = arith.constant 0 : i32
    return %c0_i32, %c0_i32_0 : i32, i32
  }
  func.func @transform_11(%arg0: i32) -> (i32, i32) {
    %c0_i32 = arith.constant 0 : i32
    %c0_i32_0 = arith.constant 0 : i32
    %c0_i32_1 = arith.constant 0 : i32
    return %c0_i32, %c0_i32_0 : i32, i32
  }
  func.func @transform_12(%arg0: i32) -> (i32, i32, i32) {
    %c0_i32 = arith.constant 0 : i32
    %c0_i32_0 = arith.constant 0 : i32
    %c0_i32_1 = arith.constant 0 : i32
    return %arg0, %c0_i32, %c0_i32_0 : i32, i32, i32
  }
}

</mosaic_0001>

<bundles_post_ra>
// kernel: dense_block_forward.1
= control target key start
LH: loop header
LB: loop body
LE: loop exit
PB: predicated region body
PF: predicated region fallthrough
CT: control target
= control target key end

     0   :  { %s4218_s21 = smov 0   ;;  %s5772_s0 = inlined_call_operand.vmem [shape: f32[2,8,256], index: 0, kind: input, shape index: {}]   ;;  %s5773_s1 = inlined_call_operand.vmem [shape: f32[3,256], index: 1, kind: input, shape index: {}]   ;;  %s5774_s2 = inlined_call_operand.vmem [shape: bf16[16,128], index: 2, kind: input, shape index: {}]   ;;  %s5775_s3 = inlined_call_operand.vmem [shape: f32[16,1], index: 3, kind: input, shape index: {}]   ;;  %s5776_s4 = inlined_call_operand.vmem [shape: bf16[16,256], index: 4, kind: input, shape index: {}]   ;;  %s5777_s5 = inlined_call_operand.vmem [shape: f32[16,1], index: 5, kind: input, shape index: {}]   ;;  %s5778_s6 = inlined_call_operand.vmem [shape: bf16[16,384], index: 6, kind: input, shape index: {}]   ;;  %s5779_s7 = inlined_call_operand.vmem [shape: f32[16,1], index: 7, kind: input, shape index: {}]   ;;  %s5780_s8 = inlined_call_operand.vmem [shape: bf16[16,512], index: 8, kind: input, shape index: {}]   ;;  %s5781_s9 = inlined_call_operand.vmem [shape: f32[16,1], index: 9, kind: input, shape index: {}]   ;;  %s5782_s10 = inlined_call_operand.vmem [shape: bf16[8,128], index: 10, kind: input, shape index: {}]   ;;  %s5783_s11 = inlined_call_operand.vmem [shape: f32[8,1], index: 11, kind: input, shape index: {}]   ;;  %s5784_s12 = inlined_call_operand.vmem [shape: f32[2,8,256], index: 12, kind: output, shape index: {}]  }
   0x1 LB: > { %s4042_s22 = sadd.s32 4294967295, %s4140_s21   ;;  %p4046_p0 = scmp.ge.s32.totalorder %s4140_s21, 1  ;;  %s4140_s21 = sphi %s4218_s21, %s22_s21  }
   0x2   : > { %p362_p1 = scmp.lt.s32.totalorder %s4140_s21, 3 }
   0x4   : > { %p363_p2 = pnand %p4046_p0, %p362_p1 }
   0x6   : > { %366 = sbr.rel (%p363_p2) target bundleno = 2120 (0x848), region = 68 }
   0xd   : > { %v488_v0 = vlaneseq  ;;  %v600_v2 = vld [vmem:[%s5773_s1] ss:$4 sm:$0x3]  ;;  %p404_p3 = scmp.lt.s32.totalorder %s4042_s22, 1  ;;  %s4142_s29 = smov 127   ;;  %v4149_v28 = vmov 0.0|0.0  }
   0xe   : > { %v486_v3 = vld [vmem:[%s5773_s1] ss:$4 sm:$0x3]  ;;  %v4051_v8 = vld [vmem:[%s5773_s1 + $0x2] ss:$4 sm:$0x3] }
   0xf   : > { %v489_v1 = vshrl.u32 %v488_v0, 7  ;;  %s5807_s22 = smov (!%p404_p3, %s4042_s22), 1  ;;  %s4143_s30 = smov 111   ;;  %v4052_v17 = vld [vmem:[%s5773_s1 + $0x2] ss:$4 sm:$0x3] }
  0x10   : > { %s5785_s13 = sshll.u32 %s5807_s22, 4  ;;  %s4144_s19 = smov 113   ;;  %v700_v20 = vld [vmem:[%s5773_s1] ss:$4 sm:$0x3]  ;;  %v4297_v29 = vrot.slane %v4149_v28, 4 }
  0x11   : > { %v4232_v4 = vsub.s32 0, %v489_v1  ;;  %v4234_v5 = vsub.s32 1, %v489_v1  ;;  %s4253_s16 = scalar_lea.vmem %s5772_s0, %s5785_s13  ;;  %s4145_s24 = smov 1   ;;  %v4053_v23 = vld [vmem:[%s5773_s1 + $0x2] ss:$4 sm:$0x3] }
  0x12   : > { %v4256_v11 = vld [vmem:[%s4253_s16 + $0x8] sm:$0xff]  ;;  %v4259_v12 = vld [vmem:[%s4253_s16] sm:$0xff]  ;;  %s4146_s27 = smov 15   ;;  %s4147_s28 = smov 17   ;;  %vm500_vm0 = vcmask 908288   ;;  %vm590_vm1 = vcmask 121856  }
  0x13   : > { %v605_v6 = vrot.slane %v600_v2, %v4232_v4  ;;  %v491_v7 = vrot.slane %v486_v3, %v4232_v4  ;;  %v609_v9 = vrot.slane %v600_v2, %v4234_v5  ;;  %v495_v10 = vrot.slane %v486_v3, %v4234_v5  ;;  %s5788_s14 = smov 16   ;;  %s5786_s15 = smov 112  }
  0x14   : > { %v532_v13 = vpack.c.bf16 %v4256_v11, %v4256_v11  ;;  %v4265_v14 = vpack.c.bf16 %v4259_v12, %v4259_v12  ;;  %v565_v15 = vrot.slane %v4051_v8, %v4234_v5  ;;  %v561_v16 = vrot.slane %v4051_v8, %v4232_v4  ;;  %s5792_s13 = smov 112   ;;  %s5793_s23 = smov 16  }
  0x15   : > { %610 = vrot.lane.b32.xlu1 %v605_v6, %s4142_s29  ;;  %496 = vrot.lane.b32.xlu0 %v491_v7, %s4143_s30  ;;  %v662_v18 = vrot.slane %v4052_v17, %v4234_v5  ;;  %v658_v19 = vrot.slane %v4052_v17, %v4232_v4  ;;  %v709_v21 = vrot.slane %v700_v20, %v4234_v5  ;;  %vm570_vm2 = vcmask 924672  }
  0x16   : > { %649 = vst [vmem:[#allocation3 + $0x28] sm:$0xf] %v532_v13  ;;  %648 = vst [vmem:[#allocation3 + $0x20] sm:$0xf] %v4265_v14  ;;  %v705_v22 = vrot.slane %v700_v20, %v4232_v4  ;;  %v778_v24 = vrot.slane %v4053_v23, %v4234_v5  ;;  %v774_v25 = vrot.slane %v4053_v23, %v4232_v4  ;;  %v538_v26 = vrot.slane %v532_v13, 4 }
  0x17   : > { %v537_v27 = vrot.slane %v4265_v14, 4  ;;  %vm614_vm3 = vcmask 1039360   ;;  %vm545_vm4 = vcmask 130048   ;;  %vm637_vm5 = vcmask 7168  }
  0x18   : > { %vm520_vm6 = vcmask 138240   ;;  %vm759_vm7 = vcmask 916480   ;;  %vm998_vm8 = vcmask 1043456  }
  0x19   : > { %612 = vrot.lane.b32.xlu1 %v609_v9, %s4142_s29  ;;  %498 = vrot.lane.b32.xlu0 %v495_v10, %s4143_s30 }
  0x1d   : > { %568 = vrot.lane.b32.xlu1 %v565_v15, %s4144_s19  ;;  %566 = vrot.lane.b32.xlu0 %v561_v16, %s4144_s19 }
  0x21   : > { %665 = vrot.lane.b32.xlu1 %v662_v18, %s4145_s24  ;;  %663 = vrot.lane.b32.xlu0 %v658_v19, %s4145_s24 }
  0x25   : > { %712 = vrot.lane.b32.xlu1 %v709_v21, %s4146_s27  ;;  %710 = vrot.lane.b32.xlu0 %v705_v22, %s4146_s27 }
  0x29   : > { %781 = vrot.lane.b32.xlu1 %v778_v24, %s4147_s28  ;;  %779 = vrot.lane.b32.xlu0 %v774_v25, %s4147_s28 }
  0x2d   : > { %543 = vrot.lane.b32.xlu1 %v538_v26, %s5788_s14  ;;  %541 = vrot.lane.b32.xlu0 %v537_v27, %s5788_s14 }
  0x31   : > { %539 = vrot.lane.b32.xlu1 %v4297_v29, %s5788_s14  ;;  %757 = vrot.lane.b32.xlu0 %v4297_v29, %s5786_s15 }
  0x35   : > { %755 = vrot.lane.b32.xlu1 %v538_v26, %s5786_s15 }
  0x87   : > { %v611_v30 = vpop.permute.xlu1 %610  ;;  %v497_v31 = vpop.permute.xlu0 %496 }
  0x88   : > { %v505_v32 = vmul.f32 0.0, %v497_v31  ;;  %v619_v55 = vmul.f32 0.0, %v611_v30 }
  0x8a   : > { %v508_v33 = vpack.c.bf16 %v505_v32, %v505_v32  ;;  %v622_v0 = vpack.c.bf16 %v619_v55, %v619_v55 }
  0x8b   : > { %v613_v34 = vpop.permute.xlu1 %612  ;;  %v499_v35 = vpop.permute.xlu0 %498 }
  0x8c   : > { %v507_v36 = vmul.f32 %v499_v35, %v4256_v11  ;;  %514 = vrot.lane.b32.xlu0 %v508_v33, %s4147_s28  ;;  %v621_v46 = vmul.f32 %v613_v34, %v4256_v11  ;;  %v501_v47 = vsel %vm500_vm0, %v497_v31, %v499_v35  ;;  %v615_v1 = vsel %vm614_vm3, %v611_v30, %v613_v34 }
  0x8d   : > { %v506_v54 = vmul.f32 %v501_v47, %v4259_v12  ;;  %v620_v9 = vmul.f32 %v615_v1, %v4259_v12  ;;  %v628_v17 = vrot.slane %v622_v0, 4  ;;  %v4151_v34 = vmov 0  }
  0x8e   : > { %v510_v37 = vpack.c.bf16 %v507_v36, %v507_v36  ;;  %v624_v56 = vpack.c.bf16 %v621_v46, %v621_v46  ;;  %811 = vst [vmem:[#allocation3 + $0x48] sm:$0xf0] %v4151_v34  ;;  %810 = vst [vmem:[#allocation3 + $0x40] sm:$0xf0] %v4151_v34  ;;  %886 = vmatprep.mubr.bf16.mxu0 %v4151_v34  ;;  %4113 = vset.pattern.permute.xlu1 %v4151_v34 }
  0x8f   : > { %v569_v38 = vpop.permute.xlu1 %568  ;;  %v567_v39 = vpop.permute.xlu0 %566  ;;  %v509_v62 = vpack.c.bf16 %v506_v54, %v506_v54  ;;  %v623_v23 = vpack.c.bf16 %v620_v9, %v620_v9  ;;  %816 = vst [vmem:[#allocation3 + $0x70] sm:$0xff] %v4151_v34  ;;  %817 = vst [vmem:[#allocation3 + $0x78] sm:$0xff] %v4151_v34  ;;  %4112 = vset.pattern.permute.xlu0 %v4151_v34  ;;  %v1289_v54 = vld [vmem:[%s5773_s1] ss:$4 sm:$0x3] }
  0x90   : > { %v577_v40 = vmul.f32 %v569_v38, %v4256_v11  ;;  %v575_v41 = vmul.f32 0.0, %v567_v39  ;;  %518 = vrot.lane.b32.xlu1 %v510_v37, %s4147_s28  ;;  %v571_v57 = vsel %vm570_vm2, %v567_v39, %v569_v38  ;;  %v630_v3 = vrot.slane %v624_v56, 4  ;;  %1478 = vst [vmem:[#allocation3 + $0xd0] sm:$0xf0] %v4151_v34  ;;  %1479 = vst [vmem:[#allocation3 + $0xd8] sm:$0xf0] %v4151_v34 }
  0x91   : > { %v576_v63 = vmul.f32 %v571_v57, %v4259_v12  ;;  %v629_v32 = vrot.slane %v623_v23, 4  ;;  %2423 = vst [vmem:[#allocation3 + $0x160] sm:$0xf0] %v4151_v34  ;;  %2424 = vst [vmem:[#allocation3 + $0x168] sm:$0xf0] %v4151_v34  ;;  %v1294_v55 = vrot.slane %v1289_v54, %v4232_v4  ;;  %v1298_v56 = vrot.slane %v1289_v54, %v4234_v5 }
  0x92   : > { %v580_v42 = vpack.c.bf16 %v577_v40, %v577_v40  ;;  %v578_v43 = vpack.c.bf16 %v575_v41, %v575_v41  ;;  %3693 = vst [vmem:[#allocation3 + $0x1f0] sm:$0xf0] %v4151_v34  ;;  %3694 = vst [vmem:[#allocation3 + $0x1f8] sm:$0xf0] %v4151_v34 }
  0x93   : > { %v666_v44 = vpop.permute.xlu1 %665  ;;  %v664_v45 = vpop.permute.xlu0 %663  ;;  %v579_v13 = vpack.c.bf16 %v576_v63, %v576_v63  ;;  %v4057_v57 = vld [vmem:[%s5773_s1 + $0x2] ss:$4 sm:$0x3] }
  0x94   : > { %588 = vrot.lane.b32.xlu1 %v580_v42, %s4146_s27  ;;  %584 = vrot.lane.b32.xlu0 %v578_v43, %s4146_s27  ;;  %v672_v61 = vmul.f32 %v664_v45, %v4259_v12  ;;  %v674_v2 = vmul.f32 0.0, %v666_v44  ;;  %v668_v16 = vsel %vm637_vm5, %v664_v45, %v666_v44  ;;  %v837_v42 = vld [vmem:[%s5775_s3 + $0x8] sm:$0xff]  ;;  %v836_v43 = vld [vmem:[%s5775_s3] sm:$0xff] }
  0x95   : > { %v673_v20 = vmul.f32 %v668_v16, %v4256_v11  ;;  %v914_v44 = vld [vmem:[%s5773_s1] ss:$4 sm:$0x3]  ;;  %v4055_v45 = vld [vmem:[%s5773_s1 + $0x2] ss:$4 sm:$0x3] }
  0x96   : > { %v675_v10 = vpack.c.bf16 %v672_v61, %v672_v61  ;;  %v677_v15 = vpack.c.bf16 %v674_v2, %v674_v2  ;;  %v919_v14 = vrot.slane %v914_v44, %v4232_v4  ;;  %v1046_v46 = vrot.slane %v4055_v45, %v4232_v4 }
  0x97   : > { %v713_v48 = vpop.permute.xlu1 %712  ;;  %v711_v49 = vpop.permute.xlu0 %710  ;;  %v676_v33 = vpack.c.bf16 %v673_v20, %v673_v20  ;;  %v1050_v47 = vrot.slane %v4055_v45, %v4234_v5 }
  0x98   : > { %v721_v50 = vmul.f32 0.0, %v713_v48  ;;  %v715_v51 = vsel %vm590_vm1, %v711_v49, %v713_v48  ;;  %v681_v21 = vrot.slane %v675_v10, 4  ;;  %v719_v24 = vmul.f32 %v711_v49, %v4259_v12  ;;  %v1113_v48 = vld [vmem:[%s5773_s1] ss:$4 sm:$0x3] }
  0x99   : > { %v720_v52 = vmul.f32 %v715_v51, %v4256_v11  ;;  %v683_v25 = vrot.slane %v677_v15, 4  ;;  %v682_v38 = vrot.slane %v676_v33, 4  ;;  %v1118_v49 = vrot.slane %v1113_v48, %v4232_v4  ;;  %v4056_v51 = vld [vmem:[%s5773_s1 + $0x2] ss:$4 sm:$0x3] }
  0x9a   : > { %v724_v53 = vpack.c.bf16 %v721_v50, %v721_v50  ;;  %v722_v35 = vpack.c.bf16 %v719_v24, %v719_v24  ;;  %v1122_v50 = vrot.slane %v1113_v48, %v4234_v5 }
  0x9b   : > { %v723_v58 = vpack.c.bf16 %v720_v52, %v720_v52  ;;  %v4319_v59 = vpop.permute.xlu1 %781  ;;  %v4321_v60 = vpop.permute.xlu0 %779  ;;  %v1213_v52 = vrot.slane %v4056_v51, %v4232_v4 }
  0x9c   : > { %732 = vrot.lane.b32.xlu0 %v724_v53, %s4144_s19  ;;  %v784_v22 = vsel %vm520_vm6, %v4321_v60, %v4319_v59  ;;  %v788_v36 = vmul.f32 %v4321_v60, %v4259_v12  ;;  %v790_v40 = vmul.f32 0.0, %v4319_v59  ;;  %v1217_v53 = vrot.slane %v4056_v51, %v4234_v5 }
  0x9d   : > { %730 = vrot.lane.b32.xlu1 %v723_v58, %s4144_s19  ;;  %v789_v31 = vmul.f32 %v784_v22, %v4256_v11  ;;  %v1420_v58 = vrot.slane %v4057_v57, %v4232_v4  ;;  %v1424_v59 = vrot.slane %v4057_v57, %v4234_v5 }
  0x9e   : > { %v791_v39 = vpack.c.bf16 %v788_v36, %v788_v36  ;;  %v793_v41 = vpack.c.bf16 %v790_v40, %v790_v40 }
  0x9f   : > { %v544_v6 = vpop.permute.xlu1 %543  ;;  %v542_v7 = vpop.permute.xlu0 %541  ;;  %v792_v37 = vpack.c.bf16 %v789_v31, %v789_v31 }
  0xa0   : > { %516 = vrot.lane.b32.xlu0 %v509_v62, %s4147_s28  ;;  %v547_v8 = vsel %vm545_vm4, %v542_v7, %v544_v6 }
  0xa1   : > { %635 = vrot.lane.b32.xlu1 %v630_v3, %s4145_s24  ;;  %551 = vst [vmem:[#allocation3 + $0x8] sm:$0xf0] %v547_v8 }
  0xa3   : > { %v540_v18 = vpop.permute.xlu1 %539  ;;  %v758_v28 = vpop.permute.xlu0 %757 }
  0xa4   : > { %586 = vrot.lane.b32.xlu0 %v579_v13, %s4146_s27  ;;  %v546_v19 = vsel %vm545_vm4, %v540_v18, %v542_v7 }
  0xa5   : > { %631 = vrot.lane.b32.xlu1 %v628_v17, %s4145_s24  ;;  %550 = vst [vmem:[#allocation3] sm:$0xf0] %v546_v19 }
  0xa7   : > { %v4341_v26 = vpop.permute.xlu1 %755 }
  0xa8   : > { %684 = vrot.lane.b32.xlu0 %v681_v21, %s4142_s29  ;;  %v761_v30 = vsel %vm759_vm7, %v4341_v26, %v758_v28 }
  0xa9   : > { %688 = vrot.lane.b32.xlu1 %v683_v25, %s4142_s29  ;;  %765 = vst [vmem:[#allocation3 + $0x38] sm:$0xf0] %v761_v30 }
  0xac   : > { %633 = vrot.lane.b32.xlu0 %v629_v32, %s4145_s24 }
  0xad   : > { %728 = vrot.lane.b32.xlu1 %v722_v35, %s4144_s19 }
  0xb0   : > { %686 = vrot.lane.b32.xlu0 %v682_v38, %s4142_s29 }
  0xb1   : > { %799 = vrot.lane.b32.xlu1 %v792_v37, %s4143_s30 }
  0xb4   : > { %753 = vrot.lane.b32.xlu0 %v537_v27, %s5786_s15  ;;  %v923_v27 = vrot.slane %v914_v44, %v4234_v5 }
  0xb5   : > { %797 = vrot.lane.b32.xlu1 %v791_v39, %s4143_s30 }
  0xb8   : > { %801 = vrot.lane.b32.xlu0 %v793_v41, %s4143_s30 }
  0xb9   : > { %845 = vperm.xlu1 %4113, %v837_v42  }
  0xbc   : > { %840 = vperm.xlu0 %4112, %v836_v43  }
  0xbd   : > { %924 = vrot.lane.b32.xlu1 %v919_v14, %s4143_s30 }
  0xc0   : > { %926 = vrot.lane.b32.xlu0 %v923_v27, %s4143_s30  ;;  %v4114_v27 = vld [vmem:[%s5774_s2] sm:$0xff]  }
  0xc1   : > { %1051 = vrot.lane.b32.xlu1 %v1046_v46, %s4144_s19 }
  0xc4   : > { %1053 = vrot.lane.b32.xlu0 %v1050_v47, %s4144_s19 }
  0xc5   : > { %1123 = vrot.lane.b32.xlu1 %v1118_v49, %s4142_s29 }
  0xc8   : > { %1125 = vrot.lane.b32.xlu0 %v1122_v50, %s4142_s29 }
  0xc9   : > { %1218 = vrot.lane.b32.xlu1 %v1213_v52, %s4145_s24 }
  0xcc   : > { %1220 = vrot.lane.b32.xlu0 %v1217_v53, %s4145_s24 }
  0xcd   : > { %1299 = vrot.lane.b32.xlu1 %v1294_v55, %s4146_s27 }
  0xd0   : > { %1301 = vrot.lane.b32.xlu0 %v1298_v56, %s4146_s27 }
  0xd1   : > { %1425 = vrot.lane.b32.xlu1 %v1420_v58, %s4147_s28 }
  0xd4   : > { %1427 = vrot.lane.b32.xlu0 %v1424_v59, %s4147_s28 }
  0xfe   : > { %v515_v60 = vpop.permute.xlu0 %514 }
 0x102   : > { %v519_v61 = vpop.permute.xlu1 %518 }
 0x106   : > { %v585_v62 = vpop.permute.xlu0 %584  ;;  %v589_v63 = vpop.permute.xlu1 %588 }
 0x10e   : > { %v733_v0 = vpop.permute.xlu0 %732 }
 0x10f   : > { %v731_v1 = vpop.permute.xlu1 %730 }
 0x110   : > { %v736_v2 = vsel %vm570_vm2, %v731_v1, %v733_v0 }
 0x111   : > { %740 = vst [vmem:[#allocation3 + $0x38] sm:$0xf] %v736_v2 }
 0x112   : > { %v517_v3 = vpop.permute.xlu0 %516 }
 0x113   : > { %v521_v6 = vsel %vm520_vm6, %v515_v60, %v517_v3  ;;  %v522_v7 = vsel %vm520_vm6, %v517_v3, %v519_v61  ;;  %v636_v8 = vpop.permute.xlu1 %635 }
 0x114   : > { %525 = vst [vmem:[#allocation3] sm:$0xf] %v521_v6  ;;  %526 = vst [vmem:[#allocation3 + $0x8] sm:$0xf] %v522_v7 }
 0x116   : > { %v587_v9 = vpop.permute.xlu0 %586 }
 0x117   : > { %v591_v10 = vsel %vm590_vm1, %v585_v62, %v587_v9  ;;  %v592_v13 = vsel %vm590_vm1, %v587_v9, %v589_v63  ;;  %v632_v15 = vpop.permute.xlu1 %631 }
 0x118   : > { %595 = vst [vmem:[#allocation3 + $0x10] sm:$0xf] %v591_v10  ;;  %596 = vst [vmem:[#allocation3 + $0x18] sm:$0xf] %v592_v13  ;;  %v827_v43 = vld [vmem:[#allocation3 + $0x38] sm:$0xff] }
 0x11a   : > { %v685_v16 = vpop.permute.xlu0 %684 }
 0x11b   : > { %v689_v17 = vpop.permute.xlu1 %688  ;;  %v821_v18 = vld [vmem:[#allocation3 + $0x8] sm:$0xff]  ;;  %v820_v19 = vld [vmem:[#allocation3] sm:$0xff] }
 0x11c   : > { %854 = vmatprep.subr.bf16.mxu0 %v821_v18 }
 0x11d   : > { %855 = vmatpush1.bf16.msra.mxu0 %v820_v19 }
 0x11e   : > { %v634_v20 = vpop.permute.xlu0 %633 }
 0x11f   : > { %v638_v21 = vsel %vm637_vm5, %v632_v15, %v634_v20  ;;  %v639_v22 = vsel %vm637_vm5, %v634_v20, %v636_v8  ;;  %v729_v23 = vpop.permute.xlu1 %728 }
 0x120   : > { %642 = vst [vmem:[#allocation3 + $0x10] sm:$0xf0] %v638_v21  ;;  %643 = vst [vmem:[#allocation3 + $0x18] sm:$0xf0] %v639_v22  ;;  %v735_v24 = vsel %vm570_vm2, %v729_v23, %v731_v1 }
 0x121   : > { %739 = vst [vmem:[#allocation3 + $0x30] sm:$0xf] %v735_v24 }
 0x122   : > { %v687_v25 = vpop.permute.xlu0 %686 }
 0x123   : > { %v691_v28 = vsel %vm614_vm3, %v685_v16, %v687_v25  ;;  %v692_v30 = vsel %vm614_vm3, %v687_v25, %v689_v17  ;;  %v800_v31 = vpop.permute.xlu1 %799 }
 0x124   : > { %695 = vst [vmem:[#allocation3 + $0x20] sm:$0xf0] %v691_v28  ;;  %696 = vst [vmem:[#allocation3 + $0x28] sm:$0xf0] %v692_v30 }
 0x126   : > { %v754_v32 = vpop.permute.xlu0 %753 }
 0x127   : > { %v760_v33 = vsel %vm759_vm7, %v754_v32, %v4341_v26  ;;  %v798_v35 = vpop.permute.xlu1 %797  ;;  %v823_v36 = vld [vmem:[#allocation3 + $0x18] sm:$0xff]  ;;  %v822_v37 = vld [vmem:[#allocation3 + $0x10] sm:$0xff] }
 0x128   : > { %764 = vst [vmem:[#allocation3 + $0x30] sm:$0xf0] %v760_v33  ;;  %v804_v38 = vsel %vm500_vm0, %v798_v35, %v800_v31  ;;  %856 = vmatprep.subr.bf16.mxu0 %v823_v36 }
 0x129   : > { %808 = vst [vmem:[#allocation3 + $0x40] sm:$0xf] %v804_v38  ;;  %857 = vmatpush1.bf16.msra.mxu0 %v822_v37 }
 0x12a   : > { %v802_v39 = vpop.permute.xlu0 %801 }
 0x12b   : > { %v805_v40 = vsel %vm500_vm0, %v800_v31, %v802_v39  ;;  %v825_v41 = vld [vmem:[#allocation3 + $0x28] sm:$0xff]  ;;  %v824_v42 = vld [vmem:[#allocation3 + $0x20] sm:$0xff] }
 0x12c   : > { %809 = vst [vmem:[#allocation3 + $0x48] sm:$0xf] %v805_v40  ;;  %858 = vmatprep.subr.bf16.mxu0 %v825_v41 }
 0x12d   : > { %859 = vmatpush1.bf16.msra.mxu0 %v824_v42 }
 0x12e   : > { %860 = vmatprep.subr.bf16.mxu0 %v827_v43 }
 0x12f   : > { %v826_v26 = vld [vmem:[#allocation3 + $0x30] sm:$0xff] }
 0x130   : > { %v828_v14 = vld [vmem:[#allocation3 + $0x40] sm:$0xff] }
 0x131   : > { %861 = vmatpush1.bf16.msra.mxu0 %v826_v26 }
 0x133   : > { %v829_v44 = vld [vmem:[#allocation3 + $0x48] sm:$0xff] }
 0x134   : > { %862 = vmatprep.subr.bf16.mxu0 %v829_v44 }
 0x135   : > { %863 = vmatpush1.bf16.msra.mxu0 %v828_v14 }
 0x136   : > { %864 = vmatprep.subr.bf16.mxu0 %v4151_v34 }
 0x138   : > { %v846_v45 = vpop.permute.xlu1 %845 }
 0x139   : > { %865 = vmatpush1.bf16.msra.mxu0 %v4151_v34 }
 0x13a   : > { %866 = vmatprep.subr.bf16.mxu0 %v4151_v34 }
 0x13b   : > { %v841_v52 = vpop.permute.xlu0 %840 }
 0x13c   : > { %v925_v46 = vpop.permute.xlu1 %924 }
 0x13d   : > { %867 = vmatpush1.bf16.msra.mxu0 %v4151_v34  ;;  %v932_v47 = vmul.f32 0.0, %v925_v46 }
 0x13e   : > { %868 = vmatprep.subr.bf16.mxu0 %v4151_v34 }
 0x13f   : > { %v941_v48 = vpack.c.bf16 %v932_v47, %v932_v47  ;;  %v4452_v53 = vpop.permute.xlu0 %926 }
 0x140   : > { %v1052_v49 = vpop.permute.xlu1 %1051  ;;  %v928_v3 = vsel %vm500_vm0, %v925_v46, %v4452_v53  ;;  %v934_v32 = vmul.f32 %v4452_v53, %v4256_v11 }
 0x141   : > { %869 = vmatpush1.bf16.msra.mxu0 %v4151_v34  ;;  %v1059_v50 = vmul.f32 0.0, %v1052_v49  ;;  %959 = vrot.lane.b32.xlu0 %v941_v48, %s4147_s28  ;;  %v933_v15 = vmul.f32 %v928_v3, %v4259_v12 }
 0x142   : > { %953 = vrot.lane.b32.xlu1 %v941_v48, %s4147_s28 }
 0x143   : > { %v1068_v51 = vpack.c.bf16 %v1059_v50, %v1059_v50  ;;  %v4454_v54 = vpop.permute.xlu0 %1053 }
 0x144   : > { %887 = vmatmul.mubr.bf16.vlgmr.msra.gmra.mrb[0].mxu0 %v4114_v27  ;;  %v1124_v56 = vpop.permute.xlu1 %1123  ;;  %v1055_v19 = vsel %vm570_vm2, %v1052_v49, %v4454_v54  ;;  %v1061_v40 = vmul.f32 %v4454_v54, %v4256_v11 }
 0x145   : > { %1014 = vrot.lane.b32.xlu0 %v4297_v29, %s5788_s14  ;;  %v1131_v57 = vmul.f32 0.0, %v1124_v56  ;;  %v1060_v28 = vmul.f32 %v1055_v19, %v4259_v12 }
 0x146   : > { %1008 = vrot.lane.b32.xlu1 %v4297_v29, %s5788_s14 }
 0x147   : > { %v4456_v55 = vpop.permute.xlu0 %1125  ;;  %v1140_v59 = vpack.c.bf16 %v1131_v57, %v1131_v57 }
 0x148   : > { %v1219_v30 = vpop.permute.xlu1 %1218  ;;  %v1127_v14 = vsel %vm614_vm3, %v1124_v56, %v4456_v55 }
 0x149   : > { %1086 = vrot.lane.b32.xlu0 %v1068_v51, %s4146_s27  ;;  %v1152_v62 = vrot.slane %v1140_v59, 4  ;;  %v1226_v35 = vmul.f32 %v1219_v30, %v4259_v12  ;;  %v1132_v49 = vmul.f32 %v1127_v14, %v4259_v12  ;;  %v1133_v59 = vmul.f32 %v4456_v55, %v4256_v11 }
 0x14a   : > { %1080 = vrot.lane.b32.xlu1 %v1068_v51, %s4146_s27 }
 0x14b   : > { %v4458_v58 = vpop.permute.xlu0 %1220 }
 0x14c   : > { %v1228_v60 = vmul.f32 0.0, %v4458_v58  ;;  %v1222_v50 = vsel %vm637_vm5, %v1219_v30, %v4458_v58 }
 0x14d   : > { %1167 = vrot.lane.b32.xlu0 %v1152_v62, %s4145_s24 }
 0x14e   : > { %v1237_v61 = vpack.c.bf16 %v1228_v60, %v1228_v60  ;;  %1161 = vrot.lane.b32.xlu1 %v1152_v62, %s4145_s24  ;;  %v1227_v60 = vmul.f32 %v1222_v50, %v4256_v11 }
 0x150   : > { %v4463_v63 = vrot.slane %v1237_v61, 4 }
 0x152   : > { %1260 = vrot.lane.b32.xlu0 %v4463_v63, %s4142_s29 }
 0x217   : > { %v888_v0 = vpop.f32.mrb[0].mxu0 }
 0x218   : > { %v889_v1 = vadd.f32 %v888_v0, %v841_v52  ;;  %v890_v2 = vpop.f32.mrb[1].mxu0  ;;  %v1302_v0 = vpop.permute.xlu0 %1301 }
 0x219   : > { %v891_v6 = vadd.f32 %v890_v2, %v841_v52  ;;  %v892_v7 = vpop.f32.mrb[2].mxu0 }
 0x21a   : > { %v4469_v8 = vmax.f32 %v889_v1, 0.0  ;;  %v893_v9 = vadd.f32 %v892_v7, %v846_v45  ;;  %v894_v10 = vpop.f32.mrb[3].mxu0 }
 0x21b   : > { %v4471_v13 = vmax.f32 %v891_v6, 0.0  ;;  %v895_v16 = vadd.f32 %v894_v10, %v846_v45 }
 0x21c   : > { %v936_v17 = vmul.f32 %v928_v3, %v4469_v8  ;;  %v4477_v18 = vpack.c.bf16 %v4469_v8, %v4259_v12  ;;  %v1063_v20 = vmul.f32 %v1055_v19, %v4469_v8  ;;  %v4486_v22 = vmax.f32 %v893_v9, 0.0 }
 0x21d   : > { %v4484_v21 = vpack.c.bf16 %v4471_v13, %v4256_v11  ;;  %v937_v25 = vmul.f32 %v4452_v53, %v4471_v13  ;;  %v4496_v31 = vmax.f32 %v895_v16, 0.0  ;;  %v1064_v37 = vmul.f32 %v4454_v54, %v4471_v13 }
 0x21e   : > { %v942_v23 = vpack.c.bf16 %v936_v17, %v933_v15  ;;  %v4489_v24 = vrot.slane %v4477_v18, 4  ;;  %3154 = vst [vmem:[#allocation3 + $0xe0] sm:$0xff] %v4477_v18  ;;  %v1069_v33 = vpack.c.bf16 %v1063_v20, %v1060_v28  ;;  %v1229_v38 = vmul.f32 %v1219_v30, %v4469_v8 }
 0x21f   : > { %3155 = vst [vmem:[#allocation3 + $0xe8] sm:$0xff] %v4484_v21  ;;  %v943_v36 = vpack.c.bf16 %v937_v25, %v934_v32  ;;  %v990_v39 = vpack.c.bf16 %v4486_v22, %v4486_v22  ;;  %v991_v41 = vpack.c.bf16 %v4496_v31, %v4496_v31  ;;  %v4516_v42 = vrot.slane %v4484_v21, 4  ;;  %v1300_v25 = vpop.permute.xlu1 %1299 }
 0x220   : > { %955 = vrot.lane.b32.xlu1 %v942_v23, %s4147_s28  ;;  %1010 = vrot.lane.b32.xlu0 %v4489_v24, %s5788_s14  ;;  %v1070_v43 = vpack.c.bf16 %v1064_v37, %v1061_v40  ;;  %v1235_v26 = vpack.c.bf16 %v1229_v38, %v1226_v35  ;;  %v939_v44 = vmul.f32 %v928_v3, %v4486_v22  ;;  %v1309_v3 = vmul.f32 0.0, %v1302_v0 }
 0x221   : > { %1197 = vst [vmem:[#allocation3 + $0x70] sm:$0xf] %v990_v39  ;;  %1198 = vst [vmem:[#allocation3 + $0x78] sm:$0xf] %v991_v41  ;;  %v940_v27 = vmul.f32 %v4452_v53, %v4496_v31  ;;  %v1066_v47 = vmul.f32 %v1055_v19, %v4486_v22  ;;  %v1135_v48 = vmul.f32 %v1127_v14, %v4469_v8  ;;  %v1004_v1 = vrot.slane %v990_v39, 4 }
 0x222   : > { %v1247_v45 = vrot.slane %v1235_v26, 4  ;;  %v945_v46 = vpack.c.bf16 %v939_v44, %v939_v44  ;;  %v1067_v51 = vmul.f32 %v4454_v54, %v4496_v31  ;;  %v1136_v57 = vmul.f32 %v4456_v55, %v4471_v13 }
 0x223   : > { %v946_v52 = vpack.c.bf16 %v940_v27, %v940_v27  ;;  %v1072_v53 = vpack.c.bf16 %v1066_v47, %v1066_v47  ;;  %v1141_v56 = vpack.c.bf16 %v1135_v48, %v1132_v49  ;;  %v1230_v54 = vmul.f32 %v1222_v50, %v4471_v13 }
 0x224   : > { %1082 = vrot.lane.b32.xlu1 %v1069_v33, %s4146_s27  ;;  %957 = vrot.lane.b32.xlu0 %v943_v36, %s4147_s28  ;;  %v1073_v61 = vpack.c.bf16 %v1067_v51, %v1067_v51  ;;  %v1142_v62 = vpack.c.bf16 %v1136_v57, %v1133_v59  ;;  %v1138_v2 = vmul.f32 %v1127_v14, %v4486_v22  ;;  %v1006_v19 = vrot.slane %v991_v41, 4  ;;  %v1426_v51 = vpop.permute.xlu1 %1425 }
 0x225   : > { %v1153_v58 = vrot.slane %v1141_v56, 4  ;;  %v1236_v7 = vpack.c.bf16 %v1230_v54, %v1227_v60  ;;  %v1005_v9 = vsel %vm998_vm8, %v4489_v24, %v1004_v1  ;;  %v1232_v15 = vmul.f32 %v1219_v30, %v4486_v22 }
 0x226   : > { %v1154_v6 = vrot.slane %v1142_v62, 4  ;;  %v1144_v10 = vpack.c.bf16 %v1138_v2, %v1138_v2  ;;  %v1318_v16 = vpack.c.bf16 %v1309_v3, %v1309_v3  ;;  %v1303_v28 = vsel %vm590_vm1, %v1300_v25, %v1302_v0  ;;  %v1606_v2 = vld [vmem:[%s5773_s1] ss:$4 sm:$0x3] }
 0x227   : > { %v1248_v17 = vrot.slane %v1236_v7, 4  ;;  %v1238_v23 = vpack.c.bf16 %v1232_v15, %v1232_v15  ;;  %v1007_v32 = vsel %vm998_vm8, %v4516_v42, %v1006_v19  ;;  %v1139_v35 = vmul.f32 %v4456_v55, %v4496_v31  ;;  %v4060_v7 = vld [vmem:[%s5773_s1 + $0x2] ss:$4 sm:$0x3] }
 0x228   : > { %1012 = vrot.lane.b32.xlu1 %v4516_v42, %s5788_s14  ;;  %1084 = vrot.lane.b32.xlu0 %v1070_v43, %s4146_s27  ;;  %v1157_v20 = vrot.slane %v1144_v10, 4  ;;  %v1308_v36 = vmul.f32 %v1303_v28, %v4256_v11  ;;  %v1314_v37 = vmul.f32 %v1303_v28, %v4496_v31  ;;  %v1311_v38 = vmul.f32 %v1303_v28, %v4471_v13  ;;  %v1894_v15 = vld [vmem:[%s5773_s1] ss:$4 sm:$0x3] }
 0x229   : > { %v1250_v33 = vrot.slane %v1238_v23, 4  ;;  %v1145_v40 = vpack.c.bf16 %v1139_v35, %v1139_v35  ;;  %v1233_v41 = vmul.f32 %v1222_v50, %v4496_v31  ;;  %v1307_v14 = vmul.f32 %v1300_v25, %v4259_v12  ;;  %v1428_v50 = vpop.permute.xlu0 %1427  ;;  %v4061_v23 = vld [vmem:[%s5773_s1 + $0x2] ss:$4 sm:$0x3] }
 0x22a   : > { %v1158_v30 = vsel %vm998_vm8, %v1153_v58, %v1157_v20  ;;  %v1320_v55 = vpack.c.bf16 %v1314_v37, %v1314_v37  ;;  %v1317_v43 = vpack.c.bf16 %v1311_v38, %v1308_v36  ;;  %v1310_v27 = vmul.f32 %v1300_v25, %v4469_v8 }
 0x22b   : > { %v1251_v39 = vsel %vm998_vm8, %v1247_v45, %v1250_v33  ;;  %v1159_v26 = vrot.slane %v1145_v40, 4  ;;  %v1239_v44 = vpack.c.bf16 %v1233_v41, %v1233_v41  ;;  %v1313_v47 = vmul.f32 %v1300_v25, %v4486_v22  ;;  %v954_v33 = vpop.permute.xlu1 %953 }
 0x22c   : > { %1256 = vrot.lane.b32.xlu1 %v1247_v45, %s4142_s29  ;;  %961 = vrot.lane.b32.xlu0 %v945_v46, %s4147_s28  ;;  %v1439_v54 = vmul.f32 %v1426_v51, %v4486_v22  ;;  %v1436_v0 = vmul.f32 %v1426_v51, %v4469_v8  ;;  %v1615_v3 = vrot.slane %v1606_v2, %v4234_v5 }
 0x22d   : > { %v1160_v45 = vsel %vm998_vm8, %v1154_v6, %v1159_v26  ;;  %v1252_v46 = vrot.slane %v1239_v44, 4  ;;  %v1319_v49 = vpack.c.bf16 %v1313_v47, %v1313_v47  ;;  %v1611_v10 = vrot.slane %v1606_v2, %v4232_v4 }
 0x22e   : > { %v1903_v19 = vrot.slane %v1894_v15, %v4234_v5  ;;  %v1797_v20 = vrot.slane %v4060_v7, %v4232_v4  ;;  %v1899_v25 = vrot.slane %v1894_v15, %v4232_v4  ;;  %v2042_v28 = vrot.slane %v4061_v23, %v4234_v5 }
 0x22f   : > { %v1253_v48 = vsel %vm998_vm8, %v1248_v17, %v1252_v46  ;;  %v2038_v35 = vrot.slane %v4061_v23, %v4232_v4 }
 0x230   : > { %963 = vrot.lane.b32.xlu1 %v946_v52, %s4147_s28  ;;  %1088 = vrot.lane.b32.xlu0 %v1072_v53, %s4146_s27  ;;  %v1435_v52 = vmul.f32 0.0, %v1428_v50  ;;  %v1429_v53 = vsel %vm520_vm6, %v1426_v51, %v1428_v50 }
 0x231   : > { %v1434_v57 = vmul.f32 %v1429_v53, %v4256_v11  ;;  %v1437_v59 = vmul.f32 %v1429_v53, %v4471_v13  ;;  %v1440_v60 = vmul.f32 %v1429_v53, %v4496_v31  ;;  %v1445_v11 = vpack.c.bf16 %v1439_v54, %v1439_v54 }
 0x232   : > { %v1444_v56 = vpack.c.bf16 %v1435_v52, %v1435_v52 }
 0x233   : > { %v1443_v62 = vpack.c.bf16 %v1437_v59, %v1434_v57 }
 0x234   : > { %1090 = vrot.lane.b32.xlu1 %v1073_v61, %s4146_s27  ;;  %1163 = vrot.lane.b32.xlu0 %v1153_v58, %s4145_s24  ;;  %v1433_v61 = vmul.f32 %v1426_v51, %v4259_v12  ;;  %v1446_v58 = vpack.c.bf16 %v1440_v60, %v1440_v60  ;;  %v1519_v12 = vld [vmem:[%s5777_s5 + $0x8] sm:$0xff] }
 0x236   : > { %v1442_v1 = vpack.c.bf16 %v1436_v0, %v1433_v61 }
 0x238   : > { %1165 = vrot.lane.b32.xlu1 %v1154_v6, %s4145_s24  ;;  %1016 = vrot.lane.b32.xlu0 %v1005_v9, %s5788_s14  ;;  %v1518_v6 = vld [vmem:[%s5777_s5] sm:$0xff] }
 0x23c   : > { %1258 = vrot.lane.b32.xlu1 %v1248_v17, %s4142_s29  ;;  %1332 = vrot.lane.b32.xlu0 %v1318_v16, %s4144_s19  ;;  %v960_v17 = vpop.permute.xlu0 %959 }
 0x240   : > { %1018 = vrot.lane.b32.xlu1 %v1007_v32, %s5788_s14  ;;  %1169 = vrot.lane.b32.xlu0 %v1158_v30, %s4145_s24  ;;  %v1015_v30 = vpop.permute.xlu0 %1014 }
 0x244   : > { %1266 = vrot.lane.b32.xlu1 %v4463_v63, %s4142_s29  ;;  %1262 = vrot.lane.b32.xlu0 %v1251_v39, %s4142_s29  ;;  %v1316_v63 = vpack.c.bf16 %v1310_v27, %v1307_v14  ;;  %v1087_v37 = vpop.permute.xlu0 %1086  ;;  %v1009_v39 = vpop.permute.xlu1 %1008 }
 0x248   : > { %1336 = vrot.lane.b32.xlu0 %v1320_v55, %s4144_s19  ;;  %1330 = vrot.lane.b32.xlu1 %v1317_v43, %s4144_s19  ;;  %v4648_v40 = vpop.permute.xlu0 %1167  ;;  %v1081_v41 = vpop.permute.xlu1 %1080 }
 0x24c   : > { %1384 = vrot.lane.b32.xlu0 %v4516_v42, %s5792_s13  ;;  %1171 = vrot.lane.b32.xlu1 %v1160_v45, %s4145_s24  ;;  %v1162_v55 = vpop.permute.xlu1 %1161  ;;  %v1261_v43 = vpop.permute.xlu0 %1260 }
 0x250   : > { %1264 = vrot.lane.b32.xlu0 %v1253_v48, %s4142_s29  ;;  %1328 = vrot.lane.b32.xlu1 %v1316_v63, %s4144_s19 }
 0x254   : > { %1334 = vrot.lane.b32.xlu0 %v1319_v49, %s4144_s19  ;;  %1338 = vrot.lane.b32.xlu1 %v1318_v16, %s4144_s19  ;;  %v4117_v16 = vld [vmem:[%s5776_s4 + $0x4] ss:$8 sps:$4 sm:$0xff]  }
 0x255   : > { %1572 = vmatprep.mubr.bf16.mxu1 %v4117_v16 }
 0x258   : > { %1390 = vrot.lane.b32.xlu0 %v1007_v32, %s5792_s13  ;;  %1386 = vrot.lane.b32.xlu1 %v4297_v29, %s5792_s13  ;;  %v2150_v32 = vld [vmem:[%s5773_s1] ss:$4 sm:$0x3] }
 0x259   : > { %v2159_v36 = vrot.slane %v2150_v32, %v4234_v5  ;;  %v2155_v38 = vrot.slane %v2150_v32, %v4232_v4 }
 0x25c   : > { %1388 = vrot.lane.b32.xlu0 %v1005_v9, %s5792_s13  ;;  %1382 = vrot.lane.b32.xlu1 %v4489_v24, %s5792_s13  ;;  %v1801_v9 = vrot.slane %v4060_v7, %v4234_v5 }
 0x260   : > { %1392 = vrot.lane.b32.xlu1 %v4297_v29, %s5792_s13  ;;  %1458 = vrot.lane.b32.xlu0 %v1444_v56, %s4143_s30 }
 0x264   : > { %1462 = vrot.lane.b32.xlu0 %v1446_v58, %s4143_s30  ;;  %1456 = vrot.lane.b32.xlu1 %v1443_v62, %s4143_s30 }
 0x268   : > { %1460 = vrot.lane.b32.xlu0 %v1445_v11, %s4143_s30  ;;  %1454 = vrot.lane.b32.xlu1 %v1442_v1, %s4143_s30 }
 0x26c   : > { %1527 = vperm.xlu0 %4112, %v1519_v12   ;;  %1464 = vrot.lane.b32.xlu1 %v1444_v56, %s4143_s30 }
 0x270   : > { %1522 = vperm.xlu1 %4113, %v1518_v6   ;;  %1618 = vrot.lane.b32.xlu0 %v1615_v3, %s4143_s30 }
 0x274   : > { %1804 = vrot.lane.b32.xlu0 %v1801_v9, %s4144_s19  ;;  %1616 = vrot.lane.b32.xlu1 %v1611_v10, %s4143_s30 }
 0x278   : > { %1906 = vrot.lane.b32.xlu0 %v1903_v19, %s4142_s29  ;;  %1802 = vrot.lane.b32.xlu1 %v1797_v20, %s4144_s19 }
 0x27c   : > { %1904 = vrot.lane.b32.xlu1 %v1899_v25, %s4142_s29  ;;  %2045 = vrot.lane.b32.xlu0 %v2042_v28, %s4145_s24 }
 0x280   : > { %2043 = vrot.lane.b32.xlu1 %v2038_v35, %s4145_s24  ;;  %2162 = vrot.lane.b32.xlu0 %v2159_v36, %s4146_s27 }
 0x284   : > { %2160 = vrot.lane.b32.xlu1 %v2155_v38, %s4146_s27 }
 0x292   : > { %v956_v26 = vpop.permute.xlu1 %955  ;;  %v1011_v44 = vpop.permute.xlu0 %1010 }
 0x293   : > { %v1020_v14 = vsel %vm545_vm4, %v1009_v39, %v1011_v44  ;;  %v965_v63 = vsel %vm520_vm6, %v954_v33, %v956_v26 }
 0x294   : > { %1028 = vst [vmem:[#allocation3 + $0x10] sm:$0xf0] %v1020_v14 }
 0x296   : > { %v1083_v27 = vpop.permute.xlu1 %1082  ;;  %v958_v45 = vpop.permute.xlu0 %957 }
 0x297   : > { %v966_v46 = vsel %vm520_vm6, %v956_v26, %v958_v45  ;;  %v1092_v23 = vsel %vm590_vm1, %v1081_v41, %v1083_v27 }
 0x298   : > { %1540 = vmatprep.subr.bf16.mxu1 %v966_v46 }
 0x299   : > { %1541 = vmatpush1.bf16.msra.mxu1 %v965_v63 }
 0x29a   : > { %v1013_v47 = vpop.permute.xlu1 %1012  ;;  %v1085_v48 = vpop.permute.xlu0 %1084 }
 0x29b   : > { %v1021_v49 = vsel %vm545_vm4, %v1011_v44, %v1013_v47 }
 0x29c   : > { %1029 = vst [vmem:[#allocation3 + $0x18] sm:$0xf0] %v1021_v49 }
 0x29e   : > { %v1257_v50 = vpop.permute.xlu1 %1256  ;;  %v962_v51 = vpop.permute.xlu0 %961 }
 0x29f   : > { %v967_v52 = vsel %vm520_vm6, %v960_v17, %v962_v51  ;;  %v1093_v17 = vsel %vm590_vm1, %v1083_v27, %v1085_v48 }
 0x2a0   : > { %975 = vst [vmem:[#allocation3 + $0x10] sm:$0xf] %v967_v52 }
 0x2a2   : > { %v964_v53 = vpop.permute.xlu1 %963  ;;  %v1089_v56 = vpop.permute.xlu0 %1088 }
 0x2a3   : > { %v968_v57 = vsel %vm520_vm6, %v962_v51, %v964_v53  ;;  %v1094_v59 = vsel %vm590_vm1, %v1087_v37, %v1089_v56 }
 0x2a4   : > { %976 = vst [vmem:[#allocation3 + $0x18] sm:$0xf] %v968_v57  ;;  %1102 = vst [vmem:[#allocation3 + $0x40] sm:$0xf] %v1094_v59 }
 0x2a6   : > { %v1091_v60 = vpop.permute.xlu1 %1090  ;;  %v1164_v61 = vpop.permute.xlu0 %1163 }
 0x2a7   : > { %v1095_v58 = vsel %vm590_vm1, %v1089_v56, %v1091_v60  ;;  %v1173_v62 = vsel %vm637_vm5, %v1162_v55, %v1164_v61  ;;  %v1488_v2 = vld [vmem:[#allocation3 + $0x10] sm:$0xff] }
 0x2a8   : > { %1103 = vst [vmem:[#allocation3 + $0x48] sm:$0xf] %v1095_v58  ;;  %1181 = vst [vmem:[#allocation3 + $0x40] sm:$0xf0] %v1173_v62 }
 0x2aa   : > { %v1166_v54 = vpop.permute.xlu1 %1165  ;;  %v1017_v0 = vpop.permute.xlu0 %1016 }
 0x2ab   : > { %v1174_v11 = vsel %vm637_vm5, %v1164_v61, %v1166_v54  ;;  %v1022_v1 = vsel %vm545_vm4, %v1015_v30, %v1017_v0  ;;  %v1489_v12 = vld [vmem:[#allocation3 + $0x18] sm:$0xff] }
 0x2ac   : > { %1182 = vst [vmem:[#allocation3 + $0x48] sm:$0xf0] %v1174_v11  ;;  %1030 = vst [vmem:[#allocation3 + $0x20] sm:$0xff] %v1022_v1  ;;  %1542 = vmatprep.subr.bf16.mxu1 %v1489_v12 }
 0x2ad   : > { %1543 = vmatpush1.bf16.msra.mxu1 %v1488_v2 }
 0x2ae   : > { %v1259_v3 = vpop.permute.xlu1 %1258  ;;  %v1333_v6 = vpop.permute.xlu0 %1332 }
 0x2af   : > { %v1268_v7 = vsel %vm614_vm3, %v1257_v50, %v1259_v3  ;;  %v1269_v9 = vsel %vm614_vm3, %v1259_v3, %v1261_v43  ;;  %v1494_v30 = vld [vmem:[#allocation3 + $0x40] sm:$0xff] }
 0x2b0   : > { %1276 = vst [vmem:[#allocation3 + $0x70] sm:$0xf0] %v1268_v7  ;;  %1277 = vst [vmem:[#allocation3 + $0x78] sm:$0xf0] %v1269_v9  ;;  %v4115_v9 = vld [vmem:[%s5776_s4] ss:$8 sps:$4 sm:$0xff]  }
 0x2b2   : > { %v1019_v10 = vpop.permute.xlu1 %1018  ;;  %v1170_v15 = vpop.permute.xlu0 %1169 }
 0x2b3   : > { %v1023_v16 = vsel %vm545_vm4, %v1017_v0, %v1019_v10  ;;  %v1495_v25 = vld [vmem:[#allocation3 + $0x48] sm:$0xff]  ;;  %v1175_v37 = vsel %vm637_vm5, %v4648_v40, %v1170_v15 }
 0x2b4   : > { %1031 = vst [vmem:[#allocation3 + $0x28] sm:$0xff] %v1023_v16  ;;  %1544 = vmatprep.subr.bf16.mxu1 %v1023_v16  ;;  %v4700_v10 = vld [vmem:[%s4253_s16 + $0x8] sm:$0xff] }
 0x2b5   : > { %1545 = vmatpush1.bf16.msra.mxu1 %v1022_v1 }
 0x2b6   : > { %v1267_v19 = vpop.permute.xlu1 %1266  ;;  %v1263_v20 = vpop.permute.xlu0 %1262  ;;  %1546 = vmatprep.subr.bf16.mxu1 %v1093_v17 }
 0x2b7   : > { %v1501_v41 = vld [vmem:[#allocation3 + $0x78] sm:$0xff]  ;;  %v1500_v14 = vld [vmem:[#allocation3 + $0x70] sm:$0xff] }
 0x2b9   : > { %1547 = vmatpush1.bf16.msra.mxu1 %v1092_v23 }
 0x2ba   : > { %v1331_v28 = vpop.permute.xlu1 %1330  ;;  %v1337_v32 = vpop.permute.xlu0 %1336  ;;  %1548 = vmatprep.subr.bf16.mxu1 %v1495_v25  ;;  %v4713_v25 = vld [vmem:[%s4253_s16] sm:$0xff] }
 0x2bb   : > { %v1341_v47 = vsel %vm570_vm2, %v1331_v28, %v1333_v6 }
 0x2bd   : > { %1549 = vmatpush1.bf16.msra.mxu1 %v1494_v30 }
 0x2be   : > { %v1172_v33 = vpop.permute.xlu1 %1171  ;;  %v1385_v35 = vpop.permute.xlu0 %1384 }
 0x2bf   : > { %v1176_v36 = vsel %vm637_vm5, %v1170_v15, %v1172_v33 }
 0x2c0   : > { %1550 = vmatprep.subr.bf16.mxu1 %v1176_v36  ;;  %v4062_v36 = vld [vmem:[%s5773_s1 + $0x2] ss:$4 sm:$0x3] }
 0x2c1   : > { %1551 = vmatpush1.bf16.msra.mxu1 %v1175_v37 }
 0x2c2   : > { %v1329_v38 = vpop.permute.xlu1 %1328  ;;  %v1265_v39 = vpop.permute.xlu0 %1264  ;;  %1552 = vmatprep.subr.bf16.mxu1 %v4484_v21 }
 0x2c3   : > { %v1271_v40 = vsel %vm614_vm3, %v1265_v39, %v1267_v19  ;;  %v1270_v63 = vsel %vm614_vm3, %v1263_v20, %v1265_v39  ;;  %v1340_v51 = vsel %vm570_vm2, %v1329_v38, %v1331_v28  ;;  %v2345_v38 = vrot.slane %v4062_v36, %v4234_v5 }
 0x2c5   : > { %1553 = vmatpush1.bf16.msra.mxu1 %v4477_v18 }
 0x2c6   : > { %v1339_v55 = vpop.permute.xlu1 %1338  ;;  %v1335_v43 = vpop.permute.xlu0 %1334  ;;  %1554 = vmatprep.subr.bf16.mxu1 %v1501_v41 }
 0x2c7   : > { %v1343_v26 = vsel %vm570_vm2, %v1337_v32, %v1339_v55  ;;  %v1342_v44 = vsel %vm570_vm2, %v1335_v43, %v1337_v32 }
 0x2c8   : > { %1351 = vst [vmem:[#allocation3 + $0xa8] sm:$0xf] %v1343_v26  ;;  %1350 = vst [vmem:[#allocation3 + $0xa0] sm:$0xf] %v1342_v44 }
 0x2c9   : > { %1555 = vmatpush1.bf16.msra.mxu1 %v1500_v14  ;;  %v2341_v14 = vrot.slane %v4062_v36, %v4232_v4 }
 0x2ca   : > { %v1387_v27 = vpop.permute.xlu1 %1386  ;;  %v1391_v45 = vpop.permute.xlu0 %1390  ;;  %1556 = vmatprep.subr.bf16.mxu1 %v1271_v40 }
 0x2cb   : > { %v1395_v46 = vsel %vm759_vm7, %v1385_v35, %v1387_v27 }
 0x2cc   : > { %1403 = vst [vmem:[#allocation3 + $0xa8] sm:$0xf0] %v1395_v46 }
 0x2cd   : > { %1557 = vmatpush1.bf16.msra.mxu1 %v1270_v63 }
 0x2ce   : > { %v1383_v48 = vpop.permute.xlu1 %1382  ;;  %v1389_v49 = vpop.permute.xlu0 %1388  ;;  %1558 = vmatprep.subr.bf16.mxu1 %v1341_v47 }
 0x2cf   : > { %v1394_v50 = vsel %vm759_vm7, %v1383_v48, %v1385_v35  ;;  %v1396_v0 = vsel %vm759_vm7, %v1389_v49, %v1391_v45 }
 0x2d0   : > { %1402 = vst [vmem:[#allocation3 + $0xa0] sm:$0xf0] %v1394_v50 }
 0x2d1   : > { %1559 = vmatpush1.bf16.msra.mxu1 %v1340_v51 }
 0x2d2   : > { %v1393_v52 = vpop.permute.xlu1 %1392  ;;  %v1459_v53 = vpop.permute.xlu0 %1458 }
 0x2d3   : > { %v1507_v56 = vld [vmem:[#allocation3 + $0xa8] sm:$0xff]  ;;  %v1397_v58 = vsel %vm759_vm7, %v1391_v45, %v1393_v52 }
 0x2d4   : > { %1560 = vmatprep.subr.bf16.mxu1 %v1507_v56  ;;  %2013 = vst [vmem:[#allocation3 + $0xa8] sm:$0xff] %v4484_v21 }
 0x2d6   : > { %v1457_v57 = vpop.permute.xlu1 %1456  ;;  %v1463_v59 = vpop.permute.xlu0 %1462 }
 0x2d7   : > { %v1467_v60 = vsel %vm500_vm0, %v1457_v57, %v1459_v53  ;;  %v1506_v61 = vld [vmem:[#allocation3 + $0xa0] sm:$0xff] }
 0x2d8   : > { %1475 = vst [vmem:[#allocation3 + $0xc8] sm:$0xff] %v1467_v60  ;;  %1561 = vmatpush1.bf16.msra.mxu1 %v1506_v61  ;;  %2012 = vst [vmem:[#allocation3 + $0xa0] sm:$0xff] %v4477_v18 }
 0x2d9   : > { %1562 = vmatprep.subr.bf16.mxu1 %v1397_v58 }
 0x2da   : > { %v1455_v62 = vpop.permute.xlu1 %1454  ;;  %v1461_v54 = vpop.permute.xlu0 %1460 }
 0x2db   : > { %v1466_v11 = vsel %vm500_vm0, %v1455_v62, %v1457_v57  ;;  %v1468_v21 = vsel %vm500_vm0, %v1461_v54, %v1463_v59 }
 0x2dc   : > { %1474 = vst [vmem:[#allocation3 + $0xc0] sm:$0xff] %v1466_v11  ;;  %1476 = vst [vmem:[#allocation3 + $0xd0] sm:$0xf] %v1468_v21  ;;  %1563 = vmatpush1.bf16.msra.mxu1 %v1396_v0 }
 0x2dd   : > { %1564 = vmatprep.subr.bf16.mxu1 %v1467_v60 }
 0x2de   : > { %v1465_v1 = vpop.permute.xlu1 %1464 }
 0x2df   : > { %v1469_v12 = vsel %vm500_vm0, %v1463_v59, %v1465_v1 }
 0x2e0   : > { %1477 = vst [vmem:[#allocation3 + $0xd8] sm:$0xf] %v1469_v12  ;;  %1565 = vmatpush1.bf16.msra.mxu1 %v1466_v11 }
 0x2e3   : > { %v1512_v2 = vld [vmem:[#allocation3 + $0xd0] sm:$0xff] }
 0x2e7   : > { %v1513_v18 = vld [vmem:[#allocation3 + $0xd8] sm:$0xff] }
 0x2e8   : > { %1566 = vmatprep.subr.bf16.mxu1 %v1513_v18 }
 0x2e9   : > { %1567 = vmatpush1.bf16.msra.mxu1 %v1512_v2 }
 0x2ea   : > { %1568 = vmatprep.subr.bf16.mxu1 %v4151_v34 }
 0x2eb   : > { %v4688_v3 = vpop.permute.xlu0 %1527 }
 0x2ed   : > { %1569 = vmatpush1.bf16.msra.mxu1 %v4151_v34 }
 0x2ee   : > { %1570 = vmatprep.subr.bf16.mxu1 %v4151_v34 }
 0x2ef   : > { %v4692_v6 = vpop.permute.xlu1 %1522  ;;  %v4694_v7 = vpop.permute.xlu0 %1618 }
 0x2f0   : > { %v1626_v15 = vmul.f32 %v4700_v10, %v4694_v7  ;;  %v1629_v16 = vmul.f32 %v4694_v7, %v4471_v13 }
 0x2f1   : > { %1571 = vmatpush1.bf16.msra.mxu1 %v4151_v34 }
 0x2f2   : > { %v1641_v17 = vpack.c.bf16 %v1629_v16, %v1626_v15 }
 0x2f3   : > { %v1617_v19 = vpop.permute.xlu1 %1616  ;;  %v4726_v35 = vpop.permute.xlu0 %1804 }
 0x2f4   : > { %v4709_v20 = vsel %vm500_vm0, %v1617_v19, %v4694_v7  ;;  %v1624_v23 = vmul.f32 0.0, %v1617_v19  ;;  %1573 = vmatmul.mubr.bf16.vlgmr.msra.gmra.mrb[0].mxu1 %v4115_v9  ;;  %1661 = vrot.lane.b32.xlu0 %v1641_v17, %s4147_s28  ;;  %v1812_v39 = vmul.f32 %v4700_v10, %v4726_v35  ;;  %v1815_v41 = vmul.f32 %v4726_v35, %v4471_v13 }
 0x2f5   : > { %v1625_v28 = vmul.f32 %v4713_v25, %v4709_v20  ;;  %v1628_v32 = vmul.f32 %v4709_v20, %v4469_v8 }
 0x2f6   : > { %v1639_v30 = vpack.c.bf16 %v1624_v23, %v1624_v23  ;;  %v1827_v40 = vpack.c.bf16 %v1815_v41, %v1812_v39 }
 0x2f7   : > { %v1640_v33 = vpack.c.bf16 %v1628_v32, %v1625_v28  ;;  %v1803_v37 = vpop.permute.xlu1 %1802  ;;  %v4741_v55 = vpop.permute.xlu0 %1906 }
 0x2f8   : > { %1663 = vrot.lane.b32.xlu0 %v1639_v30, %s4147_s28  ;;  %v4745_v43 = vsel %vm570_vm2, %v1803_v37, %v4726_v35  ;;  %v1810_v26 = vmul.f32 0.0, %v1803_v37  ;;  %v1914_v27 = vmul.f32 %v4700_v10, %v4741_v55  ;;  %v1917_v45 = vmul.f32 %v4741_v55, %v4471_v13 }
 0x2f9   : > { %1659 = vrot.lane.b32.xlu1 %v1640_v33, %s4147_s28  ;;  %v1811_v46 = vmul.f32 %v4713_v25, %v4745_v43  ;;  %v1814_v63 = vmul.f32 %v4745_v43, %v4469_v8 }
 0x2fa   : > { %v1825_v47 = vpack.c.bf16 %v1810_v26, %v1810_v26  ;;  %v1929_v50 = vpack.c.bf16 %v1917_v45, %v1914_v27 }
 0x2fb   : > { %v1905_v44 = vpop.permute.xlu1 %1904  ;;  %v1826_v53 = vpack.c.bf16 %v1814_v63, %v1811_v46  ;;  %v2046_v59 = vpop.permute.xlu0 %2045 }
 0x2fc   : > { %1745 = vrot.lane.b32.xlu0 %v4516_v42, %s5793_s23  ;;  %v4761_v48 = vsel %vm614_vm3, %v1905_v44, %v4741_v55  ;;  %v1912_v49 = vmul.f32 0.0, %v1905_v44  ;;  %v4771_v57 = vrot.slane %v1929_v50, 4  ;;  %v2053_v58 = vmul.f32 0.0, %v2046_v59 }
 0x2fd   : > { %1657 = vrot.lane.b32.xlu1 %v1639_v30, %s4147_s28  ;;  %v1913_v51 = vmul.f32 %v4713_v25, %v4761_v48  ;;  %v1916_v52 = vmul.f32 %v4761_v48, %v4469_v8 }
 0x2fe   : > { %v1927_v56 = vpack.c.bf16 %v1912_v49, %v1912_v49  ;;  %v2068_v11 = vpack.c.bf16 %v2053_v58, %v2053_v58 }
 0x2ff   : > { %v1928_v60 = vpack.c.bf16 %v1916_v52, %v1913_v51  ;;  %v4775_v62 = vpop.permute.xlu1 %2043  ;;  %v4802_v9 = vpop.permute.xlu0 %2162 }
 0x300   : > { %1741 = vrot.lane.b32.xlu0 %v4297_v29, %s5793_s23  ;;  %v1945_v61 = vrot.slane %v1927_v56, 4  ;;  %v4782_v0 = vsel %vm637_vm5, %v4775_v62, %v2046_v59  ;;  %v4791_v12 = vrot.slane %v2068_v11, 4 }
 0x301   : > { %1743 = vrot.lane.b32.xlu1 %v4489_v24, %s5793_s23  ;;  %v4778_v54 = vrot.slane %v1928_v60, 4  ;;  %v2052_v21 = vmul.f32 %v4700_v10, %v4782_v0  ;;  %v2055_v1 = vmul.f32 %v4782_v0, %v4471_v13 }
 0x303   : > { %v2067_v18 = vpack.c.bf16 %v2055_v1, %v2052_v21  ;;  %v4804_v16 = vpop.permute.xlu1 %2160 }
 0x304   : > { %1753 = vrot.lane.b32.xlu0 %v4297_v29, %s5793_s23 }
 0x305   : > { %1669 = vrot.lane.b32.xlu1 %v1639_v30, %s4147_s28  ;;  %v4798_v2 = vrot.slane %v2067_v18, 4 }
 0x308   : > { %2348 = vrot.lane.b32.xlu0 %v2345_v38, %s4147_s28 }
 0x309   : > { %1747 = vrot.lane.b32.xlu1 %v4297_v29, %s5793_s23 }
 0x30c   : > { %1847 = vrot.lane.b32.xlu0 %v1827_v40, %s4146_s27 }
 0x30d   : > { %2346 = vrot.lane.b32.xlu1 %v2341_v14, %s4147_s28 }
 0x310   : > { %1849 = vrot.lane.b32.xlu0 %v1825_v47, %s4146_s27 }
 0x311   : > { %1845 = vrot.lane.b32.xlu1 %v1826_v53, %s4146_s27 }
 0x314   : > { %1964 = vrot.lane.b32.xlu0 %v4771_v57, %s4145_s24 }
 0x315   : > { %1843 = vrot.lane.b32.xlu1 %v1825_v47, %s4146_s27 }
 0x318   : > { %1960 = vrot.lane.b32.xlu0 %v1945_v61, %s4145_s24 }
 0x319   : > { %1962 = vrot.lane.b32.xlu1 %v4778_v54, %s4145_s24 }
 0x31c   : > { %1972 = vrot.lane.b32.xlu0 %v1945_v61, %s4145_s24 }
 0x31d   : > { %1855 = vrot.lane.b32.xlu1 %v1825_v47, %s4146_s27 }
 0x320   : > { %2103 = vrot.lane.b32.xlu0 %v4791_v12, %s4142_s29 }
 0x321   : > { %1966 = vrot.lane.b32.xlu1 %v1945_v61, %s4145_s24 }
 0x325   : > { %2101 = vrot.lane.b32.xlu1 %v4798_v2, %s4142_s29 }
 0x366   : > { %v1662_v15 = vpop.permute.xlu0 %1661 }
 0x36a   : > { %v4806_v17 = vpop.permute.xlu0 %1663 }
 0x36b   : > { %v1660_v19 = vpop.permute.xlu1 %1659 }
 0x36c   : > { %v1676_v23 = vsel %vm520_vm6, %v1660_v19, %v1662_v15 }
 0x36d   : > { %2507 = vmatprep.subr.bf16.mxu0 %v1676_v23 }
 0x36e   : > { %v1746_v28 = vpop.permute.xlu0 %1745 }
 0x36f   : > { %v1658_v32 = vpop.permute.xlu1 %1657 }
 0x370   : > { %v1675_v30 = vsel %vm520_vm6, %v1658_v32, %v1660_v19 }
 0x371   : > { %2508 = vmatpush1.bf16.msra.mxu0 %v1675_v30 }
 0x372   : > { %v1742_v33 = vpop.permute.xlu0 %1741 }
 0x373   : > { %v1744_v36 = vpop.permute.xlu1 %1743 }
 0x374   : > { %v1759_v37 = vsel %vm545_vm4, %v1742_v33, %v1744_v36  ;;  %v1760_v38 = vsel %vm545_vm4, %v1744_v36, %v1746_v28  ;;  %v1631_v33 = vmul.f32 %v4709_v20, %v4486_v22 }
 0x375   : > { %1771 = vst [vmem:[#allocation3 + $0x20] sm:$0xf0] %v1759_v37  ;;  %1772 = vst [vmem:[#allocation3 + $0x28] sm:$0xf0] %v1760_v38  ;;  %v1632_v37 = vmul.f32 %v4694_v7, %v4496_v31 }
 0x376   : > { %v4812_v39 = vpop.permute.xlu0 %1753 }
 0x377   : > { %v4814_v41 = vpop.permute.xlu1 %1669 }
 0x37a   : > { %v4816_v26 = vpop.permute.xlu0 %2348 }
 0x37b   : > { %v4818_v44 = vpop.permute.xlu1 %1747 }
 0x37e   : > { %v4820_v14 = vpop.permute.xlu0 %1847 }
 0x37f   : > { %v4822_v40 = vpop.permute.xlu1 %2346 }
 0x382   : > { %v4824_v27 = vpop.permute.xlu0 %1849 }
 0x383   : > { %v4826_v45 = vpop.permute.xlu1 %1845 }
 0x386   : > { %v1965_v46 = vpop.permute.xlu0 %1964 }
 0x387   : > { %v4828_v63 = vpop.permute.xlu1 %1843 }
 0x38a   : > { %v1961_v47 = vpop.permute.xlu0 %1960 }
 0x38b   : > { %v1963_v49 = vpop.permute.xlu1 %1962 }
 0x38c   : > { %v1979_v50 = vsel %vm637_vm5, %v1963_v49, %v1965_v46  ;;  %v1978_v51 = vsel %vm637_vm5, %v1961_v47, %v1963_v49 }
 0x38d   : > { %1991 = vst [vmem:[#allocation3 + $0x78] sm:$0xf0] %v1979_v50  ;;  %1990 = vst [vmem:[#allocation3 + $0x70] sm:$0xf0] %v1978_v51  ;;  %v1817_v51 = vmul.f32 %v4745_v43, %v4486_v22 }
 0x38e   : > { %v4834_v53 = vpop.permute.xlu0 %1972 }
 0x38f   : > { %v4832_v52 = vpop.permute.xlu1 %1855 }
 0x392   : > { %v2104_v59 = vpop.permute.xlu0 %2103 }
 0x393   : > { %v4836_v56 = vpop.permute.xlu1 %1966 }
 0x397   : > { %v4838_v60 = vpop.permute.xlu1 %2101 }
 0x398   : > { %v2118_v61 = vsel %vm614_vm3, %v4838_v60, %v2104_v59 }
 0x399   : > { %2130 = vst [vmem:[#allocation3 + $0xc8] sm:$0xf0] %v2118_v61 }
 0x3c7   : > { %v1574_v58 = vpop.f32.mrb[0].mxu1 }
 0x3c8   : > { %v1575_v11 = vadd.f32 %v1574_v58, %v4692_v6  ;;  %v1576_v21 = vpop.f32.mrb[1].mxu1 }
 0x3c9   : > { %v1577_v1 = vadd.f32 %v1576_v21, %v4692_v6  ;;  %v1578_v18 = vpop.f32.mrb[2].mxu1 }
 0x3ca   : > { %v4844_v15 = vmax.f32 %v1575_v11, 0.0  ;;  %v1579_v19 = vadd.f32 %v1578_v18, %v4688_v3  ;;  %v1580_v23 = vpop.f32.mrb[3].mxu1 }
 0x3cb   : > { %v4847_v28 = vmax.f32 %v1577_v1, 0.0  ;;  %v1581_v32 = vadd.f32 %v1580_v23, %v4688_v3 }
 0x3cc   : > { %v4850_v30 = vmax.f32 %v1579_v19, 0.0  ;;  %v1634_v36 = vmul.f32 %v4709_v20, %v4844_v15  ;;  %v4858_v6 = vpack.c.bf16 %v4844_v15, %v4486_v22  ;;  %v1820_v49 = vmul.f32 %v4745_v43, %v4844_v15 }
 0x3cd   : > { %v1635_v38 = vmul.f32 %v4694_v7, %v4847_v28  ;;  %v4866_v3 = vpack.c.bf16 %v4847_v28, %v4496_v31  ;;  %v4868_v46 = vmax.f32 %v1581_v32, 0.0  ;;  %v1821_v1 = vmul.f32 %v4726_v35, %v4847_v28 }
 0x3ce   : > { %v1643_v47 = vpack.c.bf16 %v1634_v36, %v1631_v33  ;;  %3156 = vst [vmem:[#allocation3 + $0xf0] sm:$0xff] %v4858_v6  ;;  %v4878_v59 = vrot.slane %v4858_v6, 4  ;;  %v1715_v61 = vpack.c.bf16 %v4850_v30, %v4850_v30  ;;  %v1829_v58 = vpack.c.bf16 %v1820_v49, %v1817_v51 }
 0x3cf   : > { %v1644_v50 = vpack.c.bf16 %v1635_v38, %v1632_v37  ;;  %3157 = vst [vmem:[#allocation3 + $0xf8] sm:$0xff] %v4866_v3  ;;  %v1716_v11 = vpack.c.bf16 %v4868_v46, %v4868_v46  ;;  %v4886_v21 = vrot.slane %v4866_v3, 4  ;;  %v1818_v19 = vmul.f32 %v4726_v35, %v4496_v31 }
 0x3d0   : > { %1665 = vrot.lane.b32.xlu0 %v1643_v47, %s4147_s28  ;;  %2016 = vst [vmem:[#allocation3 + $0xc0] sm:$0xf] %v1715_v61  ;;  %v4894_v18 = vsel %vm998_vm8, %v4489_v24, %v4878_v59  ;;  %v1638_v23 = vmul.f32 %v4694_v7, %v4868_v46  ;;  %v1637_v36 = vmul.f32 %v4709_v20, %v4850_v30  ;;  %v1737_v49 = vrot.slane %v1715_v61, 4 }
 0x3d1   : > { %1667 = vrot.lane.b32.xlu1 %v1644_v50, %s4147_s28  ;;  %2017 = vst [vmem:[#allocation3 + $0xc8] sm:$0xf] %v1716_v11  ;;  %v4905_v32 = vsel %vm998_vm8, %v4516_v42, %v4886_v21  ;;  %v1830_v33 = vpack.c.bf16 %v1821_v1, %v1818_v19  ;;  %v1922_v37 = vmul.f32 %v4761_v48, %v4844_v15 }
 0x3d2   : > { %v1919_v7 = vmul.f32 %v4761_v48, %v4486_v22  ;;  %v1647_v38 = vpack.c.bf16 %v1638_v23, %v1638_v23  ;;  %v1646_v47 = vpack.c.bf16 %v1637_v36, %v1637_v36  ;;  %v1823_v50 = vmul.f32 %v4745_v43, %v4850_v30 }
 0x3d3   : > { %v2060_v20 = vmul.f32 %v4775_v62, %v4844_v15  ;;  %v2054_v1 = vmul.f32 %v4775_v62, %v4469_v8  ;;  %v2057_v61 = vmul.f32 %v4775_v62, %v4486_v22  ;;  %v1824_v43 = vmul.f32 %v4726_v35, %v4868_v46 }
 0x3d4   : > { %1851 = vrot.lane.b32.xlu0 %v1829_v58, %s4146_s27  ;;  %v1931_v51 = vpack.c.bf16 %v1922_v37, %v1919_v7  ;;  %v2051_v58 = vmul.f32 %v4713_v25, %v4775_v62  ;;  %v4932_v19 = vsel %vm998_vm8, %v4878_v59, %v1737_v49  ;;  %v1832_v23 = vpack.c.bf16 %v1823_v50, %v1823_v50 }
 0x3d5   : > { %1749 = vrot.lane.b32.xlu1 %v4894_v18, %s5793_s23  ;;  %v1833_v7 = vpack.c.bf16 %v1824_v43, %v1824_v43  ;;  %v1739_v49 = vrot.slane %v1716_v11, 4 }
 0x3d6   : > { %v1950_v36 = vrot.slane %v1931_v51, 4  ;;  %v2066_v37 = vpack.c.bf16 %v2054_v1, %v2051_v58  ;;  %v2061_v1 = vmul.f32 %v4782_v0, %v4847_v28 }
 0x3d8   : > { %1751 = vrot.lane.b32.xlu0 %v4905_v32, %s5793_s23  ;;  %v1951_v35 = vsel %vm998_vm8, %v4778_v54, %v1950_v36  ;;  %v2084_v50 = vrot.slane %v2066_v37, 4  ;;  %v2058_v54 = vmul.f32 %v4782_v0, %v4496_v31  ;;  %v2170_v37 = vmul.f32 0.0, %v4802_v9 }
 0x3d9   : > { %1853 = vrot.lane.b32.xlu1 %v1830_v33, %s4146_s27  ;;  %v2069_v33 = vpack.c.bf16 %v2060_v20, %v2057_v61  ;;  %v1920_v20 = vmul.f32 %v4741_v55, %v4496_v31  ;;  %v4951_v61 = vsel %vm998_vm8, %v4886_v21, %v1739_v49 }
 0x3da   : > { %v2070_v43 = vpack.c.bf16 %v2061_v1, %v2058_v54 }
 0x3dc   : > { %1673 = vrot.lane.b32.xlu0 %v1647_v38, %s4147_s28  ;;  %v2087_v38 = vrot.slane %v2069_v33, 4  ;;  %v2063_v33 = vmul.f32 %v4775_v62, %v4850_v30  ;;  %v2164_v62 = vsel %vm590_vm1, %v4804_v16, %v4802_v9 }
 0x3dd   : > { %1671 = vrot.lane.b32.xlu1 %v1646_v47, %s4147_s28  ;;  %v1923_v47 = vmul.f32 %v4741_v55, %v4847_v28  ;;  %v2172_v1 = vmul.f32 %v2164_v62, %v4471_v13 }
 0x3de   : > { %v2088_v51 = vsel %vm998_vm8, %v2084_v50, %v2087_v38  ;;  %v2072_v49 = vpack.c.bf16 %v2063_v33, %v2063_v33  ;;  %v2178_v33 = vmul.f32 %v2164_v62, %v4847_v28 }
 0x3df   : > { %v1932_v58 = vpack.c.bf16 %v1923_v47, %v1920_v20  ;;  %v2089_v47 = vrot.slane %v2070_v43, 4  ;;  %v2185_v20 = vpack.c.bf16 %v2170_v37, %v2170_v37  ;;  %v2168_v43 = vmul.f32 %v4713_v25, %v4804_v16 }
 0x3e0   : > { %1755 = vrot.lane.b32.xlu0 %v4932_v19, %s5793_s23 }
 0x3e1   : > { %1857 = vrot.lane.b32.xlu1 %v1832_v23, %s4146_s27  ;;  %v1952_v11 = vrot.slane %v1932_v58, 4  ;;  %v1925_v23 = vmul.f32 %v4761_v48, %v4850_v30  ;;  %v1926_v48 = vmul.f32 %v4741_v55, %v4868_v46  ;;  %v2169_v55 = vmul.f32 %v4700_v10, %v2164_v62 }
 0x3e3   : > { %v1935_v58 = vpack.c.bf16 %v1926_v48, %v1926_v48  ;;  %v2181_v48 = vmul.f32 %v2164_v62, %v4868_v46 }
 0x3e4   : > { %1859 = vrot.lane.b32.xlu0 %v1833_v7, %s4146_s27  ;;  %v1953_v7 = vsel %vm998_vm8, %v4771_v57, %v1952_v11 }
 0x3e5   : > { %1968 = vrot.lane.b32.xlu1 %v1951_v35, %s4145_s24  ;;  %v1934_v35 = vpack.c.bf16 %v1925_v23, %v1925_v23  ;;  %v1958_v54 = vrot.slane %v1935_v58, 4  ;;  %v2171_v23 = vmul.f32 %v4804_v16, %v4469_v8  ;;  %v2180_v58 = vmul.f32 %v4804_v16, %v4850_v30 }
 0x3e7   : > { %v1956_v57 = vrot.slane %v1934_v35, 4  ;;  %v2183_v37 = vpack.c.bf16 %v2171_v23, %v2168_v43  ;;  %v2177_v35 = vmul.f32 %v4804_v16, %v4844_v15 }
 0x3e8   : > { %2105 = vrot.lane.b32.xlu0 %v2088_v51, %s4142_s29  ;;  %v2093_v51 = vrot.slane %v2072_v49, 4  ;;  %v2174_v49 = vmul.f32 %v4804_v16, %v4486_v22  ;;  %v4120_v16 = vld [vmem:[%s5778_s6 + $0x4] ss:$12 sps:$4 sm:$0xff]  }
 0x3e9   : > { %1757 = vrot.lane.b32.xlu1 %v4951_v61, %s5793_s23  ;;  %2539 = vmatprep.mubr.bf16.mxu0 %v4120_v16 }
 0x3ea   : > { %v2094_v9 = vsel %vm998_vm8, %v2087_v38, %v2093_v51  ;;  %v2175_v38 = vmul.f32 %v2164_v62, %v4496_v31 }
 0x3ec   : > { %2115 = vrot.lane.b32.xlu0 %v4791_v12, %s4142_s29 }
 0x3ed   : > { %2099 = vrot.lane.b32.xlu1 %v2084_v50, %s4142_s29  ;;  %v2090_v50 = vsel %vm998_vm8, %v4798_v2, %v2089_v47  ;;  %v2184_v2 = vpack.c.bf16 %v2172_v1, %v2169_v55  ;;  %v2189_v55 = vpack.c.bf16 %v2180_v58, %v2180_v58 }
 0x3f0   : > { %1970 = vrot.lane.b32.xlu0 %v1953_v7, %s4145_s24  ;;  %v2187_v7 = vpack.c.bf16 %v2178_v33, %v2175_v38 }
 0x3f1   : > { %2109 = vrot.lane.b32.xlu1 %v4791_v12, %s4142_s29  ;;  %v1957_v12 = vsel %vm998_vm8, %v1950_v36, %v1956_v57  ;;  %v1959_v36 = vsel %vm998_vm8, %v1952_v11, %v1958_v54  ;;  %v2064_v11 = vmul.f32 %v4782_v0, %v4868_v46  ;;  %v2190_v57 = vpack.c.bf16 %v2181_v48, %v2181_v48 }
 0x3f2   : > { %v2357_v54 = vmul.f32 %v4822_v40, %v4469_v8 }
 0x3f3   : > { %v2073_v51 = vpack.c.bf16 %v2064_v11, %v2064_v11  ;;  %v2480_v11 = vld [vmem:[%s5779_s7 + $0x8] sm:$0xff] }
 0x3f4   : > { %2107 = vrot.lane.b32.xlu0 %v2090_v50, %s4142_s29  ;;  %v2186_v50 = vpack.c.bf16 %v2177_v35, %v2174_v49  ;;  %v2622_v49 = vld [vmem:[%s5773_s1] ss:$4 sm:$0x3] }
 0x3f5   : > { %2205 = vrot.lane.b32.xlu1 %v2185_v20, %s4144_s19  ;;  %v2095_v62 = vrot.slane %v2073_v51, 4  ;;  %v4066_v51 = vld [vmem:[%s5773_s1 + $0x2] ss:$4 sm:$0x3] }
 0x3f6   : > { %v2877_v58 = vrot.slane %v4066_v51, %v4234_v5 }
 0x3f7   : > { %v2096_v0 = vsel %vm998_vm8, %v2089_v47, %v2095_v62  ;;  %v2873_v62 = vrot.slane %v4066_v51, %v4232_v4 }
 0x3f8   : > { %1974 = vrot.lane.b32.xlu0 %v1957_v12, %s4145_s24 }
 0x3f9   : > { %2111 = vrot.lane.b32.xlu1 %v2094_v9, %s4142_s29  ;;  %v2354_v9 = vmul.f32 %v4713_v25, %v4822_v40 }
 0x3fb   : > { %v2369_v43 = vpack.c.bf16 %v2357_v54, %v2354_v9 }
 0x3fc   : > { %2203 = vrot.lane.b32.xlu0 %v2184_v2, %s4144_s19  ;;  %v2356_v2 = vmul.f32 0.0, %v4816_v26 }
 0x3fd   : > { %1976 = vrot.lane.b32.xlu1 %v1959_v36, %s4145_s24 }
 0x3fe   : > { %v2371_v23 = vpack.c.bf16 %v2356_v2, %v2356_v2 }
 0x400   : > { %2201 = vrot.lane.b32.xlu0 %v2183_v37, %s4144_s19 }
 0x401   : > { %2209 = vrot.lane.b32.xlu1 %v2187_v7, %s4144_s19  ;;  %v2366_v7 = vmul.f32 %v4822_v40, %v4850_v30 }
 0x403   : > { %v2375_v48 = vpack.c.bf16 %v2366_v7, %v2366_v7 }
 0x404   : > { %2211 = vrot.lane.b32.xlu0 %v2185_v20, %s4144_s19 }
 0x405   : > { %2207 = vrot.lane.b32.xlu1 %v2186_v50, %s4144_s19  ;;  %v2627_v50 = vrot.slane %v2622_v49, %v4232_v4 }
 0x408   : > { %2215 = vrot.lane.b32.xlu0 %v2190_v57, %s4144_s19  ;;  %v2631_v57 = vrot.slane %v2622_v49, %v4234_v5 }
 0x409   : > { %2217 = vrot.lane.b32.xlu1 %v2185_v20, %s4144_s19  ;;  %v2350_v20 = vsel %vm520_vm6, %v4822_v40, %v4816_v26  ;;  %v2363_v26 = vmul.f32 %v4822_v40, %v4844_v15 }
 0x40a   : > { %v2355_v47 = vmul.f32 %v4700_v10, %v2350_v20  ;;  %v2358_v1 = vmul.f32 %v2350_v20, %v4471_v13  ;;  %v2364_v33 = vmul.f32 %v2350_v20, %v4847_v28  ;;  %v2367_v36 = vmul.f32 %v2350_v20, %v4868_v46 }
 0x40c   : > { %2287 = vrot.lane.b32.xlu0 %v4516_v42, %s5792_s13  ;;  %v2370_v12 = vpack.c.bf16 %v2358_v1, %v2355_v47  ;;  %v2376_v37 = vpack.c.bf16 %v2367_v36, %v2367_v36 }
 0x40d   : > { %2289 = vrot.lane.b32.xlu1 %v4297_v29, %s5792_s13 }
 0x410   : > { %2213 = vrot.lane.b32.xlu0 %v2189_v55, %s4144_s19  ;;  %v3000_v55 = vld [vmem:[%s5773_s1] ss:$4 sm:$0x3] }
 0x411   : > { %2113 = vrot.lane.b32.xlu1 %v2096_v0, %s4142_s29  ;;  %v3009_v0 = vrot.slane %v3000_v55, %v4234_v5  ;;  %v3005_v16 = vrot.slane %v3000_v55, %v4232_v4 }
 0x414   : > { %2293 = vrot.lane.b32.xlu0 %v4905_v32, %s5792_s13 }
 0x415   : > { %2285 = vrot.lane.b32.xlu1 %v4489_v24, %s5792_s13 }
 0x418   : > { %2291 = vrot.lane.b32.xlu0 %v4894_v18, %s5792_s13 }
 0x419   : > { %2295 = vrot.lane.b32.xlu1 %v4297_v29, %s5792_s13 }
 0x41c   : > { %2301 = vrot.lane.b32.xlu0 %v4297_v29, %s5792_s13 }
 0x41d   : > { %2299 = vrot.lane.b32.xlu1 %v4951_v61, %s5792_s13  ;;  %v2361_v61 = vmul.f32 %v2350_v20, %v4496_v31 }
 0x41f   : > { %v2373_v38 = vpack.c.bf16 %v2364_v33, %v2361_v61 }
 0x420   : > { %2389 = vrot.lane.b32.xlu0 %v2370_v12, %s4143_s30 }
 0x421   : > { %2297 = vrot.lane.b32.xlu1 %v4932_v19, %s5792_s13  ;;  %v2360_v19 = vmul.f32 %v4822_v40, %v4486_v22  ;;  %v2479_v40 = vld [vmem:[%s5779_s7] sm:$0xff] }
 0x423   : > { %v2372_v35 = vpack.c.bf16 %v2363_v26, %v2360_v19 }
 0x424   : > { %2387 = vrot.lane.b32.xlu0 %v2369_v43, %s4143_s30 }
 0x425   : > { %2391 = vrot.lane.b32.xlu1 %v2371_v23, %s4143_s30 }
 0x428   : > { %2397 = vrot.lane.b32.xlu0 %v2371_v23, %s4143_s30 }
 0x429   : > { %2395 = vrot.lane.b32.xlu1 %v2373_v38, %s4143_s30 }
 0x42c   : > { %2401 = vrot.lane.b32.xlu0 %v2376_v37, %s4143_s30 }
 0x42d   : > { %2393 = vrot.lane.b32.xlu1 %v2372_v35, %s4143_s30 }
 0x430   : > { %2399 = vrot.lane.b32.xlu0 %v2375_v48, %s4143_s30 }
 0x431   : > { %2403 = vrot.lane.b32.xlu1 %v2371_v23, %s4143_s30 }
 0x434   : > { %2632 = vrot.lane.b32.xlu0 %v2627_v50, %s4143_s30 }
 0x435   : > { %2483 = vperm.xlu1 %4113, %v2479_v40  }
 0x438   : > { %2488 = vperm.xlu0 %4112, %v2480_v11  }
 0x439   : > { %2634 = vrot.lane.b32.xlu1 %v2631_v57, %s4143_s30 }
 0x43c   : > { %2880 = vrot.lane.b32.xlu0 %v2877_v58, %s4144_s19  ;;  %v1862_v58 = vsel %vm590_vm1, %v4826_v45, %v4820_v14 }
 0x43d   : > { %2878 = vrot.lane.b32.xlu1 %v2873_v62, %s4144_s19 }
 0x440   : > { %3012 = vrot.lane.b32.xlu0 %v3009_v0, %s4142_s29  ;;  %v1861_v0 = vsel %vm590_vm1, %v4828_v63, %v4826_v45 }
 0x441   : > { %3010 = vrot.lane.b32.xlu1 %v3005_v16, %s4142_s29 }
 0x442   : > { %v1666_v20 = vpop.permute.xlu0 %1665 }
 0x443   : > { %v1668_v47 = vpop.permute.xlu1 %1667  ;;  %v1677_v12 = vsel %vm520_vm6, %v4806_v17, %v1666_v20 }
 0x444   : > { %v1678_v1 = vsel %vm520_vm6, %v1666_v20, %v1668_v47 }
 0x445   : > { %2509 = vmatprep.subr.bf16.mxu0 %v1678_v1 }
 0x446   : > { %v1852_v9 = vpop.permute.xlu0 %1851  ;;  %2510 = vmatpush1.bf16.msra.mxu0 %v1677_v12 }
 0x447   : > { %v1750_v54 = vpop.permute.xlu1 %1749 }
 0x448   : > { %v1761_v2 = vsel %vm545_vm4, %v4818_v44, %v1750_v54 }
 0x449   : > { %1773 = vst [vmem:[#allocation3 + $0x30] sm:$0xff] %v1761_v2 }
 0x44a   : > { %v1752_v43 = vpop.permute.xlu0 %1751 }
 0x44b   : > { %v1762_v23 = vsel %vm545_vm4, %v1750_v54, %v1752_v43  ;;  %v1854_v33 = vpop.permute.xlu1 %1853 }
 0x44c   : > { %1774 = vst [vmem:[#allocation3 + $0x38] sm:$0xff] %v1762_v23  ;;  %v1864_v16 = vsel %vm590_vm1, %v1852_v9, %v1854_v33 }
 0x44e   : > { %v1674_v61 = vpop.permute.xlu0 %1673 }
 0x44f   : > { %v1672_v36 = vpop.permute.xlu1 %1671 }
 0x450   : > { %v1679_v38 = vsel %vm520_vm6, %v4814_v41, %v1672_v36  ;;  %v1680_v17 = vsel %vm520_vm6, %v1672_v36, %v1674_v61  ;;  %v5124_v36 = vld [vmem:[#allocation3 + $0xe8] sm:$0xff] }
 0x451   : > { %1691 = vst [vmem:[#allocation3 + $0x20] sm:$0xf] %v1679_v38  ;;  %1692 = vst [vmem:[#allocation3 + $0x28] sm:$0xf] %v1680_v17  ;;  %v5127_v17 = vld [vmem:[#allocation3 + $0xe0] sm:$0xff] }
 0x452   : > { %v1756_v26 = vpop.permute.xlu0 %1755 }
 0x453   : > { %v1858_v19 = vpop.permute.xlu1 %1857  ;;  %v1763_v51 = vsel %vm545_vm4, %v4812_v39, %v1756_v26  ;;  %v1863_v39 = vsel %vm590_vm1, %v4824_v27, %v1852_v9 }
 0x454   : > { %v1865_v44 = vsel %vm590_vm1, %v4832_v52, %v1858_v19 }
 0x455   : > { %1877 = vst [vmem:[#allocation3 + $0x70] sm:$0xf] %v1865_v44 }
 0x456   : > { %v1860_v37 = vpop.permute.xlu0 %1859 }
 0x457   : > { %v1866_v7 = vsel %vm590_vm1, %v1858_v19, %v1860_v37  ;;  %v1969_v35 = vpop.permute.xlu1 %1968 }
 0x458   : > { %1878 = vst [vmem:[#allocation3 + $0x78] sm:$0xf] %v1866_v7  ;;  %v2436_v49 = vld [vmem:[#allocation3 + $0x28] sm:$0xff]  ;;  %v2435_v48 = vld [vmem:[#allocation3 + $0x20] sm:$0xff]  ;;  %v1980_v63 = vsel %vm637_vm5, %v4836_v56, %v1969_v35 }
 0x459   : > { %2511 = vmatprep.subr.bf16.mxu0 %v2436_v49 }
 0x45a   : > { %2512 = vmatpush1.bf16.msra.mxu0 %v2435_v48  ;;  %v5100_v41 = vpop.permute.xlu0 %2105 }
 0x45b   : > { %v1758_v50 = vpop.permute.xlu1 %1757  ;;  %2513 = vmatprep.subr.bf16.mxu0 %v1762_v23 }
 0x45c   : > { %v1764_v40 = vsel %vm545_vm4, %v1756_v26, %v1758_v50  ;;  %v2445_v12 = vld [vmem:[#allocation3 + $0x70] sm:$0xff] }
 0x45e   : > { %2514 = vmatpush1.bf16.msra.mxu0 %v1761_v2  ;;  %v5103_v11 = vpop.permute.xlu0 %2115 }
 0x45f   : > { %v2100_v52 = vpop.permute.xlu1 %2099  ;;  %2515 = vmatprep.subr.bf16.mxu0 %v1764_v40  ;;  %v2446_v14 = vld [vmem:[#allocation3 + $0x78] sm:$0xff] }
 0x460   : > { %v2117_v57 = vsel %vm614_vm3, %v2100_v52, %v4838_v60 }
 0x461   : > { %2129 = vst [vmem:[#allocation3 + $0xc0] sm:$0xf0] %v2117_v57 }
 0x462   : > { %v1971_v62 = vpop.permute.xlu0 %1970  ;;  %2516 = vmatpush1.bf16.msra.mxu0 %v1763_v51 }
 0x463   : > { %v2110_v55 = vpop.permute.xlu1 %2109  ;;  %2517 = vmatprep.subr.bf16.mxu0 %v1862_v58  ;;  %v1981_v54 = vsel %vm637_vm5, %v1969_v35, %v1971_v62 }
 0x466   : > { %v2108_v20 = vpop.permute.xlu0 %2107  ;;  %2518 = vmatpush1.bf16.msra.mxu0 %v1861_v0 }
 0x467   : > { %v2206_v60 = vpop.permute.xlu1 %2205  ;;  %2519 = vmatprep.subr.bf16.mxu0 %v1864_v16  ;;  %v2120_v35 = vsel %vm614_vm3, %v2108_v20, %v2110_v55  ;;  %v2119_v40 = vsel %vm614_vm3, %v5100_v41, %v2108_v20 }
 0x468   : > { %v2455_v7 = vld [vmem:[#allocation3 + $0xc0] sm:$0xff] }
 0x46a   : > { %v1975_v47 = vpop.permute.xlu0 %1974  ;;  %2520 = vmatpush1.bf16.msra.mxu0 %v1863_v39 }
 0x46b   : > { %v2112_v1 = vpop.permute.xlu1 %2111  ;;  %2521 = vmatprep.subr.bf16.mxu0 %v2446_v14  ;;  %v1982_v9 = vsel %vm637_vm5, %v4834_v53, %v1975_v47  ;;  %v2456_v53 = vld [vmem:[#allocation3 + $0xc8] sm:$0xff] }
 0x46e   : > { %v2204_v2 = vpop.permute.xlu0 %2203  ;;  %2522 = vmatpush1.bf16.msra.mxu0 %v2445_v12 }
 0x46f   : > { %v1977_v45 = vpop.permute.xlu1 %1976  ;;  %2523 = vmatprep.subr.bf16.mxu0 %v1981_v54  ;;  %v2220_v55 = vsel %vm570_vm2, %v2204_v2, %v2206_v60 }
 0x470   : > { %v1983_v43 = vsel %vm637_vm5, %v1975_v47, %v1977_v45 }
 0x472   : > { %v2202_v23 = vpop.permute.xlu0 %2201  ;;  %2524 = vmatpush1.bf16.msra.mxu0 %v1980_v63 }
 0x473   : > { %v2210_v27 = vpop.permute.xlu1 %2209  ;;  %2525 = vmatprep.subr.bf16.mxu0 %v1983_v43  ;;  %v2219_v41 = vsel %vm570_vm2, %v2202_v23, %v2204_v2 }
 0x476   : > { %v2212_v33 = vpop.permute.xlu0 %2211  ;;  %2526 = vmatpush1.bf16.msra.mxu0 %v1982_v9 }
 0x477   : > { %v2208_v61 = vpop.permute.xlu1 %2207  ;;  %2527 = vmatprep.subr.bf16.mxu0 %v5124_v36  ;;  %v2222_v20 = vsel %vm570_vm2, %v2210_v27, %v2212_v33 }
 0x478   : > { %v2221_v14 = vsel %vm570_vm2, %v2208_v61, %v2210_v27 }
 0x47a   : > { %v2216_v38 = vpop.permute.xlu0 %2215  ;;  %2528 = vmatpush1.bf16.msra.mxu0 %v5127_v17 }
 0x47b   : > { %v2218_v56 = vpop.permute.xlu1 %2217  ;;  %2529 = vmatprep.subr.bf16.mxu0 %v4866_v3 }
 0x47c   : > { %v2224_v26 = vsel %vm570_vm2, %v2216_v38, %v2218_v56 }
 0x47d   : > { %2236 = vst [vmem:[#allocation3 + $0x118] sm:$0xf] %v2224_v26 }
 0x47e   : > { %v2288_v19 = vpop.permute.xlu0 %2287  ;;  %2530 = vmatpush1.bf16.msra.mxu0 %v4858_v6 }
 0x47f   : > { %v2290_v44 = vpop.permute.xlu1 %2289  ;;  %2531 = vmatprep.subr.bf16.mxu0 %v2456_v53 }
 0x480   : > { %v2304_v37 = vsel %vm759_vm7, %v2288_v19, %v2290_v44 }
 0x481   : > { %2316 = vst [vmem:[#allocation3 + $0x118] sm:$0xf0] %v2304_v37 }
 0x482   : > { %v2214_v49 = vpop.permute.xlu0 %2213  ;;  %2532 = vmatpush1.bf16.msra.mxu0 %v2455_v7 }
 0x483   : > { %v2223_v48 = vsel %vm570_vm2, %v2214_v49, %v2216_v38  ;;  %v2114_v50 = vpop.permute.xlu1 %2113  ;;  %2533 = vmatprep.subr.bf16.mxu0 %v2120_v35 }
 0x484   : > { %2235 = vst [vmem:[#allocation3 + $0x110] sm:$0xf] %v2223_v48  ;;  %v2122_v52 = vsel %vm614_vm3, %v2114_v50, %v5103_v11  ;;  %v2121_v62 = vsel %vm614_vm3, %v2112_v1, %v2114_v50  ;;  %v4118_v11 = vld [vmem:[%s5778_s6] ss:$12 sps:$4 sm:$0xff]   ;;  %v4121_v50 = vld [vmem:[%s5778_s6 + $0x8] ss:$12 sps:$4 sm:$0xff]  }
 0x486   : > { %v2294_v57 = vpop.permute.xlu0 %2293  ;;  %2534 = vmatpush1.bf16.msra.mxu0 %v2119_v40 }
 0x487   : > { %v2286_v51 = vpop.permute.xlu1 %2285  ;;  %2535 = vmatprep.subr.bf16.mxu0 %v2122_v52 }
 0x488   : > { %v2303_v58 = vsel %vm759_vm7, %v2286_v51, %v2288_v19  ;;  %v2466_v1 = vld [vmem:[#allocation3 + $0x118] sm:$0xff] }
 0x489   : > { %2315 = vst [vmem:[#allocation3 + $0x110] sm:$0xf0] %v2303_v58 }
 0x48a   : > { %v2292_v0 = vpop.permute.xlu0 %2291  ;;  %2536 = vmatpush1.bf16.msra.mxu0 %v2121_v62 }
 0x48b   : > { %v2296_v16 = vpop.permute.xlu1 %2295  ;;  %2537 = vmatprep.subr.bf16.mxu0 %v2220_v55  ;;  %v2305_v43 = vsel %vm759_vm7, %v2292_v0, %v2294_v57 }
 0x48c   : > { %v2306_v2 = vsel %vm759_vm7, %v2294_v57, %v2296_v16 }
 0x48e   : > { %v2302_v39 = vpop.permute.xlu0 %2301  ;;  %2538 = vmatpush1.bf16.msra.mxu0 %v2219_v41 }
 0x48f   : > { %v2300_v47 = vpop.permute.xlu1 %2299  ;;  %2550 = vmatprep.subr.bf16.mxu0 %v2222_v20 }
 0x490   : > { %v2465_v54 = vld [vmem:[#allocation3 + $0x110] sm:$0xff]  ;;  %v2308_v23 = vsel %vm759_vm7, %v2300_v47, %v2302_v39 }
 0x491   : > { %2540 = vmatmul.mubr.bf16.vlgmr.msra.gmra.mrb[4].mxu0 %v4118_v11 }
 0x492   : > { %v2390_v60 = vpop.permute.xlu0 %2389  ;;  %2551 = vmatpush1.bf16.msra.mxu0 %v2221_v14  ;;  %2582 = vmatprep.mubr.bf16.mxu0 %v4151_v34 }
 0x493   : > { %v2298_v12 = vpop.permute.xlu1 %2297  ;;  %2552 = vmatprep.subr.bf16.mxu0 %v2466_v1 }
 0x494   : > { %v2307_v33 = vsel %vm759_vm7, %v2298_v12, %v2300_v47 }
 0x496   : > { %v2388_v45 = vpop.permute.xlu0 %2387  ;;  %2553 = vmatpush1.bf16.msra.mxu0 %v2465_v54 }
 0x497   : > { %v2392_v63 = vpop.permute.xlu1 %2391  ;;  %2554 = vmatprep.subr.bf16.mxu0 %v2306_v2  ;;  %v2405_v26 = vsel %vm500_vm0, %v2388_v45, %v2390_v60 }
 0x498   : > { %v2406_v61 = vsel %vm500_vm0, %v2390_v60, %v2392_v63  ;;  %v3336_v60 = vld [vmem:[%s5773_s1] ss:$4 sm:$0x3]  ;;  %v5238_v63 = vld [vmem:[%s4253_s16 + $0x8] sm:$0xff] }
 0x499   : > { %v3341_v1 = vrot.slane %v3336_v60, %v4232_v4  ;;  %v3345_v45 = vrot.slane %v3336_v60, %v4234_v5 }
 0x49a   : > { %v2398_v27 = vpop.permute.xlu0 %2397  ;;  %2555 = vmatpush1.bf16.msra.mxu0 %v2305_v43 }
 0x49b   : > { %v2396_v9 = vpop.permute.xlu1 %2395  ;;  %2556 = vmatprep.subr.bf16.mxu0 %v2308_v23 }
 0x49c   : > { %v2408_v19 = vsel %vm500_vm0, %v2396_v9, %v2398_v27  ;;  %v5245_v27 = vld [vmem:[%s4253_s16] sm:$0xff] }
 0x49e   : > { %v2402_v38 = vpop.permute.xlu0 %2401  ;;  %2557 = vmatpush1.bf16.msra.mxu0 %v2307_v33 }
 0x49f   : > { %v2394_v56 = vpop.permute.xlu1 %2393  ;;  %2558 = vmatprep.subr.bf16.mxu0 %v2406_v61 }
 0x4a0   : > { %v2407_v35 = vsel %vm500_vm0, %v2394_v56, %v2396_v9 }
 0x4a2   : > { %v2400_v53 = vpop.permute.xlu0 %2399  ;;  %2559 = vmatpush1.bf16.msra.mxu0 %v2405_v26 }
 0x4a3   : > { %v2409_v44 = vsel %vm500_vm0, %v2400_v53, %v2402_v38  ;;  %v2404_v37 = vpop.permute.xlu1 %2403  ;;  %2560 = vmatprep.subr.bf16.mxu0 %v2408_v19 }
 0x4a4   : > { %2421 = vst [vmem:[#allocation3 + $0x160] sm:$0xf] %v2409_v44  ;;  %v2410_v7 = vsel %vm500_vm0, %v2402_v38, %v2404_v37 }
 0x4a5   : > { %2422 = vst [vmem:[#allocation3 + $0x168] sm:$0xf] %v2410_v7 }
 0x4a6   : > { %2561 = vmatpush1.bf16.msra.mxu0 %v2407_v35  ;;  %v2633_v52 = vpop.permute.xlu0 %2632 }
 0x4a7   : > { %v2640_v62 = vmul.f32 0.0, %v2633_v52 }
 0x4a9   : > { %v2661_v16 = vpack.c.bf16 %v2640_v62, %v2640_v62 }
 0x4ab   : > { %v2475_v48 = vld [vmem:[#allocation3 + $0x160] sm:$0xff] }
 0x4ac   : > { %v2476_v49 = vld [vmem:[#allocation3 + $0x168] sm:$0xff] }
 0x4ad   : > { %2562 = vmatprep.subr.bf16.mxu0 %v2476_v49 }
 0x4ae   : > { %2563 = vmatpush1.bf16.msra.mxu0 %v2475_v48 }
 0x4af   : > { %2564 = vmatprep.subr.bf16.mxu0 %v4151_v34 }
 0x4b2   : > { %2565 = vmatpush1.bf16.msra.mxu0 %v4151_v34 }
 0x4b3   : > { %3944 = vmatprep.subr.bf16.mxu0 %v5124_v36 }
 0x4b4   : > { %v5166_v40 = vpop.permute.xlu1 %2483 }
 0x4b5   : > { %2583 = vmatmul.mubr.bf16.vlgmr.msra.gmra.mrb[4].mxu0 %v4121_v50 }
 0x4b6   : > { %3945 = vmatpush1.bf16.msra.mxu0 %v5127_v17  ;;  %3976 = vmatprep.mubr.bf16.mxu0 %v4151_v34 }
 0x4b7   : > { %3946 = vmatprep.subr.bf16.mxu0 %v4866_v3  ;;  %v5213_v14 = vpop.permute.xlu0 %2488 }
 0x4b8   : > { %v5171_v57 = vpop.permute.xlu1 %2634 }
 0x4b9   : > { %v2642_v51 = vmul.f32 %v4700_v10, %v5171_v57  ;;  %v2645_v58 = vmul.f32 %v5171_v57, %v4471_v13  ;;  %v5179_v36 = vsel %vm500_vm0, %v2633_v52, %v5171_v57  ;;  %v4067_v10 = vld [vmem:[%s5773_s1 + $0x2] ss:$4 sm:$0x3]  ;;  %v2648_v20 = vmul.f32 %v5171_v57, %v4496_v31 }
 0x4ba   : > { %3947 = vmatpush1.bf16.msra.mxu0 %v4858_v6  ;;  %v2641_v34 = vmul.f32 %v4713_v25, %v5179_v36  ;;  %v2644_v3 = vmul.f32 %v5179_v36, %v4469_v8  ;;  %v3188_v0 = vrot.slane %v4067_v10, %v4232_v4  ;;  %v2647_v6 = vmul.f32 %v5179_v36, %v4486_v22 }
 0x4bb   : > { %v2663_v17 = vpack.c.bf16 %v2645_v58, %v2642_v51  ;;  %v2650_v25 = vmul.f32 %v5179_v36, %v4844_v15  ;;  %v3192_v41 = vrot.slane %v4067_v10, %v4234_v5  ;;  %v2651_v39 = vmul.f32 %v5171_v57, %v4847_v28  ;;  %v5225_v12 = vpop.permute.xlu0 %2880 }
 0x4bc   : > { %v2662_v55 = vpack.c.bf16 %v2644_v3, %v2641_v34  ;;  %v2879_v54 = vpop.permute.xlu1 %2878  ;;  %v2888_v43 = vmul.f32 %v5238_v63, %v5225_v12  ;;  %v2891_v23 = vmul.f32 %v5225_v12, %v4471_v13  ;;  %v2894_v50 = vmul.f32 %v5225_v12, %v4496_v31 }
 0x4bd   : > { %2689 = vrot.lane.b32.xlu0 %v2663_v17, %s4147_s28  ;;  %v2665_v11 = vpack.c.bf16 %v2650_v25, %v2647_v6  ;;  %v2666_v47 = vpack.c.bf16 %v2651_v39, %v2648_v20  ;;  %v5231_v2 = vsel %vm570_vm2, %v2879_v54, %v5225_v12  ;;  %v2886_v56 = vmul.f32 0.0, %v2879_v54  ;;  %v4068_v54 = vld [vmem:[%s5773_s1 + $0x2] ss:$4 sm:$0x3] }
 0x4be   : > { %2687 = vrot.lane.b32.xlu1 %v2662_v55, %s4147_s28  ;;  %v2887_v9 = vmul.f32 %v5245_v27, %v5231_v2  ;;  %v2890_v33 = vmul.f32 %v5231_v2, %v4469_v8  ;;  %v2909_v26 = vpack.c.bf16 %v2891_v23, %v2888_v43  ;;  %v2893_v19 = vmul.f32 %v5231_v2, %v4486_v22 }
 0x4bf   : > { %v5251_v61 = vpop.permute.xlu0 %3012  ;;  %v2896_v53 = vmul.f32 %v5231_v2, %v4844_v15  ;;  %v2907_v7 = vpack.c.bf16 %v2886_v56, %v2886_v56  ;;  %v2897_v52 = vmul.f32 %v5225_v12, %v4847_v28  ;;  %v3587_v43 = vrot.slane %v4068_v54, %v4232_v4 }
 0x4c0   : > { %v3011_v38 = vpop.permute.xlu1 %3010  ;;  %v2908_v37 = vpack.c.bf16 %v2890_v33, %v2887_v9  ;;  %v3020_v58 = vmul.f32 %v5238_v63, %v5251_v61  ;;  %v3023_v34 = vmul.f32 %v5251_v61, %v4471_v13  ;;  %v3026_v6 = vmul.f32 %v5251_v61, %v4496_v31 }
 0x4c1   : > { %3193 = vrot.lane.b32.xlu0 %v3188_v0, %s4145_s24  ;;  %v5262_v44 = vsel %vm614_vm3, %v3011_v38, %v5251_v61  ;;  %v2911_v35 = vpack.c.bf16 %v2896_v53, %v2893_v19  ;;  %v2912_v62 = vpack.c.bf16 %v2897_v52, %v2894_v50  ;;  %v3018_v17 = vmul.f32 0.0, %v3011_v38 }
 0x4c2   : > { %2685 = vrot.lane.b32.xlu1 %v2661_v16, %s4147_s28  ;;  %v3019_v49 = vmul.f32 %v5245_v27, %v5262_v44  ;;  %v3022_v48 = vmul.f32 %v5262_v44, %v4469_v8  ;;  %v3025_v3 = vmul.f32 %v5262_v44, %v4486_v22  ;;  %v3028_v10 = vmul.f32 %v5262_v44, %v4844_v15 }
 0x4c3   : > { %v3041_v0 = vpack.c.bf16 %v3023_v34, %v3020_v58  ;;  %v3029_v25 = vmul.f32 %v5251_v61, %v4847_v28  ;;  %v3591_v23 = vrot.slane %v4068_v54, %v4234_v5 }
 0x4c4   : > { %v3040_v51 = vpack.c.bf16 %v3022_v48, %v3019_v49 }
 0x4c5   : > { %2693 = vrot.lane.b32.xlu0 %v2665_v11, %s4147_s28  ;;  %v3065_v11 = vrot.slane %v3041_v0, 4  ;;  %v3044_v39 = vpack.c.bf16 %v3029_v25, %v3026_v6 }
 0x4c6   : > { %3195 = vrot.lane.b32.xlu1 %v3192_v41, %s4145_s24  ;;  %v3064_v55 = vrot.slane %v3040_v51, 4  ;;  %v3039_v41 = vpack.c.bf16 %v3018_v17, %v3018_v17 }
 0x4c9   : > { %2691 = vrot.lane.b32.xlu0 %v2661_v16, %s4147_s28 }
 0x4ca   : > { %2695 = vrot.lane.b32.xlu1 %v2666_v47, %s4147_s28  ;;  %v3063_v47 = vrot.slane %v3039_v41, 4 }
 0x4cd   : > { %2801 = vrot.lane.b32.xlu0 %v4489_v24, %s5793_s23 }
 0x4ce   : > { %2697 = vrot.lane.b32.xlu1 %v2661_v16, %s4147_s28 }
 0x4d1   : > { %2703 = vrot.lane.b32.xlu0 %v2661_v16, %s4147_s28  ;;  %v3043_v16 = vpack.c.bf16 %v3028_v10, %v3025_v3 }
 0x4d2   : > { %2803 = vrot.lane.b32.xlu1 %v4516_v42, %s5793_s23 }
 0x4d3   : > { %v5292_v20 = vrot.slane %v3043_v16, 4 }
 0x4d5   : > { %2807 = vrot.lane.b32.xlu0 %v4894_v18, %s5793_s23  ;;  %v3069_v60 = vsel %vm998_vm8, %v3064_v55, %v5292_v20 }
 0x4d6   : > { %2799 = vrot.lane.b32.xlu1 %v4297_v29, %s5793_s23 }
 0x4d9   : > { %2805 = vrot.lane.b32.xlu0 %v4297_v29, %s5793_s23 }
 0x4da   : > { %2809 = vrot.lane.b32.xlu1 %v4905_v32, %s5793_s23 }
 0x4dd   : > { %3346 = vrot.lane.b32.xlu0 %v3341_v1, %s4146_s27  ;;  %v5299_v1 = vrot.slane %v3044_v39, 4 }
 0x4de   : > { %2811 = vrot.lane.b32.xlu1 %v4297_v29, %s5793_s23 }
 0x4e1   : > { %2817 = vrot.lane.b32.xlu0 %v4297_v29, %s5793_s23 }
 0x4e2   : > { %3348 = vrot.lane.b32.xlu1 %v3345_v45, %s4146_s27  ;;  %v3071_v45 = vsel %vm998_vm8, %v3065_v11, %v5299_v1 }
 0x4e5   : > { %2935 = vrot.lane.b32.xlu0 %v2909_v26, %s4146_s27 }
 0x4e6   : > { %2933 = vrot.lane.b32.xlu1 %v2908_v37, %s4146_s27 }
 0x4e9   : > { %2939 = vrot.lane.b32.xlu0 %v2911_v35, %s4146_s27 }
 0x4ea   : > { %2931 = vrot.lane.b32.xlu1 %v2907_v7, %s4146_s27 }
 0x4ed   : > { %2937 = vrot.lane.b32.xlu0 %v2907_v7, %s4146_s27 }
 0x4ee   : > { %2941 = vrot.lane.b32.xlu1 %v2912_v62, %s4146_s27 }
 0x4f1   : > { %3086 = vrot.lane.b32.xlu0 %v3064_v55, %s4145_s24 }
 0x4f2   : > { %2943 = vrot.lane.b32.xlu1 %v2907_v7, %s4146_s27 }
 0x4f5   : > { %2949 = vrot.lane.b32.xlu0 %v2907_v7, %s4146_s27 }
 0x4f6   : > { %3088 = vrot.lane.b32.xlu1 %v3065_v11, %s4145_s24 }
 0x4f9   : > { %3092 = vrot.lane.b32.xlu0 %v3069_v60, %s4145_s24 }
 0x4fa   : > { %3084 = vrot.lane.b32.xlu1 %v3063_v47, %s4145_s24 }
 0x4fd   : > { %3090 = vrot.lane.b32.xlu0 %v3063_v47, %s4145_s24 }
 0x4fe   : > { %3094 = vrot.lane.b32.xlu1 %v3071_v45, %s4145_s24 }
 0x501   : > { %3592 = vrot.lane.b32.xlu0 %v3587_v43, %s4147_s28 }
 0x502   : > { %3096 = vrot.lane.b32.xlu1 %v3063_v47, %s4145_s24 }
 0x505   : > { %3102 = vrot.lane.b32.xlu0 %v3063_v47, %s4145_s24 }
 0x506   : > { %3594 = vrot.lane.b32.xlu1 %v3591_v23, %s4147_s28 }
 0x52f   : > { %v2690_v9 = vpop.permute.xlu0 %2689 }
 0x530   : > { %v2688_v33 = vpop.permute.xlu1 %2687 }
 0x531   : > { %v2710_v38 = vsel %vm520_vm6, %v2688_v33, %v2690_v9 }
 0x532   : > { %2726 = vst [vmem:[#allocation3 + $0x8] sm:$0xff] %v2710_v38  ;;  %3795 = vmatprep.subr.bf16.mxu1 %v2710_v38 }
 0x533   : > { %v5316_v56 = vpop.permute.xlu0 %3193 }
 0x534   : > { %v2686_v4 = vpop.permute.xlu1 %2685 }
 0x535   : > { %v2709_v26 = vsel %vm520_vm6, %v2686_v4, %v2688_v33 }
 0x536   : > { %2725 = vst [vmem:[#allocation3] sm:$0xff] %v2709_v26  ;;  %3796 = vmatpush1.bf16.msra.mxu1 %v2709_v26 }
 0x537   : > { %v2694_v19 = vpop.permute.xlu0 %2693 }
 0x538   : > { %v5319_v53 = vpop.permute.xlu1 %3195 }
 0x53b   : > { %v2692_v5 = vpop.permute.xlu0 %2691 }
 0x53c   : > { %v2711_v37 = vsel %vm520_vm6, %v2692_v5, %v2694_v19  ;;  %v2696_v7 = vpop.permute.xlu1 %2695 }
 0x53d   : > { %2727 = vst [vmem:[#allocation3 + $0x10] sm:$0xff] %v2711_v37  ;;  %v2712_v35 = vsel %vm520_vm6, %v2694_v19, %v2696_v7 }
 0x53e   : > { %2728 = vst [vmem:[#allocation3 + $0x18] sm:$0xff] %v2712_v35  ;;  %3797 = vmatprep.subr.bf16.mxu1 %v2712_v35 }
 0x53f   : > { %v2802_v49 = vpop.permute.xlu0 %2801  ;;  %3798 = vmatpush1.bf16.msra.mxu1 %v2711_v37 }
 0x540   : > { %v5323_v48 = vpop.permute.xlu1 %2697 }
 0x543   : > { %v5325_v50 = vpop.permute.xlu0 %2703 }
 0x544   : > { %v2804_v52 = vpop.permute.xlu1 %2803 }
 0x545   : > { %v2824_v51 = vsel %vm545_vm4, %v2802_v49, %v2804_v52 }
 0x546   : > { %2840 = vst [vmem:[#allocation3 + $0x38] sm:$0xf0] %v2824_v51 }
 0x547   : > { %v2808_v58 = vpop.permute.xlu0 %2807 }
 0x548   : > { %v2800_v62 = vpop.permute.xlu1 %2799 }
 0x549   : > { %v2823_v34 = vsel %vm545_vm4, %v2800_v62, %v2802_v49 }
 0x54a   : > { %2839 = vst [vmem:[#allocation3 + $0x30] sm:$0xf0] %v2823_v34 }
 0x54b   : > { %v2806_v3 = vpop.permute.xlu0 %2805 }
 0x54c   : > { %v5330_v10 = vsel %vm545_vm4, %v2806_v3, %v2808_v58  ;;  %v2810_v17 = vpop.permute.xlu1 %2809 }
 0x54d   : > { %2841 = vst [vmem:[#allocation3 + $0x40] sm:$0xff] %v5330_v10  ;;  %v5334_v55 = vsel %vm545_vm4, %v2808_v58, %v2810_v17 }
 0x54e   : > { %2842 = vst [vmem:[#allocation3 + $0x48] sm:$0xff] %v5334_v55 }
 0x54f   : > { %v5337_v0 = vpop.permute.xlu0 %3346 }
 0x550   : > { %v5339_v16 = vpop.permute.xlu1 %2811 }
 0x553   : > { %v5341_v6 = vpop.permute.xlu0 %2817 }
 0x554   : > { %v5343_v25 = vpop.permute.xlu1 %3348 }
 0x557   : > { %v2936_v41 = vpop.permute.xlu0 %2935 }
 0x558   : > { %v2934_v11 = vpop.permute.xlu1 %2933 }
 0x559   : > { %v5346_v39 = vsel %vm590_vm1, %v2934_v11, %v2936_v41 }
 0x55a   : > { %2972 = vst [vmem:[#allocation3 + $0x78] sm:$0xff] %v5346_v39 }
 0x55b   : > { %v2940_v47 = vpop.permute.xlu0 %2939 }
 0x55c   : > { %v2932_v60 = vpop.permute.xlu1 %2931 }
 0x55d   : > { %v5350_v54 = vsel %vm590_vm1, %v2932_v60, %v2934_v11 }
 0x55e   : > { %2971 = vst [vmem:[#allocation3 + $0x70] sm:$0xff] %v5350_v54 }
 0x55f   : > { %v2938_v45 = vpop.permute.xlu0 %2937 }
 0x560   : > { %v5354_v43 = vsel %vm590_vm1, %v2938_v45, %v2940_v47  ;;  %v2942_v23 = vpop.permute.xlu1 %2941 }
 0x561   : > { %5794 = vst [vmem:[#allocation4_spill] sm:$0xff] %v5354_v43  ;;  %v5357_v9 = vsel %vm590_vm1, %v2940_v47, %v2942_v23 }
 0x563   : > { %v3087_v33 = vpop.permute.xlu0 %3086 }
 0x564   : > { %v5359_v38 = vpop.permute.xlu1 %2943 }
 0x567   : > { %v5361_v4 = vpop.permute.xlu0 %2949 }
 0x568   : > { %v3089_v26 = vpop.permute.xlu1 %3088 }
 0x569   : > { %v3109_v19 = vsel %vm637_vm5, %v3087_v33, %v3089_v26 }
 0x56a   : > { %3125 = vst [vmem:[#allocation3 + $0xa8] sm:$0xf0] %v3109_v19  ;;  %v2654_v19 = vmul.f32 %v5171_v57, %v4868_v46 }
 0x56b   : > { %v3093_v5 = vpop.permute.xlu0 %3092 }
 0x56c   : > { %v3085_v37 = vpop.permute.xlu1 %3084 }
 0x56d   : > { %v3108_v7 = vsel %vm637_vm5, %v3085_v37, %v3087_v33  ;;  %v2653_v33 = vmul.f32 %v5179_v36, %v4850_v30 }
 0x56e   : > { %3124 = vst [vmem:[#allocation3 + $0xa0] sm:$0xf0] %v3108_v7 }
 0x56f   : > { %v3091_v35 = vpop.permute.xlu0 %3090 }
 0x570   : > { %v5366_v49 = vsel %vm637_vm5, %v3091_v35, %v3093_v5  ;;  %v3095_v52 = vpop.permute.xlu1 %3094 }
 0x571   : > { %5795 = vst [vmem:[#allocation5_spill] sm:$0xff] %v5366_v49  ;;  %v5369_v51 = vsel %vm637_vm5, %v3093_v5, %v3095_v52  ;;  %v3210_v49 = vmul.f32 %v5316_v56, %v4844_v15 }
 0x572   : > { %5796 = vst [vmem:[#allocation6_spill] sm:$0xff] %v5369_v51 }
 0x588   : > { %v2584_v58 = vpop.f32.mrb[4].mxu0 }
 0x589   : > { %v4077_v62 = vadd.f32 %v2584_v58, %v5166_v40  ;;  %v2586_v34 = vpop.f32.mrb[5].mxu0 }
 0x58a   : > { %v4078_v3 = vadd.f32 %v2586_v34, %v5166_v40  ;;  %v2588_v17 = vpop.f32.mrb[6].mxu0  ;;  %v2900_v34 = vmul.f32 %v5225_v12, %v4868_v46 }
 0x58b   : > { %v5373_v41 = vmax.f32 %v4077_v62, 0.0  ;;  %v4079_v11 = vadd.f32 %v2588_v17, %v5213_v14  ;;  %v2590_v47 = vpop.f32.mrb[7].mxu0  ;;  %v2899_v62 = vmul.f32 %v5231_v2, %v4850_v30 }
 0x58c   : > { %v5376_v60 = vmax.f32 %v4078_v3, 0.0  ;;  %v4080_v45 = vadd.f32 %v2590_v47, %v5213_v14 }
 0x58d   : > { %v5381_v23 = vpack.c.bf16 %v5373_v41, %v4850_v30  ;;  %v2656_v40 = vmul.f32 %v5179_v36, %v5373_v41  ;;  %v5395_v5 = vmax.f32 %v4079_v11, 0.0  ;;  %v2902_v35 = vmul.f32 %v5231_v2, %v5373_v41 }
 0x58e   : > { %v5389_v26 = vpack.c.bf16 %v5376_v60, %v4868_v46  ;;  %v2657_v14 = vmul.f32 %v5171_v57, %v5376_v60  ;;  %v5397_v37 = vmax.f32 %v4080_v45, 0.0  ;;  %v2903_v58 = vmul.f32 %v5225_v12, %v5376_v60 }
 0x58f   : > { %5797 = vst [vmem:[#allocation7_spill] sm:$0xff] %v5381_v23  ;;  %v2668_v7 = vpack.c.bf16 %v2656_v40, %v2653_v33  ;;  %v2914_v3 = vpack.c.bf16 %v2902_v35, %v2899_v62  ;;  %v2764_v17 = vpack.c.bf16 %v5395_v5, %v5395_v5  ;;  %v2789_v45 = vrot.slane %v5381_v23, 4 }
 0x590   : > { %5798 = vst [vmem:[#allocation8_spill] sm:$0xff] %v5389_v26  ;;  %3948 = vmatprep.subr.bf16.mxu0 %v5389_v26  ;;  %v2669_v52 = vpack.c.bf16 %v2657_v14, %v2654_v19  ;;  %v2765_v11 = vpack.c.bf16 %v5397_v37, %v5397_v37  ;;  %v2915_v47 = vpack.c.bf16 %v2903_v58, %v2900_v34  ;;  %v2791_v35 = vrot.slane %v5389_v26, 4 }
 0x591   : > { %3949 = vmatpush1.bf16.msra.mxu0 %v5381_v23  ;;  %2699 = vrot.lane.b32.xlu1 %v2668_v7, %s4147_s28  ;;  %v2659_v33 = vmul.f32 %v5179_v36, %v5395_v5  ;;  %3160 = vst [vmem:[#allocation3 + $0x110] sm:$0xf] %v2764_v17  ;;  %v5422_v40 = vsel %vm590_vm1, %v5337_v0, %v5343_v25 }
 0x592   : > { %2701 = vrot.lane.b32.xlu0 %v2669_v52, %s4147_s28  ;;  %3161 = vst [vmem:[#allocation3 + $0x118] sm:$0xf] %v2765_v11  ;;  %v2660_v19 = vmul.f32 %v5171_v57, %v5397_v37  ;;  %v5429_v14 = vsel %vm998_vm8, %v4878_v59, %v2789_v45  ;;  %v3034_v36 = vmul.f32 %v5262_v44, %v5373_v41 }
 0x593   : > { %v2671_v7 = vpack.c.bf16 %v2659_v33, %v2659_v33  ;;  %v5438_v52 = vmul.f32 %v5422_v40, %v4868_v46  ;;  %v5442_v57 = vmul.f32 %v5422_v40, %v5376_v60  ;;  %v3031_v59 = vmul.f32 %v5262_v44, %v4850_v30 }
 0x594   : > { %v2672_v58 = vpack.c.bf16 %v2660_v19, %v2660_v19  ;;  %v2906_v62 = vmul.f32 %v5225_v12, %v5397_v37  ;;  %v5456_v33 = vsel %vm637_vm5, %v5316_v56, %v5319_v53  ;;  %v5461_v19 = vsel %vm998_vm8, %v4886_v21, %v2791_v35 }
 0x595   : > { %2945 = vrot.lane.b32.xlu1 %v2914_v3, %s4146_s27  ;;  %v2905_v3 = vmul.f32 %v5231_v2, %v5395_v5  ;;  %v3203_v12 = vmul.f32 0.0, %v5319_v53  ;;  %v3208_v21 = vmul.f32 %v5456_v33, %v4496_v31  ;;  %v3211_v53 = vmul.f32 %v5456_v33, %v4847_v28 }
 0x596   : > { %2947 = vrot.lane.b32.xlu0 %v2915_v47, %s4146_s27  ;;  %v3046_v47 = vpack.c.bf16 %v3034_v36, %v3031_v59  ;;  %v3202_v36 = vmul.f32 %v5238_v63, %v5456_v33  ;;  %v2795_v59 = vrot.slane %v2764_v17, 4  ;;  %v2797_v17 = vrot.slane %v2765_v11, 4 }
 0x597   : > { %v2917_v34 = vpack.c.bf16 %v2905_v3, %v2905_v3  ;;  %v3224_v23 = vpack.c.bf16 %v3203_v12, %v3203_v12  ;;  %v3226_v26 = vpack.c.bf16 %v3211_v53, %v3208_v21 }
 0x598   : > { %v5466_v2 = vrot.slane %v3046_v47, 4  ;;  %v3204_v47 = vmul.f32 %v5316_v56, %v4469_v8  ;;  %v5489_v12 = vsel %vm998_vm8, %v2789_v45, %v2795_v59 }
 0x599   : > { %2813 = vrot.lane.b32.xlu1 %v5429_v14, %s5793_s23  ;;  %v3248_v51 = vrot.slane %v3224_v23, 4 }
 0x59a   : > { %2705 = vrot.lane.b32.xlu0 %v2671_v7, %s4147_s28  ;;  %v2918_v7 = vpack.c.bf16 %v2906_v62, %v2906_v62  ;;  %v3201_v62 = vmul.f32 %v5245_v27, %v5316_v56  ;;  %v3075_v3 = vsel %vm998_vm8, %v5292_v20, %v5466_v2  ;;  %v5496_v20 = vsel %vm998_vm8, %v2791_v35, %v2797_v17 }
 0x59b   : > { %v3035_v35 = vmul.f32 %v5251_v61, %v5376_v60 }
 0x59c   : > { %v3222_v43 = vpack.c.bf16 %v3204_v47, %v3201_v62  ;;  %v3217_v47 = vmul.f32 %v5456_v33, %v5376_v60 }
 0x59d   : > { %2707 = vrot.lane.b32.xlu1 %v2672_v58, %s4147_s28  ;;  %v3205_v58 = vmul.f32 %v5456_v33, %v4471_v13 }
 0x59e   : > { %2815 = vrot.lane.b32.xlu0 %v5461_v19, %s5793_s23  ;;  %v3246_v59 = vrot.slane %v3222_v43, 4  ;;  %v3037_v43 = vmul.f32 %v5262_v44, %v5395_v5 }
 0x5a1   : > { %2953 = vrot.lane.b32.xlu1 %v2918_v7, %s4146_s27  ;;  %v3207_v7 = vmul.f32 %v5316_v56, %v4486_v22 }
 0x5a2   : > { %2951 = vrot.lane.b32.xlu0 %v2917_v34, %s4146_s27  ;;  %v3223_v34 = vpack.c.bf16 %v3205_v58, %v3202_v36  ;;  %v3216_v36 = vmul.f32 %v5316_v56, %v5373_v41 }
 0x5a3   : > { %v3225_v45 = vpack.c.bf16 %v3210_v49, %v3207_v7  ;;  %v3032_v49 = vmul.f32 %v5251_v61, %v4868_v46 }
 0x5a4   : > { %v3247_v11 = vrot.slane %v3223_v34, 4  ;;  %v3049_v34 = vpack.c.bf16 %v3037_v43, %v3037_v43 }
 0x5a5   : > { %3098 = vrot.lane.b32.xlu1 %v3075_v3, %s4145_s24  ;;  %v3251_v3 = vrot.slane %v3226_v26, 4  ;;  %v3249_v58 = vrot.slane %v3225_v45, 4  ;;  %v3213_v26 = vmul.f32 %v5316_v56, %v4850_v30  ;;  %v3047_v62 = vpack.c.bf16 %v3035_v35, %v3032_v49 }
 0x5a6   : > { %2819 = vrot.lane.b32.xlu0 %v5489_v12, %s5793_s23  ;;  %v3214_v45 = vmul.f32 %v5456_v33, %v4868_v46  ;;  %v3080_v35 = vrot.slane %v3049_v34, 4  ;;  %v3354_v34 = vmul.f32 %v5245_v27, %v5337_v0 }
 0x5a7   : > { %v3252_v23 = vsel %vm998_vm8, %v3247_v11, %v3251_v3  ;;  %v3228_v21 = vpack.c.bf16 %v3216_v36, %v3213_v26  ;;  %v3250_v53 = vsel %vm998_vm8, %v3246_v59, %v3249_v58  ;;  %v3076_v7 = vrot.slane %v3047_v62, 4 }
 0x5a8   : > { %v3229_v36 = vpack.c.bf16 %v3217_v47, %v3214_v45  ;;  %v3361_v47 = vmul.f32 %v5422_v40, %v4496_v31 }
 0x5a9   : > { %2821 = vrot.lane.b32.xlu1 %v5496_v20, %s5793_s23  ;;  %v3255_v17 = vrot.slane %v3228_v21, 4 }
 0x5aa   : > { %3271 = vrot.lane.b32.xlu0 %v3248_v51, %s4142_s29 }
 0x5ab   : > { %v3256_v44 = vsel %vm998_vm8, %v3249_v58, %v3255_v17  ;;  %v3081_v58 = vsel %vm998_vm8, %v5466_v2, %v3080_v35  ;;  %v3358_v2 = vmul.f32 %v5422_v40, %v4471_v13  ;;  %v3373_v35 = vmul.f32 %v5422_v40, %v5397_v37 }
 0x5ad   : > { %3269 = vrot.lane.b32.xlu1 %v3247_v11, %s4142_s29  ;;  %v3219_v11 = vmul.f32 %v5316_v56, %v5395_v5  ;;  %v3257_v56 = vrot.slane %v3229_v36, 4 }
 0x5ae   : > { %3275 = vrot.lane.b32.xlu0 %v3252_v23, %s4142_s29  ;;  %v3038_v23 = vmul.f32 %v5251_v61, %v5397_v37 }
 0x5af   : > { %v3231_v26 = vpack.c.bf16 %v3219_v11, %v3219_v11  ;;  %v3258_v61 = vsel %vm998_vm8, %v3251_v3, %v3257_v56  ;;  %v3364_v3 = vmul.f32 %v5422_v40, %v4847_v28  ;;  %v3357_v11 = vmul.f32 %v5337_v0, %v4469_v8 }
 0x5b0   : > { %v3050_v49 = vpack.c.bf16 %v3038_v23, %v3038_v23 }
 0x5b1   : > { %3267 = vrot.lane.b32.xlu1 %v3246_v59, %s4142_s29  ;;  %v3077_v59 = vsel %vm998_vm8, %v5299_v1, %v3076_v7  ;;  %v3261_v21 = vrot.slane %v3231_v26, 4  ;;  %v3379_v45 = vpack.c.bf16 %v3364_v3, %v3361_v47  ;;  %v3375_v36 = vpack.c.bf16 %v3357_v11, %v3354_v34 }
 0x5b2   : > { %3273 = vrot.lane.b32.xlu0 %v3250_v53, %s4142_s29  ;;  %v3356_v53 = vmul.f32 0.0, %v5343_v25  ;;  %v3082_v62 = vrot.slane %v3050_v49, 4  ;;  %v3220_v26 = vmul.f32 %v5456_v33, %v5397_v37  ;;  %v3369_v49 = vmul.f32 %v5337_v0, %v5373_v41 }
 0x5b3   : > { %v3262_v1 = vsel %vm998_vm8, %v3255_v17, %v3261_v21  ;;  %v5799_v21 = vpack.c.bf16 %v5442_v57, %v5438_v52 }
 0x5b4   : > { %v3377_v43 = vpack.c.bf16 %v3356_v53, %v3356_v53  ;;  %v3083_v25 = vsel %vm998_vm8, %v3076_v7, %v3082_v62  ;;  %v3360_v7 = vmul.f32 %v5337_v0, %v4486_v22  ;;  %v3366_v53 = vmul.f32 %v5337_v0, %v4850_v30 }
 0x5b5   : > { %3277 = vrot.lane.b32.xlu1 %v3248_v51, %s4142_s29  ;;  %v3372_v62 = vmul.f32 %v5337_v0, %v5395_v5 }
 0x5b6   : > { %3283 = vrot.lane.b32.xlu0 %v3248_v51, %s4142_s29 }
 0x5b7   : > { %v3384_v57 = vpack.c.bf16 %v3372_v62, %v3372_v62 }
 0x5b9   : > { %3279 = vrot.lane.b32.xlu1 %v3256_v44, %s4142_s29  ;;  %v3363_v44 = vmul.f32 %v5337_v0, %v4844_v15 }
 0x5ba   : > { %3100 = vrot.lane.b32.xlu0 %v3077_v59, %s4145_s24  ;;  %v4124_v59 = vld [vmem:[%s5780_s8 + $0x4] ss:$16 sps:$4 sm:$0xff]  }
 0x5bb   : > { %v3378_v23 = vpack.c.bf16 %v3363_v44, %v3360_v7  ;;  %3827 = vmatprep.mubr.bf16.mxu1 %v4124_v59 }
 0x5bd   : > { %3289 = vrot.lane.b32.xlu1 %v3248_v51, %s4142_s29  ;;  %v3355_v51 = vmul.f32 %v5238_v63, %v5422_v40  ;;  %v3232_v40 = vpack.c.bf16 %v3220_v26, %v3220_v26 }
 0x5be   : > { %3104 = vrot.lane.b32.xlu0 %v3081_v58, %s4145_s24  ;;  %v3385_v58 = vpack.c.bf16 %v3373_v35, %v3373_v35  ;;  %v3763_v35 = vld [vmem:[%s5781_s9] sm:$0xff] }
 0x5bf   : > { %v3376_v17 = vpack.c.bf16 %v3358_v2, %v3355_v51  ;;  %v3263_v33 = vrot.slane %v3232_v40, 4 }
 0x5c1   : > { %3281 = vrot.lane.b32.xlu1 %v3258_v61, %s4142_s29  ;;  %v3381_v61 = vpack.c.bf16 %v3369_v49, %v3366_v53  ;;  %v3264_v52 = vsel %vm998_vm8, %v3257_v56, %v3263_v33  ;;  %v3593_v56 = vpop.permute.xlu0 %3592  ;;  %v3764_v49 = vld [vmem:[%s5781_s9 + $0x8] sm:$0xff] }
 0x5c2   : > { %3285 = vrot.lane.b32.xlu0 %v3262_v1, %s4142_s29  ;;  %v3603_v51 = vmul.f32 %v3593_v56, %v4469_v8  ;;  %v3612_v34 = vmul.f32 %v3593_v56, %v4850_v30  ;;  %v3618_v7 = vmul.f32 %v3593_v56, %v5395_v5 }
 0x5c4   : > { %v3630_v59 = vpack.c.bf16 %v3618_v7, %v3618_v7  ;;  %v3728_v7 = vld [vmem:[#allocation3 + $0xe8] sm:$0xff] }
 0x5c5   : > { %3106 = vrot.lane.b32.xlu1 %v3083_v25, %s4145_s24  ;;  %s5805_s24 = sshll.u32 %s5807_s22, 4 }
 0x5c6   : > { %3403 = vrot.lane.b32.xlu0 %v3377_v43, %s4144_s19 }
 0x5c9   : > { %3401 = vrot.lane.b32.xlu1 %v3376_v17, %s4144_s19 }
 0x5ca   : > { %3407 = vrot.lane.b32.xlu0 %v3379_v45, %s4144_s19 }
 0x5cd   : > { %3399 = vrot.lane.b32.xlu1 %v3375_v36, %s4144_s19 }
 0x5ce   : > { %3405 = vrot.lane.b32.xlu0 %v3378_v23, %s4144_s19 }
 0x5d1   : > { %3409 = vrot.lane.b32.xlu1 %v3377_v43, %s4144_s19 }
 0x5d2   : > { %3415 = vrot.lane.b32.xlu0 %v3377_v43, %s4144_s19 }
 0x5d5   : > { %3413 = vrot.lane.b32.xlu1 %v5799_v21, %s4144_s19  ;;  %v3938_v21 = vld [vmem:[%s5783_s11] sm:$0xff] }
 0x5d6   : > { %3419 = vrot.lane.b32.xlu0 %v3385_v58, %s4144_s19 }
 0x5d9   : > { %3411 = vrot.lane.b32.xlu1 %v3381_v61, %s4144_s19 }
 0x5da   : > { %3515 = vrot.lane.b32.xlu0 %v4516_v42, %s5792_s13  ;;  %v5597_v42 = vpop.permute.xlu1 %3096 }
 0x5dd   : > { %3421 = vrot.lane.b32.xlu1 %v3377_v43, %s4144_s19  ;;  %v3600_v43 = vmul.f32 %v5245_v27, %v3593_v56  ;;  %v5629_v27 = vpop.permute.xlu0 %3102 }
 0x5de   : > { %3287 = vrot.lane.b32.xlu0 %v3264_v52, %s4142_s29  ;;  %v3595_v0 = vpop.permute.xlu1 %3594 }
 0x5df   : > { %v3602_v1 = vmul.f32 0.0, %v3595_v0 }
 0x5e1   : > { %3517 = vrot.lane.b32.xlu1 %v4297_v29, %s5792_s13 }
 0x5e2   : > { %3417 = vrot.lane.b32.xlu0 %v3384_v57, %s4144_s19  ;;  %s413_s19 = scalar_lea.vmem %s5784_s12, %s5805_s24 }
 0x5e5   : > { %3513 = vrot.lane.b32.xlu1 %v4489_v24, %s5792_s13  ;;  %v3596_v24 = vsel %vm520_vm6, %v3593_v56, %v3595_v0 }
 0x5e6   : > { %3521 = vrot.lane.b32.xlu0 %v4905_v32, %s5792_s13  ;;  %v3601_v32 = vmul.f32 %v5238_v63, %v3596_v24  ;;  %v3607_v2 = vmul.f32 %v3596_v24, %v4496_v31  ;;  %v3616_v8 = vmul.f32 %v3596_v24, %v5376_v60  ;;  %v3619_v17 = vmul.f32 %v3596_v24, %v5397_v37 }
 0x5e8   : > { %v3631_v45 = vpack.c.bf16 %v3619_v17, %v3619_v17  ;;  %v5802_v17 = vld [vmem:[#allocation5_spill] sm:$0xff] }
 0x5e9   : > { %3523 = vrot.lane.b32.xlu1 %v4297_v29, %s5792_s13 }
 0x5ea   : > { %3519 = vrot.lane.b32.xlu0 %v4894_v18, %s5792_s13  ;;  %v3604_v18 = vmul.f32 %v3596_v24, %v4471_v13  ;;  %v3621_v13 = vpack.c.bf16 %v3603_v51, %v3600_v43 }
 0x5ed   : > { %3527 = vrot.lane.b32.xlu1 %v5461_v19, %s5792_s13  ;;  %v3622_v19 = vpack.c.bf16 %v3604_v18, %v3601_v32 }
 0x5ee   : > { %3529 = vrot.lane.b32.xlu0 %v4297_v29, %s5792_s13 }
 0x5f1   : > { %3525 = vrot.lane.b32.xlu1 %v5429_v14, %s5792_s13  ;;  %v3623_v14 = vpack.c.bf16 %v3602_v1, %v3602_v1 }
 0x5f2   : > { %3533 = vrot.lane.b32.xlu0 %v5496_v20, %s5792_s13  ;;  %v3610_v20 = vmul.f32 %v3596_v24, %v4847_v28  ;;  %v3613_v28 = vmul.f32 %v3596_v24, %v4868_v46 }
 0x5f4   : > { %v3625_v63 = vpack.c.bf16 %v3610_v20, %v3607_v2  ;;  %v3628_v47 = vpack.c.bf16 %v3616_v8, %v3613_v28 }
 0x5f5   : > { %3535 = vrot.lane.b32.xlu1 %v4297_v29, %s5792_s13  ;;  %v3606_v29 = vmul.f32 %v3593_v56, %v4486_v22  ;;  %v3615_v22 = vmul.f32 %v3593_v56, %v5373_v41 }
 0x5f6   : > { %3531 = vrot.lane.b32.xlu0 %v5489_v12, %s5792_s13  ;;  %v3609_v12 = vmul.f32 %v3593_v56, %v4844_v15 }
 0x5f7   : > { %v3627_v11 = vpack.c.bf16 %v3615_v22, %v3612_v34 }
 0x5f8   : > { %v3624_v31 = vpack.c.bf16 %v3609_v12, %v3606_v29  ;;  %v5800_v29 = vld [vmem:[#allocation4_spill] sm:$0xff] }
 0x5f9   : > { %3647 = vrot.lane.b32.xlu1 %v3622_v19, %s4143_s30 }
 0x5fa   : > { %3649 = vrot.lane.b32.xlu0 %v3623_v14, %s4143_s30 }
 0x5fd   : > { %3645 = vrot.lane.b32.xlu1 %v3621_v13, %s4143_s30 }
 0x5fe   : > { %3653 = vrot.lane.b32.xlu0 %v3625_v63, %s4143_s30 }
 0x601   : > { %3655 = vrot.lane.b32.xlu1 %v3623_v14, %s4143_s30 }
 0x602   : > { %3651 = vrot.lane.b32.xlu0 %v3624_v31, %s4143_s30 }
 0x603   : > { %v2700_v25 = vpop.permute.xlu1 %2699 }
 0x604   : > { %v2713_v15 = vsel %vm520_vm6, %v5323_v48, %v2700_v25  ;;  %v2702_v3 = vpop.permute.xlu0 %2701 }
 0x605   : > { %2729 = vst [vmem:[#allocation3 + $0x20] sm:$0xff] %v2713_v15  ;;  %v2714_v60 = vsel %vm520_vm6, %v2700_v25, %v2702_v3  ;;  %3659 = vrot.lane.b32.xlu1 %v3628_v47, %s4143_s30 }
 0x606   : > { %2730 = vst [vmem:[#allocation3 + $0x28] sm:$0xff] %v2714_v60  ;;  %3661 = vrot.lane.b32.xlu0 %v3623_v14, %s4143_s30  ;;  %3799 = vmatprep.subr.bf16.mxu1 %v2714_v60 }
 0x607   : > { %v2946_v46 = vpop.permute.xlu1 %2945  ;;  %3800 = vmatpush1.bf16.msra.mxu1 %v2713_v15  ;;  %v5801_v15 = vld [vmem:[#allocation6_spill] sm:$0xff] }
 0x608   : > { %v5644_v48 = vsel %vm590_vm1, %v5359_v38, %v2946_v46  ;;  %v2948_v41 = vpop.permute.xlu0 %2947 }
 0x609   : > { %v5648_v44 = vsel %vm590_vm1, %v2946_v46, %v2948_v41  ;;  %3657 = vrot.lane.b32.xlu1 %v3627_v11, %s4143_s30 }
 0x60a   : > { %3665 = vrot.lane.b32.xlu0 %v3631_v45, %s4143_s30 }
 0x60b   : > { %v2814_v30 = vpop.permute.xlu1 %2813 }
 0x60c   : > { %v2827_v36 = vsel %vm545_vm4, %v5339_v16, %v2814_v30  ;;  %v2706_v23 = vpop.permute.xlu0 %2705 }
 0x60d   : > { %v2715_v38 = vsel %vm520_vm6, %v5325_v50, %v2706_v23  ;;  %3667 = vrot.lane.b32.xlu1 %v3623_v14, %s4143_s30 }
 0x60e   : > { %2731 = vst [vmem:[#allocation3 + $0x30] sm:$0xf] %v2715_v38  ;;  %3663 = vrot.lane.b32.xlu0 %v3630_v59, %s4143_s30  ;;  %v3730_v59 = vld [vmem:[#allocation3 + $0xf8] sm:$0xff] }
 0x60f   : > { %v2708_v26 = vpop.permute.xlu1 %2707 }
 0x610   : > { %v2716_v16 = vsel %vm520_vm6, %v2706_v23, %v2708_v26  ;;  %v2816_v58 = vpop.permute.xlu0 %2815  ;;  %v3727_v23 = vld [vmem:[#allocation3 + $0xe0] sm:$0xff] }
 0x611   : > { %2732 = vst [vmem:[#allocation3 + $0x38] sm:$0xf] %v2716_v16  ;;  %v2828_v50 = vsel %vm545_vm4, %v2814_v30, %v2816_v58  ;;  %3767 = vperm.xlu1 %4113, %v3763_v35   ;;  %v4122_v16 = vld [vmem:[%s5780_s8] ss:$16 sps:$4 sm:$0xff]   ;;  %v4127_v58 = vld [vmem:[%s5780_s8 + $0xc] ss:$16 sps:$4 sm:$0xff]  }
 0x612   : > { %3772 = vperm.xlu0 %4112, %v3764_v49   ;;  %v3729_v49 = vld [vmem:[#allocation3 + $0xf0] sm:$0xff] }
 0x613   : > { %v2954_v53 = vpop.permute.xlu1 %2953 }
 0x614   : > { %v2952_v40 = vpop.permute.xlu0 %2951 }
 0x615   : > { %v2961_v61 = vsel %vm590_vm1, %v5361_v4, %v2952_v40  ;;  %v2962_v33 = vsel %vm590_vm1, %v2952_v40, %v2954_v53  ;;  %3941 = vperm.xlu1 %4113, %v3938_v21   ;;  %v3705_v24 = vld [vmem:[#allocation3 + $0x30] sm:$0xff]  ;;  %v5803_v21 = vld [vmem:[#allocation8_spill] sm:$0xff] }
 0x616   : > { %2977 = vst [vmem:[#allocation3 + $0xa0] sm:$0xf] %v2961_v61  ;;  %2978 = vst [vmem:[#allocation3 + $0xa8] sm:$0xf] %v2962_v33  ;;  %v5804_v61 = vld [vmem:[#allocation7_spill] sm:$0xff] }
 0x617   : > { %v3099_v62 = vpop.permute.xlu1 %3098 }
 0x618   : > { %v3112_v52 = vsel %vm637_vm5, %v5597_v42, %v3099_v62  ;;  %v2820_v57 = vpop.permute.xlu0 %2819  ;;  %v3706_v0 = vld [vmem:[#allocation3 + $0x38] sm:$0xff] }
 0x619   : > { %3128 = vst [vmem:[#allocation3 + $0xc0] sm:$0xff] %v3112_v52  ;;  %v2829_v56 = vsel %vm545_vm4, %v5341_v6, %v2820_v57  ;;  %3801 = vmatprep.subr.bf16.mxu1 %v3706_v0 }
 0x61a   : > { %3802 = vmatpush1.bf16.msra.mxu1 %v3705_v24 }
 0x61b   : > { %v2822_v32 = vpop.permute.xlu1 %2821  ;;  %3803 = vmatprep.subr.bf16.mxu1 %v5334_v55 }
 0x61c   : > { %v2830_v4 = vsel %vm545_vm4, %v2820_v57, %v2822_v32  ;;  %v3272_v18 = vpop.permute.xlu0 %3271 }
 0x61d   : > { %v3719_v47 = vld [vmem:[#allocation3 + $0xa0] sm:$0xff] }
 0x61e   : > { %3804 = vmatpush1.bf16.msra.mxu1 %v5330_v10 }
 0x61f   : > { %v3270_v1 = vpop.permute.xlu1 %3269  ;;  %3805 = vmatprep.subr.bf16.mxu1 %v2828_v50 }
 0x620   : > { %v3292_v42 = vsel %vm614_vm3, %v3270_v1, %v3272_v18  ;;  %v3276_v19 = vpop.permute.xlu0 %3275 }
 0x621   : > { %3308 = vst [vmem:[#allocation3 + $0x118] sm:$0xf0] %v3292_v42 }
 0x622   : > { %3806 = vmatpush1.bf16.msra.mxu1 %v2827_v36 }
 0x623   : > { %v3268_v43 = vpop.permute.xlu1 %3267  ;;  %3807 = vmatprep.subr.bf16.mxu1 %v2830_v4 }
 0x624   : > { %v3291_v6 = vsel %vm614_vm3, %v3268_v43, %v3270_v1  ;;  %v3274_v51 = vpop.permute.xlu0 %3273 }
 0x625   : > { %3307 = vst [vmem:[#allocation3 + $0x110] sm:$0xf0] %v3291_v6  ;;  %v5682_v55 = vsel %vm614_vm3, %v3274_v51, %v3276_v19 }
 0x626   : > { %3808 = vmatpush1.bf16.msra.mxu1 %v2829_v56 }
 0x627   : > { %v3278_v14 = vpop.permute.xlu1 %3277  ;;  %3809 = vmatprep.subr.bf16.mxu1 %v5346_v39 }
 0x628   : > { %v5686_v10 = vsel %vm614_vm3, %v3276_v19, %v3278_v14  ;;  %v3284_v2 = vpop.permute.xlu0 %3283  ;;  %v3734_v33 = vld [vmem:[#allocation3 + $0x118] sm:$0xff] }
 0x62a   : > { %3810 = vmatpush1.bf16.msra.mxu1 %v5350_v54  ;;  %v3720_v54 = vld [vmem:[#allocation3 + $0xa8] sm:$0xff] }
 0x62b   : > { %v3280_v20 = vpop.permute.xlu1 %3279  ;;  %3811 = vmatprep.subr.bf16.mxu1 %v5357_v9 }
 0x62c   : > { %v3101_v13 = vpop.permute.xlu0 %3100  ;;  %v3733_v24 = vld [vmem:[#allocation3 + $0x110] sm:$0xff] }
 0x62d   : > { %v3113_v63 = vsel %vm637_vm5, %v3099_v62, %v3101_v13 }
 0x62e   : > { %3129 = vst [vmem:[#allocation3 + $0xc8] sm:$0xff] %v3113_v63  ;;  %3812 = vmatpush1.bf16.msra.mxu1 %v5800_v29 }
 0x62f   : > { %v5692_v12 = vpop.permute.xlu1 %3289  ;;  %3813 = vmatprep.subr.bf16.mxu1 %v5648_v44 }
 0x630   : > { %v3105_v39 = vpop.permute.xlu0 %3104 }
 0x631   : > { %v3114_v8 = vsel %vm637_vm5, %v5629_v27, %v3105_v39 }
 0x632   : > { %3130 = vst [vmem:[#allocation3 + $0xd0] sm:$0xff] %v3114_v8  ;;  %3814 = vmatpush1.bf16.msra.mxu1 %v5644_v48 }
 0x633   : > { %v3282_v31 = vpop.permute.xlu1 %3281  ;;  %3815 = vmatprep.subr.bf16.mxu1 %v3720_v54 }
 0x634   : > { %v5699_v9 = vsel %vm614_vm3, %v3280_v20, %v3282_v31  ;;  %v5702_v28 = vsel %vm614_vm3, %v3282_v31, %v3284_v2  ;;  %v3286_v25 = vpop.permute.xlu0 %3285 }
 0x636   : > { %3816 = vmatpush1.bf16.msra.mxu1 %v3719_v47 }
 0x637   : > { %v3107_v22 = vpop.permute.xlu1 %3106  ;;  %3817 = vmatprep.subr.bf16.mxu1 %v5801_v15 }
 0x638   : > { %v3115_v27 = vsel %vm637_vm5, %v3105_v39, %v3107_v22  ;;  %v3404_v3 = vpop.permute.xlu0 %3403 }
 0x639   : > { %3131 = vst [vmem:[#allocation3 + $0xd8] sm:$0xff] %v3115_v27 }
 0x63a   : > { %3818 = vmatpush1.bf16.msra.mxu1 %v5802_v17 }
 0x63b   : > { %v3402_v60 = vpop.permute.xlu1 %3401  ;;  %3819 = vmatprep.subr.bf16.mxu1 %v3113_v63 }
 0x63c   : > { %v5708_v34 = vsel %vm570_vm2, %v3402_v60, %v3404_v3  ;;  %v3408_v46 = vpop.permute.xlu0 %3407 }
 0x63e   : > { %3820 = vmatpush1.bf16.msra.mxu1 %v3112_v52 }
 0x63f   : > { %v3400_v11 = vpop.permute.xlu1 %3399  ;;  %3821 = vmatprep.subr.bf16.mxu1 %v3115_v27 }
 0x640   : > { %v5711_v48 = vsel %vm570_vm2, %v3400_v11, %v3402_v60  ;;  %v3406_v41 = vpop.permute.xlu0 %3405 }
 0x641   : > { %v5714_v45 = vsel %vm570_vm2, %v3406_v41, %v3408_v46 }
 0x642   : > { %3441 = vst [vmem:[#allocation3 + $0x160] sm:$0xff] %v5714_v45  ;;  %3822 = vmatpush1.bf16.msra.mxu1 %v3114_v8 }
 0x643   : > { %v3410_v44 = vpop.permute.xlu1 %3409  ;;  %3823 = vmatprep.subr.bf16.mxu1 %v3728_v7 }
 0x644   : > { %v3426_v30 = vsel %vm570_vm2, %v3408_v46, %v3410_v44  ;;  %v3416_v36 = vpop.permute.xlu0 %3415 }
 0x645   : > { %3442 = vst [vmem:[#allocation3 + $0x168] sm:$0xff] %v3426_v30 }
 0x646   : > { %3824 = vmatpush1.bf16.msra.mxu1 %v3727_v23 }
 0x647   : > { %v3414_v38 = vpop.permute.xlu1 %3413  ;;  %3825 = vmatprep.subr.bf16.mxu1 %v3730_v59 }
 0x648   : > { %v3428_v35 = vsel %vm570_vm2, %v3414_v38, %v3416_v36  ;;  %v3420_v26 = vpop.permute.xlu0 %3419 }
 0x64a   : > { %3826 = vmatpush1.bf16.msra.mxu1 %v3729_v49 }
 0x64b   : > { %v3412_v50 = vpop.permute.xlu1 %3411  ;;  %3838 = vmatprep.subr.bf16.mxu1 %v5803_v21 }
 0x64c   : > { %v3427_v53 = vsel %vm570_vm2, %v3412_v50, %v3414_v38  ;;  %v3516_v40 = vpop.permute.xlu0 %3515 }
 0x64d   : > { %3828 = vmatmul.mubr.bf16.vlgmr.msra.gmra.mrb[4].mxu1 %v4122_v16 }
 0x64e   : > { %3839 = vmatpush1.bf16.msra.mxu1 %v5804_v61  ;;  %3870 = vmatprep.mubr.bf16.mxu1 %v4127_v58 }
 0x64f   : > { %v3422_v62 = vpop.permute.xlu1 %3421  ;;  %3840 = vmatprep.subr.bf16.mxu1 %v3734_v33 }
 0x650   : > { %v3430_v52 = vsel %vm570_vm2, %v3420_v26, %v3422_v62  ;;  %v3288_v57 = vpop.permute.xlu0 %3287 }
 0x651   : > { %3446 = vst [vmem:[#allocation3 + $0x188] sm:$0xf] %v3430_v52  ;;  %v3297_v0 = vsel %vm614_vm3, %v3286_v25, %v3288_v57  ;;  %v3298_v56 = vsel %vm614_vm3, %v3288_v57, %v5692_v12 }
 0x652   : > { %3841 = vmatpush1.bf16.msra.mxu1 %v3733_v24 }
 0x653   : > { %v3518_v32 = vpop.permute.xlu1 %3517  ;;  %3842 = vmatprep.subr.bf16.mxu1 %v5686_v10 }
 0x654   : > { %v3538_v4 = vsel %vm759_vm7, %v3516_v40, %v3518_v32  ;;  %v3418_v18 = vpop.permute.xlu0 %3417  ;;  %v4152_v32 = vmov 0.0  }
 0x655   : > { %3554 = vst [vmem:[#allocation3 + $0x188] sm:$0xf0] %v3538_v4  ;;  %v3429_v1 = vsel %vm570_vm2, %v3418_v18, %v3420_v26 }
 0x656   : > { %3445 = vst [vmem:[#allocation3 + $0x180] sm:$0xf] %v3429_v1  ;;  %3843 = vmatpush1.bf16.msra.mxu1 %v5682_v55  ;;  %v3937_v1 = vld [vmem:[%s5782_s10] sm:$0xf] }
 0x657   : > { %v3514_v42 = vpop.permute.xlu1 %3513  ;;  %3844 = vmatprep.subr.bf16.mxu1 %v5702_v28 }
 0x658   : > { %v3537_v19 = vsel %vm759_vm7, %v3514_v42, %v3516_v40  ;;  %v3522_v43 = vpop.permute.xlu0 %3521 }
 0x659   : > { %3553 = vst [vmem:[#allocation3 + $0x180] sm:$0xf0] %v3537_v19 }
 0x65a   : > { %3845 = vmatpush1.bf16.msra.mxu1 %v5699_v9 }
 0x65b   : > { %v3524_v6 = vpop.permute.xlu1 %3523  ;;  %3846 = vmatprep.subr.bf16.mxu1 %v3298_v56 }
 0x65c   : > { %v3540_v51 = vsel %vm759_vm7, %v3522_v43, %v3524_v6  ;;  %v3520_v14 = vpop.permute.xlu0 %3519  ;;  %v3748_v31 = vld [vmem:[#allocation3 + $0x188] sm:$0xff] }
 0x65d   : > { %v3539_v10 = vsel %vm759_vm7, %v3520_v14, %v3522_v43 }
 0x65e   : > { %3847 = vmatpush1.bf16.msra.mxu1 %v3297_v0 }
 0x65f   : > { %v3528_v2 = vpop.permute.xlu1 %3527  ;;  %3848 = vmatprep.subr.bf16.mxu1 %v5708_v34 }
 0x660   : > { %v3530_v55 = vpop.permute.xlu0 %3529  ;;  %v3747_v47 = vld [vmem:[#allocation3 + $0x180] sm:$0xff] }
 0x661   : > { %v3542_v20 = vsel %vm759_vm7, %v3528_v2, %v3530_v55 }
 0x662   : > { %3849 = vmatpush1.bf16.msra.mxu1 %v5711_v48 }
 0x663   : > { %v3526_v13 = vpop.permute.xlu1 %3525  ;;  %3850 = vmatprep.subr.bf16.mxu1 %v3426_v30 }
 0x664   : > { %v3541_v63 = vsel %vm759_vm7, %v3526_v13, %v3528_v2  ;;  %v3534_v29 = vpop.permute.xlu0 %3533 }
 0x666   : > { %3851 = vmatpush1.bf16.msra.mxu1 %v5714_v45 }
 0x667   : > { %v3536_v12 = vpop.permute.xlu1 %3535  ;;  %3852 = vmatprep.subr.bf16.mxu1 %v3428_v35  ;;  %v4125_v35 = vld [vmem:[%s5780_s8 + $0x8] ss:$16 sps:$4 sm:$0xff]  }
 0x668   : > { %v3544_v39 = vsel %vm759_vm7, %v3534_v29, %v3536_v12  ;;  %v3532_v8 = vpop.permute.xlu0 %3531 }
 0x669   : > { %v3543_v54 = vsel %vm759_vm7, %v3532_v8, %v3534_v29 }
 0x66a   : > { %3853 = vmatpush1.bf16.msra.mxu1 %v3427_v53 }
 0x66b   : > { %v3648_v9 = vpop.permute.xlu1 %3647  ;;  %3854 = vmatprep.subr.bf16.mxu1 %v3748_v31 }
 0x66c   : > { %v3650_v28 = vpop.permute.xlu0 %3649 }
 0x66d   : > { %v3670_v25 = vsel %vm500_vm0, %v3648_v9, %v3650_v28 }
 0x66e   : > { %3855 = vmatpush1.bf16.msra.mxu1 %v3747_v47 }
 0x66f   : > { %v3646_v22 = vpop.permute.xlu1 %3645  ;;  %3856 = vmatprep.subr.bf16.mxu1 %v3540_v51 }
 0x670   : > { %v3669_v15 = vsel %vm500_vm0, %v3646_v22, %v3648_v9  ;;  %v3654_v27 = vpop.permute.xlu0 %3653 }
 0x672   : > { %3857 = vmatpush1.bf16.msra.mxu1 %v3539_v10 }
 0x673   : > { %v3656_v3 = vpop.permute.xlu1 %3655  ;;  %3858 = vmatprep.subr.bf16.mxu1 %v3542_v20 }
 0x674   : > { %v3672_v17 = vsel %vm500_vm0, %v3654_v27, %v3656_v3  ;;  %v3652_v60 = vpop.permute.xlu0 %3651 }
 0x675   : > { %v3671_v34 = vsel %vm500_vm0, %v3652_v60, %v3654_v27 }
 0x676   : > { %3859 = vmatpush1.bf16.msra.mxu1 %v3541_v63 }
 0x677   : > { %v3660_v46 = vpop.permute.xlu1 %3659  ;;  %3860 = vmatprep.subr.bf16.mxu1 %v3544_v39 }
 0x678   : > { %v3662_v11 = vpop.permute.xlu0 %3661 }
 0x679   : > { %v3674_v48 = vsel %vm500_vm0, %v3660_v46, %v3662_v11 }
 0x67a   : > { %3861 = vmatpush1.bf16.msra.mxu1 %v3543_v54 }
 0x67b   : > { %v3658_v41 = vpop.permute.xlu1 %3657  ;;  %3862 = vmatprep.subr.bf16.mxu1 %v3670_v25 }
 0x67c   : > { %v3673_v45 = vsel %vm500_vm0, %v3658_v41, %v3660_v46  ;;  %v3666_v7 = vpop.permute.xlu0 %3665 }
 0x67e   : > { %3863 = vmatpush1.bf16.msra.mxu1 %v3669_v15 }
 0x67f   : > { %v3668_v44 = vpop.permute.xlu1 %3667  ;;  %3864 = vmatprep.subr.bf16.mxu1 %v3672_v17 }
 0x680   : > { %v3676_v30 = vsel %vm500_vm0, %v3666_v7, %v3668_v44  ;;  %v3664_v36 = vpop.permute.xlu0 %3663 }
 0x681   : > { %3692 = vst [vmem:[#allocation3 + $0x1f8] sm:$0xf] %v3676_v30  ;;  %v3675_v23 = vsel %vm500_vm0, %v3664_v36, %v3666_v7 }
 0x682   : > { %3691 = vst [vmem:[#allocation3 + $0x1f0] sm:$0xf] %v3675_v23  ;;  %3865 = vmatpush1.bf16.msra.mxu1 %v3671_v34 }
 0x683   : > { %3866 = vmatprep.subr.bf16.mxu1 %v3674_v48 }
 0x686   : > { %3867 = vmatpush1.bf16.msra.mxu1 %v3673_v45 }
 0x688   : > { %v3762_v59 = vld [vmem:[#allocation3 + $0x1f8] sm:$0xff] }
 0x689   : > { %3868 = vmatprep.subr.bf16.mxu1 %v3762_v59  ;;  %v3761_v38 = vld [vmem:[#allocation3 + $0x1f0] sm:$0xff] }
 0x68a   : > { %3869 = vmatpush1.bf16.msra.mxu1 %v3761_v38 }
 0x68d   : > { %3871 = vmatmul.mubr.bf16.vlgmr.msra.gmra.mrb[4].mxu1 %v4125_v35 }
 0x690   : > { %v3768_v26 = vpop.permute.xlu1 %3767 }
 0x691   : > { %v3773_v50 = vpop.permute.xlu0 %3772 }
 0x694   : > { %v3942_v42 = vpop.permute.xlu1 %3941 }
 0x760   : > { %v3872_v49 = vpop.f32.mrb[4].mxu1 }
 0x761   : > { %v4081_v16 = vadd.f32 %v3872_v49, %v3768_v26  ;;  %v3874_v58 = vpop.f32.mrb[5].mxu1 }
 0x762   : > { %v4082_v21 = vadd.f32 %v3874_v58, %v3768_v26  ;;  %v3876_v53 = vpop.f32.mrb[6].mxu1 }
 0x763   : > { %v3881_v40 = vmax.f32 %v4081_v16, 0.0  ;;  %v4083_v61 = vadd.f32 %v3876_v53, %v3773_v50  ;;  %v3878_v33 = vpop.f32.mrb[7].mxu1 }
 0x764   : > { %v3882_v62 = vmax.f32 %v4082_v21, 0.0  ;;  %v4084_v52 = vadd.f32 %v3878_v33, %v3773_v50 }
 0x765   : > { %v3927_v56 = vpack.c.bf16 %v3881_v40, %v5395_v5  ;;  %v3883_v24 = vmax.f32 %v4083_v61, 0.0 }
 0x766   : > { %v3928_v57 = vpack.c.bf16 %v3882_v62, %v5397_v37  ;;  %v3884_v0 = vmax.f32 %v4084_v52, 0.0 }
 0x767   : > { %v3929_v18 = vpack.c.bf16 %v4152_v32, %v3883_v24 }
 0x768   : > { %v3930_v4 = vpack.c.bf16 %v4152_v32, %v3884_v0  ;;  %3950 = vmatprep.subr.bf16.mxu0 %v3928_v57 }
 0x769   : > { %3951 = vmatpush1.bf16.msra.mxu0 %v3927_v56 }
 0x76a   : > { %3952 = vmatprep.subr.bf16.mxu0 %v3930_v4 }
 0x76d   : > { %3953 = vmatpush1.bf16.msra.mxu0 %v3929_v18 }
 0x770   : > { %3977 = vmatmul.mubr.bf16.vlgmr.msra.gmra.mrb[8].mxu0 %v3937_v1 }
 0x843   : > { %v3978_v5 = vpop.f32.mrb[8].mxu0 }
 0x844   : > { %v3979_v37 = vadd.f32 %v3978_v5, %v3942_v42  ;;  %v3980_v19 = vpop.f32.mrb[9].mxu0 }
 0x845   : > { %v3981_v43 = vadd.f32 %v3980_v19, %v3942_v42  ;;  %v3982_v6 = vpop.f32.mrb[10].mxu0 }
 0x846   : > { %3985 = vst [vmem:[%s413_s19] sm:$0xff] %v3979_v37  ;;  %v3983_v51 = vpop.f32.mrb[11].mxu0 }
 0x847   : > { %3986 = vst [vmem:[%s413_s19 + $0x8] sm:$0xff] %v3981_v43 }
 0x848 PF: > { %s22_s21 = sadd.s32 1, %s4140_s21  }
 0x849   : > { %p19_p4 = scmp.ge.s32.totalorder %s22_s21, 4  }
 0x84b   :  { %21 = sbr.rel (!%p19_p4) target bundleno = 1 (0x1), region = 99 }

</bundles_post_ra>
